<compile_context>
chip_gen: v7x
topology: tpu7x:2x2x1
jax: 0.10.0
libtpu: 0.0.40
codegen_flags: <defaults>
</compile_context>

<pallas_src>
import functools

import jax
import jax.numpy as jnp
from jax import lax
from jax.experimental import pallas as pl
from jax.experimental.pallas import tpu as pltpu


# ---------------------------------------------------------------------------
# Kernel: one grid step = (batch b, q tile qi, kv tile ki).
# ---------------------------------------------------------------------------
def msa_flash_kernel(x_q_ref, x_kv_ref, w_qkv_ref, w_proj_ref, b_proj_ref, o_ref,
                     q_s, acc_s, attn_s, m_s, l_s,
                     *, num_heads, head_dim, scale):
    # x_q_ref:   (tq, C)   input rows for this q tile
    # x_kv_ref:  (tkv, C)  input rows for this kv tile
    # w_qkv_ref: (C, 3C)   bf16 qkv weight (x @ W layout)
    # w_proj_ref:(C, C)    bf16 proj weight (x @ W layout)
    # b_proj_ref:(1, C)    f32 proj bias
    # o_ref:     (tq, C)   output tile (written only at the last kv step)
    # q_s:   (tq, C) bf16  scaled q tile (persists across kv steps)
    # acc_s: (tq, C) f32   un-normalized attention accumulator
    # attn_s:(tq, C) f32   normalized attention output (proj input)
    # m_s:   (H, tq, 1) f32  running row max per head
    # l_s:   (H, tq, 1) f32  running row sum per head
    C = num_heads * head_dim
    ki = pl.program_id(2)
    nk = pl.num_programs(2)

    # ---- new (b, q-tile) block: project q and reset the online-softmax state.
    @pl.when(ki == 0)
    def _init():
        xq = x_q_ref[...].astype(jnp.bfloat16)                      # bf16 MXU operand
        q = jnp.dot(xq, w_qkv_ref[:, 0:C],
                    preferred_element_type=jnp.float32)             # f32 accumulation
        q_s[...] = (q * scale).astype(jnp.bfloat16)                 # scale folded into q
        m_s[...] = jnp.full(m_s.shape, -jnp.inf, dtype=m_s.dtype)
        l_s[...] = jnp.zeros(l_s.shape, dtype=l_s.dtype)
        acc_s[...] = jnp.zeros(acc_s.shape, dtype=acc_s.dtype)

    # ---- project K / V for this kv tile (bf16 operands, f32 accumulation).
    xkv = x_kv_ref[...].astype(jnp.bfloat16)
    k = jnp.dot(xkv, w_qkv_ref[:, C:2 * C],
                preferred_element_type=jnp.float32).astype(jnp.bfloat16)
    v = jnp.dot(xkv, w_qkv_ref[:, 2 * C:3 * C],
                preferred_element_type=jnp.float32).astype(jnp.bfloat16)

    # ---- per-head online softmax.  Heads live on static lane slabs of the (t, C)
    #      tiles so the final (tq, C) packing is free (no per-head HBM stores).
    for h in range(num_heads):
        lo = h * head_dim
        hi = lo + head_dim
        # q @ k^T without materializing a transpose: contract the last dims.
        s = lax.dot_general(q_s[:, lo:hi], k[:, lo:hi],
                            (((1,), (1,)), ((), ())),
                            preferred_element_type=jnp.float32)     # (tq, tkv) f32
        m_prev = m_s[h]                                             # (tq, 1) f32
        m_new = jnp.maximum(m_prev, jnp.max(s, axis=-1, keepdims=True))
        alpha = jnp.exp(m_prev - m_new)                             # f32 softmax stats
        p = jnp.exp(s - m_new)
        l_s[h] = alpha * l_s[h] + jnp.sum(p, axis=-1, keepdims=True)
        acc_s[:, lo:hi] = alpha * acc_s[:, lo:hi] + jnp.dot(
            p.astype(jnp.bfloat16), v[:, lo:hi],                    # bf16 MXU operands
            preferred_element_type=jnp.float32)
        m_s[h] = m_new

    # ---- last kv tile: normalize (exact division), fuse proj + bias, one
    #      lane-dense (tq, C) store.
    @pl.when(ki == nk - 1)
    def _finalize():
        for h in range(num_heads):
            lo = h * head_dim
            hi = lo + head_dim
            attn_s[:, lo:hi] = acc_s[:, lo:hi] / l_s[h]
        y = jnp.dot(attn_s[...].astype(jnp.bfloat16), w_proj_ref[...],
                    preferred_element_type=jnp.float32)
        o_ref[...] = (y + b_proj_ref[...]).astype(o_ref.dtype)


# ---------------------------------------------------------------------------
# Wrapper helpers
# ---------------------------------------------------------------------------
def _pick_tile(n, preferred=128):
    """Largest tile <= preferred that divides n (multiple of 8 unless it is n itself)."""
    if n <= preferred:
        return n
    for t in range(preferred, 7, -1):
        if n % t == 0 and t % 8 == 0:
            return t
    return n  # TODO(synk): pad ragged sequence lengths instead of falling back.


def _vmem_limit_bytes(C, tq, tkv, num_heads, x_bytes, out_bytes):
    """Scoped-VMEM limit from the actual working set, capped by device capacity."""
    bf16 = 2
    weights = (C * 3 * C + C * C) * bf16 * 2 + C * 4 * 2            # allow double buffers
    blocks = (tq * C + tkv * C) * x_bytes * 2 + tq * C * out_bytes * 2
    scratch = tq * C * (bf16 + 4 + 4) + 2 * num_heads * max(tq, 8) * 128 * 4
    transient = 2 * tkv * C * bf16 + 2 * tq * tkv * 4 + tq * 3 * C * 4
    working_set = weights + blocks + scratch + transient
    try:
        cap = int(pltpu.get_tpu_info().vmem_capacity_bytes * 0.9)   # per-generation cap
    except Exception:
        cap = 64 << 20                                              # safe on every gen
    return int(min(max(2 * working_set, 32 << 20), cap))


def _build_msa_call(B, N, C, num_heads, head_dim, scale, tq, tkv,
                    x_dtype, out_dtype, single_buffer_weights):
    n_q = N // tq
    n_kv = N // tkv
    kernel = functools.partial(msa_flash_kernel, num_heads=num_heads,
                               head_dim=head_dim, scale=scale)

    # Resident operands have a constant index_map -> single-buffer them when supported.
    wkw = dict(pipeline_mode=pl.Buffered(1)) if single_buffer_weights else {}

    x_isz = jnp.dtype(x_dtype).itemsize
    o_isz = jnp.dtype(out_dtype).itemsize
    flops = 2 * B * N * C * 3 * C + 4 * B * N * N * C + 2 * B * N * C * C
    transcendentals = B * num_heads * N * N
    bytes_accessed = (2 * B * N * C * x_isz            # x read via two views
                      + (3 * C * C + C * C) * 2 + C * 4
                      + B * N * C * o_isz)

    return pl.pallas_call(
        kernel,
        out_shape=jax.ShapeDtypeStruct((B, N, C), out_dtype),
        grid=(B, n_q, n_kv),
        in_specs=[
            pl.BlockSpec((None, tq, C), lambda b, qi, ki: (b, qi, 0)),    # x (q rows)
            pl.BlockSpec((None, tkv, C), lambda b, qi, ki: (b, ki, 0)),   # x (kv rows)
            pl.BlockSpec((C, 3 * C), lambda b, qi, ki: (0, 0), **wkw),    # w_qkv^T (bf16)
            pl.BlockSpec((C, C), lambda b, qi, ki: (0, 0), **wkw),        # w_proj^T (bf16)
            pl.BlockSpec((1, C), lambda b, qi, ki: (0, 0), **wkw),        # b_proj (f32)
        ],
        out_specs=pl.BlockSpec((None, tq, C), lambda b, qi, ki: (b, qi, 0)),
        scratch_shapes=[
            pltpu.VMEM((tq, C), jnp.bfloat16),              # q tile (scaled, bf16)
            pltpu.VMEM((tq, C), jnp.float32),               # f32 attention accumulator
            pltpu.VMEM((tq, C), jnp.float32),               # normalized attn (proj input)
            pltpu.VMEM((num_heads, tq, 1), jnp.float32),    # running row max per head
            pltpu.VMEM((num_heads, tq, 1), jnp.float32),    # running row sum per head
        ],
        compiler_params=pltpu.CompilerParams(
            dimension_semantics=("parallel", "parallel", "arbitrary"),
            vmem_limit_bytes=_vmem_limit_bytes(C, tq, tkv, num_heads, x_isz, o_isz)),
        cost_estimate=pl.CostEstimate(flops=flops,
                                      transcendentals=transcendentals,
                                      bytes_accessed=bytes_accessed),
    )


def msa_forward(x, w_qkv, w_proj, b_proj, num_heads):
    """MSA forward.  x: (B, N, C); w_qkv: (3C, C) (PyTorch nn.Linear layout);
    w_proj: (C, C); b_proj: (C,).  Output: (B, N, C) in x.dtype.
    Callers may pass bf16 x (and keep a bf16 output dtype) to also halve HBM traffic
    (v5e note); matmul operands are cast to bf16 inside the kernel either way."""
    B, N, C = x.shape
    assert C % num_heads == 0, "dim should be divisible by num_heads"
    head_dim = C // num_heads
    scale = head_dim ** (-0.5)

    tq = _pick_tile(N)
    tkv = _pick_tile(N)
    assert N % tq == 0 and N % tkv == 0  # TODO(synk): pad ragged N

    # nn.Linear computes x @ W.T — transpose the (tiny) weights once host-side and
    # cast them to bf16 so the MXU sees bf16 operands and resident VMEM halves.
    w_qkv_t = jnp.transpose(w_qkv).astype(jnp.bfloat16)     # (C, 3C)
    w_proj_t = jnp.transpose(w_proj).astype(jnp.bfloat16)   # (C, C)
    b_proj_2d = b_proj.reshape(1, C).astype(jnp.float32)    # added post-matmul in f32

    args = (x, x, w_qkv_t, w_proj_t, b_proj_2d)
    build = functools.partial(_build_msa_call, B, N, C, num_heads, head_dim, scale,
                              tq, tkv, x.dtype, x.dtype)
    try:
        return build(True)(*args)        # single-buffered resident weights
    except Exception:
        # pl.Buffered(1) not supported by this jax build -> default double buffering.
        return build(False)(*args)


# ---------------------------------------------------------------------------
# Pure-JAX reference (silent correctness check)
# ---------------------------------------------------------------------------
def msa_reference(x, w_qkv, w_proj, b_proj, num_heads):
    B, N, C = x.shape
    head_dim = C // num_heads
    scale = head_dim ** (-0.5)
    qkv = x @ w_qkv.T                                   # (B, N, 3C)
    qkv = qkv.reshape(B, N, 3, num_heads, head_dim)
    qkv = jnp.transpose(qkv, (2, 0, 3, 1, 4))
    q, k, v = qkv[0], qkv[1], qkv[2]
    attn = jnp.einsum("bhqd,bhkd->bhqk", q, k) * scale
    attn = jax.nn.softmax(attn, axis=-1)
    o = jnp.einsum("bhqk,bhkd->bhqd", attn, v)
    o = jnp.transpose(o, (0, 2, 1, 3)).reshape(B, N, C)
    return o @ w_proj.T + b_proj


# ---------------------------------------------------------------------------
if __name__ == "__main__":
    B, N, C = 2, 8, 32
    num_heads = 8  # module default; head_dim = 4

    key = jax.random.PRNGKey(0)
    kx, kq, kp, kb = jax.random.split(key, 4)

    x = jax.random.normal(kx, (B, N, C), dtype=jnp.float32)
    # Deterministic parameter init (nn.Linear weight layout is (out, in)).
    w_qkv = jax.random.normal(kq, (3 * C, C), dtype=jnp.float32) * 0.05   # qkv_bias=False
    w_proj = jax.random.normal(kp, (C, C), dtype=jnp.float32) * 0.05
    b_proj = jax.random.normal(kb, (C,), dtype=jnp.float32) * 0.05

    out = msa_forward(x, w_qkv, w_proj, b_proj, num_heads)
    out = jax.block_until_ready(out)

    ref = msa_reference(x, w_qkv, w_proj, b_proj, num_heads)
    assert out.shape == (B, N, C)
    # bf16 MXU operands (f32 accumulation, f32 softmax stats) => ~0.5% relative error
    # vs. the all-f32 reference at these magnitudes.
    assert jnp.allclose(out, ref, atol=2e-2, rtol=2e-2), "mismatch vs reference"

    print("KERNEL_OK")
</pallas_src>

<mosaic_0001>
module attributes {stable_mosaic.version = 11 : i64} {
  func.func @msa_flash_kernel(%arg0: i32, %arg1: i32, %arg2: i32, %arg3: memref<1x8x32xf32, #tpu.memory_space<vmem>>, %arg4: memref<1x8x32xf32, #tpu.memory_space<vmem>>, %arg5: memref<32x96xbf16, #tpu.memory_space<vmem>>, %arg6: memref<32x32xbf16, #tpu.memory_space<vmem>>, %arg7: memref<1x32xf32, #tpu.memory_space<vmem>>, %arg8: memref<1x8x32xf32, #tpu.memory_space<vmem>>, %arg9: memref<8x32xbf16, #tpu.memory_space<vmem>>, %arg10: memref<8x32xf32, #tpu.memory_space<vmem>>, %arg11: memref<8x32xf32, #tpu.memory_space<vmem>>, %arg12: memref<8x8x1xf32, #tpu.memory_space<vmem>>, %arg13: memref<8x8x1xf32, #tpu.memory_space<vmem>>) attributes {dimension_semantics = [#tpu.dimension_semantics<parallel>, #tpu.dimension_semantics<parallel>, #tpu.dimension_semantics<arbitrary>], iteration_bounds = array<i64: 2, 1, 1>, scalar_prefetch = 0 : i64, scratch_operands = 5 : i64, tpu.core_type = #tpu.core_type<tc>, window_params = [{transform_indices = @transform_0, window_bounds = array<i64: 1, 8, 32>}, {transform_indices = @transform_1, window_bounds = array<i64: 1, 8, 32>}, {pipeline_mode = #tpu.pipeline_mode<synchronous>, transform_indices = @transform_2, window_bounds = array<i64: 32, 96>}, {pipeline_mode = #tpu.pipeline_mode<synchronous>, transform_indices = @transform_3, window_bounds = array<i64: 32, 32>}, {pipeline_mode = #tpu.pipeline_mode<synchronous>, transform_indices = @transform_4, window_bounds = array<i64: 1, 32>}, {transform_indices = @transform_5, window_bounds = array<i64: 1, 8, 32>}]} {
    %c0_i32 = arith.constant 0 : i32
    %0 = arith.cmpi eq, %arg2, %c0_i32 : i32
    %1 = arith.extui %0 : i1 to i32
    %c0_i32_0 = arith.constant 0 : i32
    %2 = arith.cmpi ne, %1, %c0_i32_0 : i32
    scf.if %2 {
      %c0_171 = arith.constant 0 : index
      %c0_172 = arith.constant 0 : index
      %c0_173 = arith.constant 0 : index
      %279 = vector.load %arg3[%c0_171, %c0_172, %c0_173] : memref<1x8x32xf32, #tpu.memory_space<vmem>>, vector<1x8x32xf32>
      %280 = vector.shape_cast %279 : vector<1x8x32xf32> to vector<8x32xf32>
      %281 = arith.truncf %280 : vector<8x32xf32> to vector<8x32xbf16>
      %c0_174 = arith.constant 0 : index
      %c0_175 = arith.constant 0 : index
      %282 = vector.load %arg5[%c0_174, %c0_175] : memref<32x96xbf16, #tpu.memory_space<vmem>>, vector<32x32xbf16>
      %cst_176 = arith.constant dense<0.000000e+00> : vector<8x32xf32>
      %283 = tpu.matmul %281, %282, %cst_176 {dimension_numbers = #tpu.dot_dimension_numbers<[1], [0], [0], [1], [0, 0, 1, 1], [], []>} : vector<8x32xbf16>, vector<32x32xbf16>, vector<8x32xf32> -> vector<8x32xf32>
      %cst_177 = arith.constant 5.000000e-01 : f32
      %284 = vector.broadcast %cst_177 : f32 to vector<8x32xf32>
      %285 = arith.mulf %283, %284 : vector<8x32xf32>
      %286 = arith.truncf %285 : vector<8x32xf32> to vector<8x32xbf16>
      %c0_178 = arith.constant 0 : index
      %c0_179 = arith.constant 0 : index
      %287 = vector.load %arg9[%c0_178, %c0_179] : memref<8x32xbf16, #tpu.memory_space<vmem>>, vector<8x32xbf16>
      tpu.vector_store %arg9[%c0_178, %c0_179], %286 {strides = array<i32>} : memref<8x32xbf16, #tpu.memory_space<vmem>>, vector<8x32xbf16>,
      %cst_180 = arith.constant 0xFF800000 : f32
      %288 = vector.broadcast %cst_180 : f32 to vector<8x8x1xf32>
      %c0_181 = arith.constant 0 : index
      %c0_182 = arith.constant 0 : index
      %c0_183 = arith.constant 0 : index
      %289 = vector.load %arg12[%c0_181, %c0_182, %c0_183] : memref<8x8x1xf32, #tpu.memory_space<vmem>>, vector<8x8x1xf32>
      tpu.vector_store %arg12[%c0_181, %c0_182, %c0_183], %288 {strides = array<i32>} : memref<8x8x1xf32, #tpu.memory_space<vmem>>, vector<8x8x1xf32>,
      %cst_184 = arith.constant 0.000000e+00 : f32
      %290 = vector.broadcast %cst_184 : f32 to vector<8x8x1xf32>
      %c0_185 = arith.constant 0 : index
      %c0_186 = arith.constant 0 : index
      %c0_187 = arith.constant 0 : index
      %291 = vector.load %arg13[%c0_185, %c0_186, %c0_187] : memref<8x8x1xf32, #tpu.memory_space<vmem>>, vector<8x8x1xf32>
      tpu.vector_store %arg13[%c0_185, %c0_186, %c0_187], %290 {strides = array<i32>} : memref<8x8x1xf32, #tpu.memory_space<vmem>>, vector<8x8x1xf32>,
      %cst_188 = arith.constant 0.000000e+00 : f32
      %292 = vector.broadcast %cst_188 : f32 to vector<8x32xf32>
      %c0_189 = arith.constant 0 : index
      %c0_190 = arith.constant 0 : index
      %293 = vector.load %arg10[%c0_189, %c0_190] : memref<8x32xf32, #tpu.memory_space<vmem>>, vector<8x32xf32>
      tpu.vector_store %arg10[%c0_189, %c0_190], %292 {strides = array<i32>} : memref<8x32xf32, #tpu.memory_space<vmem>>, vector<8x32xf32>,
    } else {
    }
    %c0 = arith.constant 0 : index
    %c0_1 = arith.constant 0 : index
    %c0_2 = arith.constant 0 : index
    %3 = vector.load %arg4[%c0, %c0_1, %c0_2] : memref<1x8x32xf32, #tpu.memory_space<vmem>>, vector<1x8x32xf32>
    %4 = vector.shape_cast %3 : vector<1x8x32xf32> to vector<8x32xf32>
    %5 = arith.truncf %4 : vector<8x32xf32> to vector<8x32xbf16>
    %c0_3 = arith.constant 0 : index
    %c32 = arith.constant 32 : index
    %6 = vector.load %arg5[%c0_3, %c32] : memref<32x96xbf16, #tpu.memory_space<vmem>>, vector<32x32xbf16>
    %cst = arith.constant dense<0.000000e+00> : vector<8x32xf32>
    %7 = tpu.matmul %5, %6, %cst {dimension_numbers = #tpu.dot_dimension_numbers<[1], [0], [0], [1], [0, 0, 1, 1], [], []>} : vector<8x32xbf16>, vector<32x32xbf16>, vector<8x32xf32> -> vector<8x32xf32>
    %8 = arith.truncf %7 : vector<8x32xf32> to vector<8x32xbf16>
    %c0_4 = arith.constant 0 : index
    %c64 = arith.constant 64 : index
    %9 = vector.load %arg5[%c0_4, %c64] : memref<32x96xbf16, #tpu.memory_space<vmem>>, vector<32x32xbf16>
    %cst_5 = arith.constant dense<0.000000e+00> : vector<8x32xf32>
    %10 = tpu.matmul %5, %9, %cst_5 {dimension_numbers = #tpu.dot_dimension_numbers<[1], [0], [0], [1], [0, 0, 1, 1], [], []>} : vector<8x32xbf16>, vector<32x32xbf16>, vector<8x32xf32> -> vector<8x32xf32>
    %11 = arith.truncf %10 : vector<8x32xf32> to vector<8x32xbf16>
    %c0_6 = arith.constant 0 : index
    %c0_7 = arith.constant 0 : index
    %12 = vector.load %arg9[%c0_6, %c0_7] : memref<8x32xbf16, #tpu.memory_space<vmem>>, vector<8x4xbf16>
    %13 = vector.extract_strided_slice %8 {offsets = [0, 0], sizes = [8, 4], strides = [1, 1]} : vector<8x32xbf16> to vector<8x4xbf16>
    %cst_8 = arith.constant dense<0.000000e+00> : vector<8x8xf32>
    %14 = tpu.matmul %12, %13, %cst_8 {dimension_numbers = #tpu.dot_dimension_numbers<[1], [1], [0], [0], [0, 0, 1, 0], [], []>} : vector<8x4xbf16>, vector<8x4xbf16>, vector<8x8xf32> -> vector<8x8xf32>
    %c0_9 = arith.constant 0 : index
    %c0_10 = arith.constant 0 : index
    %c0_11 = arith.constant 0 : index
    %15 = vector.load %arg12[%c0_9, %c0_10, %c0_11] : memref<8x8x1xf32, #tpu.memory_space<vmem>>, vector<1x8x1xf32>
    %16 = vector.shape_cast %15 : vector<1x8x1xf32> to vector<8x1xf32>
    %cst_12 = arith.constant dense<0xFF800000> : vector<8xf32>
    %17 = vector.multi_reduction <maximumf>, %14, %cst_12 [1] : vector<8x8xf32> to vector<8xf32>
    %18 = vector.shape_cast %17 : vector<8xf32> to vector<8x1xf32>
    %19 = arith.maximumf %16, %18 : vector<8x1xf32>
    %20 = arith.subf %16, %19 : vector<8x1xf32>
    %21 = math.exp %20 : vector<8x1xf32>
    %22 = vector.broadcast %19 : vector<8x1xf32> to vector<8x8xf32>
    %23 = arith.subf %14, %22 : vector<8x8xf32>
    %24 = math.exp %23 : vector<8x8xf32>
    %c0_13 = arith.constant 0 : index
    %c0_14 = arith.constant 0 : index
    %c0_15 = arith.constant 0 : index
    %25 = vector.load %arg13[%c0_13, %c0_14, %c0_15] : memref<8x8x1xf32, #tpu.memory_space<vmem>>, vector<1x8x1xf32>
    %26 = vector.shape_cast %25 : vector<1x8x1xf32> to vector<8x1xf32>
    %27 = arith.mulf %21, %26 : vector<8x1xf32>
    %cst_16 = arith.constant dense<0.000000e+00> : vector<8xf32>
    %28 = vector.multi_reduction <add>, %24, %cst_16 [1] : vector<8x8xf32> to vector<8xf32>
    %29 = vector.shape_cast %28 : vector<8xf32> to vector<8x1xf32>
    %30 = arith.addf %27, %29 : vector<8x1xf32>
    %c0_17 = arith.constant 0 : index
    %c0_18 = arith.constant 0 : index
    %c0_19 = arith.constant 0 : index
    %31 = vector.load %arg13[%c0_17, %c0_18, %c0_19] : memref<8x8x1xf32, #tpu.memory_space<vmem>>, vector<1x8x1xf32>
    %32 = vector.shape_cast %31 : vector<1x8x1xf32> to vector<8x1xf32>
    %33 = vector.shape_cast %30 : vector<8x1xf32> to vector<1x8x1xf32>
    tpu.vector_store %arg13[%c0_17, %c0_18, %c0_19], %33 {strides = array<i32>} : memref<8x8x1xf32, #tpu.memory_space<vmem>>, vector<1x8x1xf32>,
    %c0_20 = arith.constant 0 : index
    %c0_21 = arith.constant 0 : index
    %34 = vector.load %arg10[%c0_20, %c0_21] : memref<8x32xf32, #tpu.memory_space<vmem>>, vector<8x4xf32>
    %35 = vector.broadcast %21 : vector<8x1xf32> to vector<8x4xf32>
    %36 = arith.mulf %35, %34 : vector<8x4xf32>
    %37 = arith.truncf %24 : vector<8x8xf32> to vector<8x8xbf16>
    %38 = vector.extract_strided_slice %11 {offsets = [0, 0], sizes = [8, 4], strides = [1, 1]} : vector<8x32xbf16> to vector<8x4xbf16>
    %cst_22 = arith.constant dense<0.000000e+00> : vector<8x4xf32>
    %39 = tpu.matmul %37, %38, %cst_22 {dimension_numbers = #tpu.dot_dimension_numbers<[1], [0], [0], [1], [0, 0, 1, 1], [], []>} : vector<8x8xbf16>, vector<8x4xbf16>, vector<8x4xf32> -> vector<8x4xf32>
    %40 = arith.addf %36, %39 : vector<8x4xf32>
    %c0_23 = arith.constant 0 : index
    %c0_24 = arith.constant 0 : index
    %41 = vector.load %arg10[%c0_23, %c0_24] : memref<8x32xf32, #tpu.memory_space<vmem>>, vector<8x4xf32>
    tpu.vector_store %arg10[%c0_23, %c0_24], %40 {strides = array<i32>} : memref<8x32xf32, #tpu.memory_space<vmem>>, vector<8x4xf32>,
    %c0_25 = arith.constant 0 : index
    %c0_26 = arith.constant 0 : index
    %c0_27 = arith.constant 0 : index
    %42 = vector.load %arg12[%c0_25, %c0_26, %c0_27] : memref<8x8x1xf32, #tpu.memory_space<vmem>>, vector<1x8x1xf32>
    %43 = vector.shape_cast %42 : vector<1x8x1xf32> to vector<8x1xf32>
    %44 = vector.shape_cast %19 : vector<8x1xf32> to vector<1x8x1xf32>
    tpu.vector_store %arg12[%c0_25, %c0_26, %c0_27], %44 {strides = array<i32>} : memref<8x8x1xf32, #tpu.memory_space<vmem>>, vector<1x8x1xf32>,
    %c0_28 = arith.constant 0 : index
    %c4 = arith.constant 4 : index
    %45 = vector.load %arg9[%c0_28, %c4] : memref<8x32xbf16, #tpu.memory_space<vmem>>, vector<8x4xbf16>
    %46 = vector.extract_strided_slice %8 {offsets = [0, 4], sizes = [8, 4], strides = [1, 1]} : vector<8x32xbf16> to vector<8x4xbf16>
    %cst_29 = arith.constant dense<0.000000e+00> : vector<8x8xf32>
    %47 = tpu.matmul %45, %46, %cst_29 {dimension_numbers = #tpu.dot_dimension_numbers<[1], [1], [0], [0], [0, 0, 1, 0], [], []>} : vector<8x4xbf16>, vector<8x4xbf16>, vector<8x8xf32> -> vector<8x8xf32>
    %c1 = arith.constant 1 : index
    %c0_30 = arith.constant 0 : index
    %c0_31 = arith.constant 0 : index
    %48 = vector.load %arg12[%c1, %c0_30, %c0_31] : memref<8x8x1xf32, #tpu.memory_space<vmem>>, vector<1x8x1xf32>
    %49 = vector.shape_cast %48 : vector<1x8x1xf32> to vector<8x1xf32>
    %cst_32 = arith.constant dense<0xFF800000> : vector<8xf32>
    %50 = vector.multi_reduction <maximumf>, %47, %cst_32 [1] : vector<8x8xf32> to vector<8xf32>
    %51 = vector.shape_cast %50 : vector<8xf32> to vector<8x1xf32>
    %52 = arith.maximumf %49, %51 : vector<8x1xf32>
    %53 = arith.subf %49, %52 : vector<8x1xf32>
    %54 = math.exp %53 : vector<8x1xf32>
    %55 = vector.broadcast %52 : vector<8x1xf32> to vector<8x8xf32>
    %56 = arith.subf %47, %55 : vector<8x8xf32>
    %57 = math.exp %56 : vector<8x8xf32>
    %c1_33 = arith.constant 1 : index
    %c0_34 = arith.constant 0 : index
    %c0_35 = arith.constant 0 : index
    %58 = vector.load %arg13[%c1_33, %c0_34, %c0_35] : memref<8x8x1xf32, #tpu.memory_space<vmem>>, vector<1x8x1xf32>
    %59 = vector.shape_cast %58 : vector<1x8x1xf32> to vector<8x1xf32>
    %60 = arith.mulf %54, %59 : vector<8x1xf32>
    %cst_36 = arith.constant dense<0.000000e+00> : vector<8xf32>
    %61 = vector.multi_reduction <add>, %57, %cst_36 [1] : vector<8x8xf32> to vector<8xf32>
    %62 = vector.shape_cast %61 : vector<8xf32> to vector<8x1xf32>
    %63 = arith.addf %60, %62 : vector<8x1xf32>
    %c1_37 = arith.constant 1 : index
    %c0_38 = arith.constant 0 : index
    %c0_39 = arith.constant 0 : index
    %64 = vector.load %arg13[%c1_37, %c0_38, %c0_39] : memref<8x8x1xf32, #tpu.memory_space<vmem>>, vector<1x8x1xf32>
    %65 = vector.shape_cast %64 : vector<1x8x1xf32> to vector<8x1xf32>
    %66 = vector.shape_cast %63 : vector<8x1xf32> to vector<1x8x1xf32>
    tpu.vector_store %arg13[%c1_37, %c0_38, %c0_39], %66 {strides = array<i32>} : memref<8x8x1xf32, #tpu.memory_space<vmem>>, vector<1x8x1xf32>,
    %c0_40 = arith.constant 0 : index
    %c4_41 = arith.constant 4 : index
    %67 = vector.load %arg10[%c0_40, %c4_41] : memref<8x32xf32, #tpu.memory_space<vmem>>, vector<8x4xf32>
    %68 = vector.broadcast %54 : vector<8x1xf32> to vector<8x4xf32>
    %69 = arith.mulf %68, %67 : vector<8x4xf32>
    %70 = arith.truncf %57 : vector<8x8xf32> to vector<8x8xbf16>
    %71 = vector.extract_strided_slice %11 {offsets = [0, 4], sizes = [8, 4], strides = [1, 1]} : vector<8x32xbf16> to vector<8x4xbf16>
    %cst_42 = arith.constant dense<0.000000e+00> : vector<8x4xf32>
    %72 = tpu.matmul %70, %71, %cst_42 {dimension_numbers = #tpu.dot_dimension_numbers<[1], [0], [0], [1], [0, 0, 1, 1], [], []>} : vector<8x8xbf16>, vector<8x4xbf16>, vector<8x4xf32> -> vector<8x4xf32>
    %73 = arith.addf %69, %72 : vector<8x4xf32>
    %c0_43 = arith.constant 0 : index
    %c4_44 = arith.constant 4 : index
    %74 = vector.load %arg10[%c0_43, %c4_44] : memref<8x32xf32, #tpu.memory_space<vmem>>, vector<8x4xf32>
    tpu.vector_store %arg10[%c0_43, %c4_44], %73 {strides = array<i32>} : memref<8x32xf32, #tpu.memory_space<vmem>>, vector<8x4xf32>,
    %c1_45 = arith.constant 1 : index
    %c0_46 = arith.constant 0 : index
    %c0_47 = arith.constant 0 : index
    %75 = vector.load %arg12[%c1_45, %c0_46, %c0_47] : memref<8x8x1xf32, #tpu.memory_space<vmem>>, vector<1x8x1xf32>
    %76 = vector.shape_cast %75 : vector<1x8x1xf32> to vector<8x1xf32>
    %77 = vector.shape_cast %52 : vector<8x1xf32> to vector<1x8x1xf32>
    tpu.vector_store %arg12[%c1_45, %c0_46, %c0_47], %77 {strides = array<i32>} : memref<8x8x1xf32, #tpu.memory_space<vmem>>, vector<1x8x1xf32>,
    %c0_48 = arith.constant 0 : index
    %c8 = arith.constant 8 : index
    %78 = vector.load %arg9[%c0_48, %c8] : memref<8x32xbf16, #tpu.memory_space<vmem>>, vector<8x4xbf16>
    %79 = vector.extract_strided_slice %8 {offsets = [0, 8], sizes = [8, 4], strides = [1, 1]} : vector<8x32xbf16> to vector<8x4xbf16>
    %cst_49 = arith.constant dense<0.000000e+00> : vector<8x8xf32>
    %80 = tpu.matmul %78, %79, %cst_49 {dimension_numbers = #tpu.dot_dimension_numbers<[1], [1], [0], [0], [0, 0, 1, 0], [], []>} : vector<8x4xbf16>, vector<8x4xbf16>, vector<8x8xf32> -> vector<8x8xf32>
    %c2 = arith.constant 2 : index
    %c0_50 = arith.constant 0 : index
    %c0_51 = arith.constant 0 : index
    %81 = vector.load %arg12[%c2, %c0_50, %c0_51] : memref<8x8x1xf32, #tpu.memory_space<vmem>>, vector<1x8x1xf32>
    %82 = vector.shape_cast %81 : vector<1x8x1xf32> to vector<8x1xf32>
    %cst_52 = arith.constant dense<0xFF800000> : vector<8xf32>
    %83 = vector.multi_reduction <maximumf>, %80, %cst_52 [1] : vector<8x8xf32> to vector<8xf32>
    %84 = vector.shape_cast %83 : vector<8xf32> to vector<8x1xf32>
    %85 = arith.maximumf %82, %84 : vector<8x1xf32>
    %86 = arith.subf %82, %85 : vector<8x1xf32>
    %87 = math.exp %86 : vector<8x1xf32>
    %88 = vector.broadcast %85 : vector<8x1xf32> to vector<8x8xf32>
    %89 = arith.subf %80, %88 : vector<8x8xf32>
    %90 = math.exp %89 : vector<8x8xf32>
    %c2_53 = arith.constant 2 : index
    %c0_54 = arith.constant 0 : index
    %c0_55 = arith.constant 0 : index
    %91 = vector.load %arg13[%c2_53, %c0_54, %c0_55] : memref<8x8x1xf32, #tpu.memory_space<vmem>>, vector<1x8x1xf32>
    %92 = vector.shape_cast %91 : vector<1x8x1xf32> to vector<8x1xf32>
    %93 = arith.mulf %87, %92 : vector<8x1xf32>
    %cst_56 = arith.constant dense<0.000000e+00> : vector<8xf32>
    %94 = vector.multi_reduction <add>, %90, %cst_56 [1] : vector<8x8xf32> to vector<8xf32>
    %95 = vector.shape_cast %94 : vector<8xf32> to vector<8x1xf32>
    %96 = arith.addf %93, %95 : vector<8x1xf32>
    %c2_57 = arith.constant 2 : index
    %c0_58 = arith.constant 0 : index
    %c0_59 = arith.constant 0 : index
    %97 = vector.load %arg13[%c2_57, %c0_58, %c0_59] : memref<8x8x1xf32, #tpu.memory_space<vmem>>, vector<1x8x1xf32>
    %98 = vector.shape_cast %97 : vector<1x8x1xf32> to vector<8x1xf32>
    %99 = vector.shape_cast %96 : vector<8x1xf32> to vector<1x8x1xf32>
    tpu.vector_store %arg13[%c2_57, %c0_58, %c0_59], %99 {strides = array<i32>} : memref<8x8x1xf32, #tpu.memory_space<vmem>>, vector<1x8x1xf32>,
    %c0_60 = arith.constant 0 : index
    %c8_61 = arith.constant 8 : index
    %100 = vector.load %arg10[%c0_60, %c8_61] : memref<8x32xf32, #tpu.memory_space<vmem>>, vector<8x4xf32>
    %101 = vector.broadcast %87 : vector<8x1xf32> to vector<8x4xf32>
    %102 = arith.mulf %101, %100 : vector<8x4xf32>
    %103 = arith.truncf %90 : vector<8x8xf32> to vector<8x8xbf16>
    %104 = vector.extract_strided_slice %11 {offsets = [0, 8], sizes = [8, 4], strides = [1, 1]} : vector<8x32xbf16> to vector<8x4xbf16>
    %cst_62 = arith.constant dense<0.000000e+00> : vector<8x4xf32>
    %105 = tpu.matmul %103, %104, %cst_62 {dimension_numbers = #tpu.dot_dimension_numbers<[1], [0], [0], [1], [0, 0, 1, 1], [], []>} : vector<8x8xbf16>, vector<8x4xbf16>, vector<8x4xf32> -> vector<8x4xf32>
    %106 = arith.addf %102, %105 : vector<8x4xf32>
    %c0_63 = arith.constant 0 : index
    %c8_64 = arith.constant 8 : index
    %107 = vector.load %arg10[%c0_63, %c8_64] : memref<8x32xf32, #tpu.memory_space<vmem>>, vector<8x4xf32>
    tpu.vector_store %arg10[%c0_63, %c8_64], %106 {strides = array<i32>} : memref<8x32xf32, #tpu.memory_space<vmem>>, vector<8x4xf32>,
    %c2_65 = arith.constant 2 : index
    %c0_66 = arith.constant 0 : index
    %c0_67 = arith.constant 0 : index
    %108 = vector.load %arg12[%c2_65, %c0_66, %c0_67] : memref<8x8x1xf32, #tpu.memory_space<vmem>>, vector<1x8x1xf32>
    %109 = vector.shape_cast %108 : vector<1x8x1xf32> to vector<8x1xf32>
    %110 = vector.shape_cast %85 : vector<8x1xf32> to vector<1x8x1xf32>
    tpu.vector_store %arg12[%c2_65, %c0_66, %c0_67], %110 {strides = array<i32>} : memref<8x8x1xf32, #tpu.memory_space<vmem>>, vector<1x8x1xf32>,
    %c0_68 = arith.constant 0 : index
    %c12 = arith.constant 12 : index
    %111 = vector.load %arg9[%c0_68, %c12] : memref<8x32xbf16, #tpu.memory_space<vmem>>, vector<8x4xbf16>
    %112 = vector.extract_strided_slice %8 {offsets = [0, 12], sizes = [8, 4], strides = [1, 1]} : vector<8x32xbf16> to vector<8x4xbf16>
    %cst_69 = arith.constant dense<0.000000e+00> : vector<8x8xf32>
    %113 = tpu.matmul %111, %112, %cst_69 {dimension_numbers = #tpu.dot_dimension_numbers<[1], [1], [0], [0], [0, 0, 1, 0], [], []>} : vector<8x4xbf16>, vector<8x4xbf16>, vector<8x8xf32> -> vector<8x8xf32>
    %c3 = arith.constant 3 : index
    %c0_70 = arith.constant 0 : index
    %c0_71 = arith.constant 0 : index
    %114 = vector.load %arg12[%c3, %c0_70, %c0_71] : memref<8x8x1xf32, #tpu.memory_space<vmem>>, vector<1x8x1xf32>
    %115 = vector.shape_cast %114 : vector<1x8x1xf32> to vector<8x1xf32>
    %cst_72 = arith.constant dense<0xFF800000> : vector<8xf32>
    %116 = vector.multi_reduction <maximumf>, %113, %cst_72 [1] : vector<8x8xf32> to vector<8xf32>
    %117 = vector.shape_cast %116 : vector<8xf32> to vector<8x1xf32>
    %118 = arith.maximumf %115, %117 : vector<8x1xf32>
    %119 = arith.subf %115, %118 : vector<8x1xf32>
    %120 = math.exp %119 : vector<8x1xf32>
    %121 = vector.broadcast %118 : vector<8x1xf32> to vector<8x8xf32>
    %122 = arith.subf %113, %121 : vector<8x8xf32>
    %123 = math.exp %122 : vector<8x8xf32>
    %c3_73 = arith.constant 3 : index
    %c0_74 = arith.constant 0 : index
    %c0_75 = arith.constant 0 : index
    %124 = vector.load %arg13[%c3_73, %c0_74, %c0_75] : memref<8x8x1xf32, #tpu.memory_space<vmem>>, vector<1x8x1xf32>
    %125 = vector.shape_cast %124 : vector<1x8x1xf32> to vector<8x1xf32>
    %126 = arith.mulf %120, %125 : vector<8x1xf32>
    %cst_76 = arith.constant dense<0.000000e+00> : vector<8xf32>
    %127 = vector.multi_reduction <add>, %123, %cst_76 [1] : vector<8x8xf32> to vector<8xf32>
    %128 = vector.shape_cast %127 : vector<8xf32> to vector<8x1xf32>
    %129 = arith.addf %126, %128 : vector<8x1xf32>
    %c3_77 = arith.constant 3 : index
    %c0_78 = arith.constant 0 : index
    %c0_79 = arith.constant 0 : index
    %130 = vector.load %arg13[%c3_77, %c0_78, %c0_79] : memref<8x8x1xf32, #tpu.memory_space<vmem>>, vector<1x8x1xf32>
    %131 = vector.shape_cast %130 : vector<1x8x1xf32> to vector<8x1xf32>
    %132 = vector.shape_cast %129 : vector<8x1xf32> to vector<1x8x1xf32>
    tpu.vector_store %arg13[%c3_77, %c0_78, %c0_79], %132 {strides = array<i32>} : memref<8x8x1xf32, #tpu.memory_space<vmem>>, vector<1x8x1xf32>,
    %c0_80 = arith.constant 0 : index
    %c12_81 = arith.constant 12 : index
    %133 = vector.load %arg10[%c0_80, %c12_81] : memref<8x32xf32, #tpu.memory_space<vmem>>, vector<8x4xf32>
    %134 = vector.broadcast %120 : vector<8x1xf32> to vector<8x4xf32>
    %135 = arith.mulf %134, %133 : vector<8x4xf32>
    %136 = arith.truncf %123 : vector<8x8xf32> to vector<8x8xbf16>
    %137 = vector.extract_strided_slice %11 {offsets = [0, 12], sizes = [8, 4], strides = [1, 1]} : vector<8x32xbf16> to vector<8x4xbf16>
    %cst_82 = arith.constant dense<0.000000e+00> : vector<8x4xf32>
    %138 = tpu.matmul %136, %137, %cst_82 {dimension_numbers = #tpu.dot_dimension_numbers<[1], [0], [0], [1], [0, 0, 1, 1], [], []>} : vector<8x8xbf16>, vector<8x4xbf16>, vector<8x4xf32> -> vector<8x4xf32>
    %139 = arith.addf %135, %138 : vector<8x4xf32>
    %c0_83 = arith.constant 0 : index
    %c12_84 = arith.constant 12 : index
    %140 = vector.load %arg10[%c0_83, %c12_84] : memref<8x32xf32, #tpu.memory_space<vmem>>, vector<8x4xf32>
    tpu.vector_store %arg10[%c0_83, %c12_84], %139 {strides = array<i32>} : memref<8x32xf32, #tpu.memory_space<vmem>>, vector<8x4xf32>,
    %c3_85 = arith.constant 3 : index
    %c0_86 = arith.constant 0 : index
    %c0_87 = arith.constant 0 : index
    %141 = vector.load %arg12[%c3_85, %c0_86, %c0_87] : memref<8x8x1xf32, #tpu.memory_space<vmem>>, vector<1x8x1xf32>
    %142 = vector.shape_cast %141 : vector<1x8x1xf32> to vector<8x1xf32>
    %143 = vector.shape_cast %118 : vector<8x1xf32> to vector<1x8x1xf32>
    tpu.vector_store %arg12[%c3_85, %c0_86, %c0_87], %143 {strides = array<i32>} : memref<8x8x1xf32, #tpu.memory_space<vmem>>, vector<1x8x1xf32>,
    %c0_88 = arith.constant 0 : index
    %c16 = arith.constant 16 : index
    %144 = vector.load %arg9[%c0_88, %c16] : memref<8x32xbf16, #tpu.memory_space<vmem>>, vector<8x4xbf16>
    %145 = vector.extract_strided_slice %8 {offsets = [0, 16], sizes = [8, 4], strides = [1, 1]} : vector<8x32xbf16> to vector<8x4xbf16>
    %cst_89 = arith.constant dense<0.000000e+00> : vector<8x8xf32>
    %146 = tpu.matmul %144, %145, %cst_89 {dimension_numbers = #tpu.dot_dimension_numbers<[1], [1], [0], [0], [0, 0, 1, 0], [], []>} : vector<8x4xbf16>, vector<8x4xbf16>, vector<8x8xf32> -> vector<8x8xf32>
    %c4_90 = arith.constant 4 : index
    %c0_91 = arith.constant 0 : index
    %c0_92 = arith.constant 0 : index
    %147 = vector.load %arg12[%c4_90, %c0_91, %c0_92] : memref<8x8x1xf32, #tpu.memory_space<vmem>>, vector<1x8x1xf32>
    %148 = vector.shape_cast %147 : vector<1x8x1xf32> to vector<8x1xf32>
    %cst_93 = arith.constant dense<0xFF800000> : vector<8xf32>
    %149 = vector.multi_reduction <maximumf>, %146, %cst_93 [1] : vector<8x8xf32> to vector<8xf32>
    %150 = vector.shape_cast %149 : vector<8xf32> to vector<8x1xf32>
    %151 = arith.maximumf %148, %150 : vector<8x1xf32>
    %152 = arith.subf %148, %151 : vector<8x1xf32>
    %153 = math.exp %152 : vector<8x1xf32>
    %154 = vector.broadcast %151 : vector<8x1xf32> to vector<8x8xf32>
    %155 = arith.subf %146, %154 : vector<8x8xf32>
    %156 = math.exp %155 : vector<8x8xf32>
    %c4_94 = arith.constant 4 : index
    %c0_95 = arith.constant 0 : index
    %c0_96 = arith.constant 0 : index
    %157 = vector.load %arg13[%c4_94, %c0_95, %c0_96] : memref<8x8x1xf32, #tpu.memory_space<vmem>>, vector<1x8x1xf32>
    %158 = vector.shape_cast %157 : vector<1x8x1xf32> to vector<8x1xf32>
    %159 = arith.mulf %153, %158 : vector<8x1xf32>
    %cst_97 = arith.constant dense<0.000000e+00> : vector<8xf32>
    %160 = vector.multi_reduction <add>, %156, %cst_97 [1] : vector<8x8xf32> to vector<8xf32>
    %161 = vector.shape_cast %160 : vector<8xf32> to vector<8x1xf32>
    %162 = arith.addf %159, %161 : vector<8x1xf32>
    %c4_98 = arith.constant 4 : index
    %c0_99 = arith.constant 0 : index
    %c0_100 = arith.constant 0 : index
    %163 = vector.load %arg13[%c4_98, %c0_99, %c0_100] : memref<8x8x1xf32, #tpu.memory_space<vmem>>, vector<1x8x1xf32>
    %164 = vector.shape_cast %163 : vector<1x8x1xf32> to vector<8x1xf32>
    %165 = vector.shape_cast %162 : vector<8x1xf32> to vector<1x8x1xf32>
    tpu.vector_store %arg13[%c4_98, %c0_99, %c0_100], %165 {strides = array<i32>} : memref<8x8x1xf32, #tpu.memory_space<vmem>>, vector<1x8x1xf32>,
    %c0_101 = arith.constant 0 : index
    %c16_102 = arith.constant 16 : index
    %166 = vector.load %arg10[%c0_101, %c16_102] : memref<8x32xf32, #tpu.memory_space<vmem>>, vector<8x4xf32>
    %167 = vector.broadcast %153 : vector<8x1xf32> to vector<8x4xf32>
    %168 = arith.mulf %167, %166 : vector<8x4xf32>
    %169 = arith.truncf %156 : vector<8x8xf32> to vector<8x8xbf16>
    %170 = vector.extract_strided_slice %11 {offsets = [0, 16], sizes = [8, 4], strides = [1, 1]} : vector<8x32xbf16> to vector<8x4xbf16>
    %cst_103 = arith.constant dense<0.000000e+00> : vector<8x4xf32>
    %171 = tpu.matmul %169, %170, %cst_103 {dimension_numbers = #tpu.dot_dimension_numbers<[1], [0], [0], [1], [0, 0, 1, 1], [], []>} : vector<8x8xbf16>, vector<8x4xbf16>, vector<8x4xf32> -> vector<8x4xf32>
    %172 = arith.addf %168, %171 : vector<8x4xf32>
    %c0_104 = arith.constant 0 : index
    %c16_105 = arith.constant 16 : index
    %173 = vector.load %arg10[%c0_104, %c16_105] : memref<8x32xf32, #tpu.memory_space<vmem>>, vector<8x4xf32>
    tpu.vector_store %arg10[%c0_104, %c16_105], %172 {strides = array<i32>} : memref<8x32xf32, #tpu.memory_space<vmem>>, vector<8x4xf32>,
    %c4_106 = arith.constant 4 : index
    %c0_107 = arith.constant 0 : index
    %c0_108 = arith.constant 0 : index
    %174 = vector.load %arg12[%c4_106, %c0_107, %c0_108] : memref<8x8x1xf32, #tpu.memory_space<vmem>>, vector<1x8x1xf32>
    %175 = vector.shape_cast %174 : vector<1x8x1xf32> to vector<8x1xf32>
    %176 = vector.shape_cast %151 : vector<8x1xf32> to vector<1x8x1xf32>
    tpu.vector_store %arg12[%c4_106, %c0_107, %c0_108], %176 {strides = array<i32>} : memref<8x8x1xf32, #tpu.memory_space<vmem>>, vector<1x8x1xf32>,
    %c0_109 = arith.constant 0 : index
    %c20 = arith.constant 20 : index
    %177 = vector.load %arg9[%c0_109, %c20] : memref<8x32xbf16, #tpu.memory_space<vmem>>, vector<8x4xbf16>
    %178 = vector.extract_strided_slice %8 {offsets = [0, 20], sizes = [8, 4], strides = [1, 1]} : vector<8x32xbf16> to vector<8x4xbf16>
    %cst_110 = arith.constant dense<0.000000e+00> : vector<8x8xf32>
    %179 = tpu.matmul %177, %178, %cst_110 {dimension_numbers = #tpu.dot_dimension_numbers<[1], [1], [0], [0], [0, 0, 1, 0], [], []>} : vector<8x4xbf16>, vector<8x4xbf16>, vector<8x8xf32> -> vector<8x8xf32>
    %c5 = arith.constant 5 : index
    %c0_111 = arith.constant 0 : index
    %c0_112 = arith.constant 0 : index
    %180 = vector.load %arg12[%c5, %c0_111, %c0_112] : memref<8x8x1xf32, #tpu.memory_space<vmem>>, vector<1x8x1xf32>
    %181 = vector.shape_cast %180 : vector<1x8x1xf32> to vector<8x1xf32>
    %cst_113 = arith.constant dense<0xFF800000> : vector<8xf32>
    %182 = vector.multi_reduction <maximumf>, %179, %cst_113 [1] : vector<8x8xf32> to vector<8xf32>
    %183 = vector.shape_cast %182 : vector<8xf32> to vector<8x1xf32>
    %184 = arith.maximumf %181, %183 : vector<8x1xf32>
    %185 = arith.subf %181, %184 : vector<8x1xf32>
    %186 = math.exp %185 : vector<8x1xf32>
    %187 = vector.broadcast %184 : vector<8x1xf32> to vector<8x8xf32>
    %188 = arith.subf %179, %187 : vector<8x8xf32>
    %189 = math.exp %188 : vector<8x8xf32>
    %c5_114 = arith.constant 5 : index
    %c0_115 = arith.constant 0 : index
    %c0_116 = arith.constant 0 : index
    %190 = vector.load %arg13[%c5_114, %c0_115, %c0_116] : memref<8x8x1xf32, #tpu.memory_space<vmem>>, vector<1x8x1xf32>
    %191 = vector.shape_cast %190 : vector<1x8x1xf32> to vector<8x1xf32>
    %192 = arith.mulf %186, %191 : vector<8x1xf32>
    %cst_117 = arith.constant dense<0.000000e+00> : vector<8xf32>
    %193 = vector.multi_reduction <add>, %189, %cst_117 [1] : vector<8x8xf32> to vector<8xf32>
    %194 = vector.shape_cast %193 : vector<8xf32> to vector<8x1xf32>
    %195 = arith.addf %192, %194 : vector<8x1xf32>
    %c5_118 = arith.constant 5 : index
    %c0_119 = arith.constant 0 : index
    %c0_120 = arith.constant 0 : index
    %196 = vector.load %arg13[%c5_118, %c0_119, %c0_120] : memref<8x8x1xf32, #tpu.memory_space<vmem>>, vector<1x8x1xf32>
    %197 = vector.shape_cast %196 : vector<1x8x1xf32> to vector<8x1xf32>
    %198 = vector.shape_cast %195 : vector<8x1xf32> to vector<1x8x1xf32>
    tpu.vector_store %arg13[%c5_118, %c0_119, %c0_120], %198 {strides = array<i32>} : memref<8x8x1xf32, #tpu.memory_space<vmem>>, vector<1x8x1xf32>,
    %c0_121 = arith.constant 0 : index
    %c20_122 = arith.constant 20 : index
    %199 = vector.load %arg10[%c0_121, %c20_122] : memref<8x32xf32, #tpu.memory_space<vmem>>, vector<8x4xf32>
    %200 = vector.broadcast %186 : vector<8x1xf32> to vector<8x4xf32>
    %201 = arith.mulf %200, %199 : vector<8x4xf32>
    %202 = arith.truncf %189 : vector<8x8xf32> to vector<8x8xbf16>
    %203 = vector.extract_strided_slice %11 {offsets = [0, 20], sizes = [8, 4], strides = [1, 1]} : vector<8x32xbf16> to vector<8x4xbf16>
    %cst_123 = arith.constant dense<0.000000e+00> : vector<8x4xf32>
    %204 = tpu.matmul %202, %203, %cst_123 {dimension_numbers = #tpu.dot_dimension_numbers<[1], [0], [0], [1], [0, 0, 1, 1], [], []>} : vector<8x8xbf16>, vector<8x4xbf16>, vector<8x4xf32> -> vector<8x4xf32>
    %205 = arith.addf %201, %204 : vector<8x4xf32>
    %c0_124 = arith.constant 0 : index
    %c20_125 = arith.constant 20 : index
    %206 = vector.load %arg10[%c0_124, %c20_125] : memref<8x32xf32, #tpu.memory_space<vmem>>, vector<8x4xf32>
    tpu.vector_store %arg10[%c0_124, %c20_125], %205 {strides = array<i32>} : memref<8x32xf32, #tpu.memory_space<vmem>>, vector<8x4xf32>,
    %c5_126 = arith.constant 5 : index
    %c0_127 = arith.constant 0 : index
    %c0_128 = arith.constant 0 : index
    %207 = vector.load %arg12[%c5_126, %c0_127, %c0_128] : memref<8x8x1xf32, #tpu.memory_space<vmem>>, vector<1x8x1xf32>
    %208 = vector.shape_cast %207 : vector<1x8x1xf32> to vector<8x1xf32>
    %209 = vector.shape_cast %184 : vector<8x1xf32> to vector<1x8x1xf32>
    tpu.vector_store %arg12[%c5_126, %c0_127, %c0_128], %209 {strides = array<i32>} : memref<8x8x1xf32, #tpu.memory_space<vmem>>, vector<1x8x1xf32>,
    %c0_129 = arith.constant 0 : index
    %c24 = arith.constant 24 : index
    %210 = vector.load %arg9[%c0_129, %c24] : memref<8x32xbf16, #tpu.memory_space<vmem>>, vector<8x4xbf16>
    %211 = vector.extract_strided_slice %8 {offsets = [0, 24], sizes = [8, 4], strides = [1, 1]} : vector<8x32xbf16> to vector<8x4xbf16>
    %cst_130 = arith.constant dense<0.000000e+00> : vector<8x8xf32>
    %212 = tpu.matmul %210, %211, %cst_130 {dimension_numbers = #tpu.dot_dimension_numbers<[1], [1], [0], [0], [0, 0, 1, 0], [], []>} : vector<8x4xbf16>, vector<8x4xbf16>, vector<8x8xf32> -> vector<8x8xf32>
    %c6 = arith.constant 6 : index
    %c0_131 = arith.constant 0 : index
    %c0_132 = arith.constant 0 : index
    %213 = vector.load %arg12[%c6, %c0_131, %c0_132] : memref<8x8x1xf32, #tpu.memory_space<vmem>>, vector<1x8x1xf32>
    %214 = vector.shape_cast %213 : vector<1x8x1xf32> to vector<8x1xf32>
    %cst_133 = arith.constant dense<0xFF800000> : vector<8xf32>
    %215 = vector.multi_reduction <maximumf>, %212, %cst_133 [1] : vector<8x8xf32> to vector<8xf32>
    %216 = vector.shape_cast %215 : vector<8xf32> to vector<8x1xf32>
    %217 = arith.maximumf %214, %216 : vector<8x1xf32>
    %218 = arith.subf %214, %217 : vector<8x1xf32>
    %219 = math.exp %218 : vector<8x1xf32>
    %220 = vector.broadcast %217 : vector<8x1xf32> to vector<8x8xf32>
    %221 = arith.subf %212, %220 : vector<8x8xf32>
    %222 = math.exp %221 : vector<8x8xf32>
    %c6_134 = arith.constant 6 : index
    %c0_135 = arith.constant 0 : index
    %c0_136 = arith.constant 0 : index
    %223 = vector.load %arg13[%c6_134, %c0_135, %c0_136] : memref<8x8x1xf32, #tpu.memory_space<vmem>>, vector<1x8x1xf32>
    %224 = vector.shape_cast %223 : vector<1x8x1xf32> to vector<8x1xf32>
    %225 = arith.mulf %219, %224 : vector<8x1xf32>
    %cst_137 = arith.constant dense<0.000000e+00> : vector<8xf32>
    %226 = vector.multi_reduction <add>, %222, %cst_137 [1] : vector<8x8xf32> to vector<8xf32>
    %227 = vector.shape_cast %226 : vector<8xf32> to vector<8x1xf32>
    %228 = arith.addf %225, %227 : vector<8x1xf32>
    %c6_138 = arith.constant 6 : index
    %c0_139 = arith.constant 0 : index
    %c0_140 = arith.constant 0 : index
    %229 = vector.load %arg13[%c6_138, %c0_139, %c0_140] : memref<8x8x1xf32, #tpu.memory_space<vmem>>, vector<1x8x1xf32>
    %230 = vector.shape_cast %229 : vector<1x8x1xf32> to vector<8x1xf32>
    %231 = vector.shape_cast %228 : vector<8x1xf32> to vector<1x8x1xf32>
    tpu.vector_store %arg13[%c6_138, %c0_139, %c0_140], %231 {strides = array<i32>} : memref<8x8x1xf32, #tpu.memory_space<vmem>>, vector<1x8x1xf32>,
    %c0_141 = arith.constant 0 : index
    %c24_142 = arith.constant 24 : index
    %232 = vector.load %arg10[%c0_141, %c24_142] : memref<8x32xf32, #tpu.memory_space<vmem>>, vector<8x4xf32>
    %233 = vector.broadcast %219 : vector<8x1xf32> to vector<8x4xf32>
    %234 = arith.mulf %233, %232 : vector<8x4xf32>
    %235 = arith.truncf %222 : vector<8x8xf32> to vector<8x8xbf16>
    %236 = vector.extract_strided_slice %11 {offsets = [0, 24], sizes = [8, 4], strides = [1, 1]} : vector<8x32xbf16> to vector<8x4xbf16>
    %cst_143 = arith.constant dense<0.000000e+00> : vector<8x4xf32>
    %237 = tpu.matmul %235, %236, %cst_143 {dimension_numbers = #tpu.dot_dimension_numbers<[1], [0], [0], [1], [0, 0, 1, 1], [], []>} : vector<8x8xbf16>, vector<8x4xbf16>, vector<8x4xf32> -> vector<8x4xf32>
    %238 = arith.addf %234, %237 : vector<8x4xf32>
    %c0_144 = arith.constant 0 : index
    %c24_145 = arith.constant 24 : index
    %239 = vector.load %arg10[%c0_144, %c24_145] : memref<8x32xf32, #tpu.memory_space<vmem>>, vector<8x4xf32>
    tpu.vector_store %arg10[%c0_144, %c24_145], %238 {strides = array<i32>} : memref<8x32xf32, #tpu.memory_space<vmem>>, vector<8x4xf32>,
    %c6_146 = arith.constant 6 : index
    %c0_147 = arith.constant 0 : index
    %c0_148 = arith.constant 0 : index
    %240 = vector.load %arg12[%c6_146, %c0_147, %c0_148] : memref<8x8x1xf32, #tpu.memory_space<vmem>>, vector<1x8x1xf32>
    %241 = vector.shape_cast %240 : vector<1x8x1xf32> to vector<8x1xf32>
    %242 = vector.shape_cast %217 : vector<8x1xf32> to vector<1x8x1xf32>
    tpu.vector_store %arg12[%c6_146, %c0_147, %c0_148], %242 {strides = array<i32>} : memref<8x8x1xf32, #tpu.memory_space<vmem>>, vector<1x8x1xf32>,
    %c0_149 = arith.constant 0 : index
    %c28 = arith.constant 28 : index
    %243 = vector.load %arg9[%c0_149, %c28] : memref<8x32xbf16, #tpu.memory_space<vmem>>, vector<8x4xbf16>
    %244 = vector.extract_strided_slice %8 {offsets = [0, 28], sizes = [8, 4], strides = [1, 1]} : vector<8x32xbf16> to vector<8x4xbf16>
    %cst_150 = arith.constant dense<0.000000e+00> : vector<8x8xf32>
    %245 = tpu.matmul %243, %244, %cst_150 {dimension_numbers = #tpu.dot_dimension_numbers<[1], [1], [0], [0], [0, 0, 1, 0], [], []>} : vector<8x4xbf16>, vector<8x4xbf16>, vector<8x8xf32> -> vector<8x8xf32>
    %c7 = arith.constant 7 : index
    %c0_151 = arith.constant 0 : index
    %c0_152 = arith.constant 0 : index
    %246 = vector.load %arg12[%c7, %c0_151, %c0_152] : memref<8x8x1xf32, #tpu.memory_space<vmem>>, vector<1x8x1xf32>
    %247 = vector.shape_cast %246 : vector<1x8x1xf32> to vector<8x1xf32>
    %cst_153 = arith.constant dense<0xFF800000> : vector<8xf32>
    %248 = vector.multi_reduction <maximumf>, %245, %cst_153 [1] : vector<8x8xf32> to vector<8xf32>
    %249 = vector.shape_cast %248 : vector<8xf32> to vector<8x1xf32>
    %250 = arith.maximumf %247, %249 : vector<8x1xf32>
    %251 = arith.subf %247, %250 : vector<8x1xf32>
    %252 = math.exp %251 : vector<8x1xf32>
    %253 = vector.broadcast %250 : vector<8x1xf32> to vector<8x8xf32>
    %254 = arith.subf %245, %253 : vector<8x8xf32>
    %255 = math.exp %254 : vector<8x8xf32>
    %c7_154 = arith.constant 7 : index
    %c0_155 = arith.constant 0 : index
    %c0_156 = arith.constant 0 : index
    %256 = vector.load %arg13[%c7_154, %c0_155, %c0_156] : memref<8x8x1xf32, #tpu.memory_space<vmem>>, vector<1x8x1xf32>
    %257 = vector.shape_cast %256 : vector<1x8x1xf32> to vector<8x1xf32>
    %258 = arith.mulf %252, %257 : vector<8x1xf32>
    %cst_157 = arith.constant dense<0.000000e+00> : vector<8xf32>
    %259 = vector.multi_reduction <add>, %255, %cst_157 [1] : vector<8x8xf32> to vector<8xf32>
    %260 = vector.shape_cast %259 : vector<8xf32> to vector<8x1xf32>
    %261 = arith.addf %258, %260 : vector<8x1xf32>
    %c7_158 = arith.constant 7 : index
    %c0_159 = arith.constant 0 : index
    %c0_160 = arith.constant 0 : index
    %262 = vector.load %arg13[%c7_158, %c0_159, %c0_160] : memref<8x8x1xf32, #tpu.memory_space<vmem>>, vector<1x8x1xf32>
    %263 = vector.shape_cast %262 : vector<1x8x1xf32> to vector<8x1xf32>
    %264 = vector.shape_cast %261 : vector<8x1xf32> to vector<1x8x1xf32>
    tpu.vector_store %arg13[%c7_158, %c0_159, %c0_160], %264 {strides = array<i32>} : memref<8x8x1xf32, #tpu.memory_space<vmem>>, vector<1x8x1xf32>,
    %c0_161 = arith.constant 0 : index
    %c28_162 = arith.constant 28 : index
    %265 = vector.load %arg10[%c0_161, %c28_162] : memref<8x32xf32, #tpu.memory_space<vmem>>, vector<8x4xf32>
    %266 = vector.broadcast %252 : vector<8x1xf32> to vector<8x4xf32>
    %267 = arith.mulf %266, %265 : vector<8x4xf32>
    %268 = arith.truncf %255 : vector<8x8xf32> to vector<8x8xbf16>
    %269 = vector.extract_strided_slice %11 {offsets = [0, 28], sizes = [8, 4], strides = [1, 1]} : vector<8x32xbf16> to vector<8x4xbf16>
    %cst_163 = arith.constant dense<0.000000e+00> : vector<8x4xf32>
    %270 = tpu.matmul %268, %269, %cst_163 {dimension_numbers = #tpu.dot_dimension_numbers<[1], [0], [0], [1], [0, 0, 1, 1], [], []>} : vector<8x8xbf16>, vector<8x4xbf16>, vector<8x4xf32> -> vector<8x4xf32>
    %271 = arith.addf %267, %270 : vector<8x4xf32>
    %c0_164 = arith.constant 0 : index
    %c28_165 = arith.constant 28 : index
    %272 = vector.load %arg10[%c0_164, %c28_165] : memref<8x32xf32, #tpu.memory_space<vmem>>, vector<8x4xf32>
    tpu.vector_store %arg10[%c0_164, %c28_165], %271 {strides = array<i32>} : memref<8x32xf32, #tpu.memory_space<vmem>>, vector<8x4xf32>,
    %c7_166 = arith.constant 7 : index
    %c0_167 = arith.constant 0 : index
    %c0_168 = arith.constant 0 : index
    %273 = vector.load %arg12[%c7_166, %c0_167, %c0_168] : memref<8x8x1xf32, #tpu.memory_space<vmem>>, vector<1x8x1xf32>
    %274 = vector.shape_cast %273 : vector<1x8x1xf32> to vector<8x1xf32>
    %275 = vector.shape_cast %250 : vector<8x1xf32> to vector<1x8x1xf32>
    tpu.vector_store %arg12[%c7_166, %c0_167, %c0_168], %275 {strides = array<i32>} : memref<8x8x1xf32, #tpu.memory_space<vmem>>, vector<1x8x1xf32>,
    %c0_i32_169 = arith.constant 0 : i32
    %276 = arith.cmpi eq, %arg2, %c0_i32_169 : i32
    %277 = arith.extui %276 : i1 to i32
    %c0_i32_170 = arith.constant 0 : i32
    %278 = arith.cmpi ne, %277, %c0_i32_170 : i32
    scf.if %278 {
      %c0_171 = arith.constant 0 : index
      %c0_172 = arith.constant 0 : index
      %279 = vector.load %arg10[%c0_171, %c0_172] : memref<8x32xf32, #tpu.memory_space<vmem>>, vector<8x4xf32>
      %c0_173 = arith.constant 0 : index
      %c0_174 = arith.constant 0 : index
      %c0_175 = arith.constant 0 : index
      %280 = vector.load %arg13[%c0_173, %c0_174, %c0_175] : memref<8x8x1xf32, #tpu.memory_space<vmem>>, vector<1x8x1xf32>
      %281 = vector.shape_cast %280 : vector<1x8x1xf32> to vector<8x1xf32>
      %282 = vector.broadcast %281 : vector<8x1xf32> to vector<8x4xf32>
      %283 = arith.divf %279, %282 : vector<8x4xf32>
      %c0_176 = arith.constant 0 : index
      %c0_177 = arith.constant 0 : index
      %284 = vector.load %arg11[%c0_176, %c0_177] : memref<8x32xf32, #tpu.memory_space<vmem>>, vector<8x4xf32>
      tpu.vector_store %arg11[%c0_176, %c0_177], %283 {strides = array<i32>} : memref<8x32xf32, #tpu.memory_space<vmem>>, vector<8x4xf32>,
      %c0_178 = arith.constant 0 : index
      %c4_179 = arith.constant 4 : index
      %285 = vector.load %arg10[%c0_178, %c4_179] : memref<8x32xf32, #tpu.memory_space<vmem>>, vector<8x4xf32>
      %c1_180 = arith.constant 1 : index
      %c0_181 = arith.constant 0 : index
      %c0_182 = arith.constant 0 : index
      %286 = vector.load %arg13[%c1_180, %c0_181, %c0_182] : memref<8x8x1xf32, #tpu.memory_space<vmem>>, vector<1x8x1xf32>
      %287 = vector.shape_cast %286 : vector<1x8x1xf32> to vector<8x1xf32>
      %288 = vector.broadcast %287 : vector<8x1xf32> to vector<8x4xf32>
      %289 = arith.divf %285, %288 : vector<8x4xf32>
      %c0_183 = arith.constant 0 : index
      %c4_184 = arith.constant 4 : index
      %290 = vector.load %arg11[%c0_183, %c4_184] : memref<8x32xf32, #tpu.memory_space<vmem>>, vector<8x4xf32>
      tpu.vector_store %arg11[%c0_183, %c4_184], %289 {strides = array<i32>} : memref<8x32xf32, #tpu.memory_space<vmem>>, vector<8x4xf32>,
      %c0_185 = arith.constant 0 : index
      %c8_186 = arith.constant 8 : index
      %291 = vector.load %arg10[%c0_185, %c8_186] : memref<8x32xf32, #tpu.memory_space<vmem>>, vector<8x4xf32>
      %c2_187 = arith.constant 2 : index
      %c0_188 = arith.constant 0 : index
      %c0_189 = arith.constant 0 : index
      %292 = vector.load %arg13[%c2_187, %c0_188, %c0_189] : memref<8x8x1xf32, #tpu.memory_space<vmem>>, vector<1x8x1xf32>
      %293 = vector.shape_cast %292 : vector<1x8x1xf32> to vector<8x1xf32>
      %294 = vector.broadcast %293 : vector<8x1xf32> to vector<8x4xf32>
      %295 = arith.divf %291, %294 : vector<8x4xf32>
      %c0_190 = arith.constant 0 : index
      %c8_191 = arith.constant 8 : index
      %296 = vector.load %arg11[%c0_190, %c8_191] : memref<8x32xf32, #tpu.memory_space<vmem>>, vector<8x4xf32>
      tpu.vector_store %arg11[%c0_190, %c8_191], %295 {strides = array<i32>} : memref<8x32xf32, #tpu.memory_space<vmem>>, vector<8x4xf32>,
      %c0_192 = arith.constant 0 : index
      %c12_193 = arith.constant 12 : index
      %297 = vector.load %arg10[%c0_192, %c12_193] : memref<8x32xf32, #tpu.memory_space<vmem>>, vector<8x4xf32>
      %c3_194 = arith.constant 3 : index
      %c0_195 = arith.constant 0 : index
      %c0_196 = arith.constant 0 : index
      %298 = vector.load %arg13[%c3_194, %c0_195, %c0_196] : memref<8x8x1xf32, #tpu.memory_space<vmem>>, vector<1x8x1xf32>
      %299 = vector.shape_cast %298 : vector<1x8x1xf32> to vector<8x1xf32>
      %300 = vector.broadcast %299 : vector<8x1xf32> to vector<8x4xf32>
      %301 = arith.divf %297, %300 : vector<8x4xf32>
      %c0_197 = arith.constant 0 : index
      %c12_198 = arith.constant 12 : index
      %302 = vector.load %arg11[%c0_197, %c12_198] : memref<8x32xf32, #tpu.memory_space<vmem>>, vector<8x4xf32>
      tpu.vector_store %arg11[%c0_197, %c12_198], %301 {strides = array<i32>} : memref<8x32xf32, #tpu.memory_space<vmem>>, vector<8x4xf32>,
      %c0_199 = arith.constant 0 : index
      %c16_200 = arith.constant 16 : index
      %303 = vector.load %arg10[%c0_199, %c16_200] : memref<8x32xf32, #tpu.memory_space<vmem>>, vector<8x4xf32>
      %c4_201 = arith.constant 4 : index
      %c0_202 = arith.constant 0 : index
      %c0_203 = arith.constant 0 : index
      %304 = vector.load %arg13[%c4_201, %c0_202, %c0_203] : memref<8x8x1xf32, #tpu.memory_space<vmem>>, vector<1x8x1xf32>
      %305 = vector.shape_cast %304 : vector<1x8x1xf32> to vector<8x1xf32>
      %306 = vector.broadcast %305 : vector<8x1xf32> to vector<8x4xf32>
      %307 = arith.divf %303, %306 : vector<8x4xf32>
      %c0_204 = arith.constant 0 : index
      %c16_205 = arith.constant 16 : index
      %308 = vector.load %arg11[%c0_204, %c16_205] : memref<8x32xf32, #tpu.memory_space<vmem>>, vector<8x4xf32>
      tpu.vector_store %arg11[%c0_204, %c16_205], %307 {strides = array<i32>} : memref<8x32xf32, #tpu.memory_space<vmem>>, vector<8x4xf32>,
      %c0_206 = arith.constant 0 : index
      %c20_207 = arith.constant 20 : index
      %309 = vector.load %arg10[%c0_206, %c20_207] : memref<8x32xf32, #tpu.memory_space<vmem>>, vector<8x4xf32>
      %c5_208 = arith.constant 5 : index
      %c0_209 = arith.constant 0 : index
      %c0_210 = arith.constant 0 : index
      %310 = vector.load %arg13[%c5_208, %c0_209, %c0_210] : memref<8x8x1xf32, #tpu.memory_space<vmem>>, vector<1x8x1xf32>
      %311 = vector.shape_cast %310 : vector<1x8x1xf32> to vector<8x1xf32>
      %312 = vector.broadcast %311 : vector<8x1xf32> to vector<8x4xf32>
      %313 = arith.divf %309, %312 : vector<8x4xf32>
      %c0_211 = arith.constant 0 : index
      %c20_212 = arith.constant 20 : index
      %314 = vector.load %arg11[%c0_211, %c20_212] : memref<8x32xf32, #tpu.memory_space<vmem>>, vector<8x4xf32>
      tpu.vector_store %arg11[%c0_211, %c20_212], %313 {strides = array<i32>} : memref<8x32xf32, #tpu.memory_space<vmem>>, vector<8x4xf32>,
      %c0_213 = arith.constant 0 : index
      %c24_214 = arith.constant 24 : index
      %315 = vector.load %arg10[%c0_213, %c24_214] : memref<8x32xf32, #tpu.memory_space<vmem>>, vector<8x4xf32>
      %c6_215 = arith.constant 6 : index
      %c0_216 = arith.constant 0 : index
      %c0_217 = arith.constant 0 : index
      %316 = vector.load %arg13[%c6_215, %c0_216, %c0_217] : memref<8x8x1xf32, #tpu.memory_space<vmem>>, vector<1x8x1xf32>
      %317 = vector.shape_cast %316 : vector<1x8x1xf32> to vector<8x1xf32>
      %318 = vector.broadcast %317 : vector<8x1xf32> to vector<8x4xf32>
      %319 = arith.divf %315, %318 : vector<8x4xf32>
      %c0_218 = arith.constant 0 : index
      %c24_219 = arith.constant 24 : index
      %320 = vector.load %arg11[%c0_218, %c24_219] : memref<8x32xf32, #tpu.memory_space<vmem>>, vector<8x4xf32>
      tpu.vector_store %arg11[%c0_218, %c24_219], %319 {strides = array<i32>} : memref<8x32xf32, #tpu.memory_space<vmem>>, vector<8x4xf32>,
      %c0_220 = arith.constant 0 : index
      %c28_221 = arith.constant 28 : index
      %321 = vector.load %arg10[%c0_220, %c28_221] : memref<8x32xf32, #tpu.memory_space<vmem>>, vector<8x4xf32>
      %c7_222 = arith.constant 7 : index
      %c0_223 = arith.constant 0 : index
      %c0_224 = arith.constant 0 : index
      %322 = vector.load %arg13[%c7_222, %c0_223, %c0_224] : memref<8x8x1xf32, #tpu.memory_space<vmem>>, vector<1x8x1xf32>
      %323 = vector.shape_cast %322 : vector<1x8x1xf32> to vector<8x1xf32>
      %324 = vector.broadcast %323 : vector<8x1xf32> to vector<8x4xf32>
      %325 = arith.divf %321, %324 : vector<8x4xf32>
      %c0_225 = arith.constant 0 : index
      %c28_226 = arith.constant 28 : index
      %326 = vector.load %arg11[%c0_225, %c28_226] : memref<8x32xf32, #tpu.memory_space<vmem>>, vector<8x4xf32>
      tpu.vector_store %arg11[%c0_225, %c28_226], %325 {strides = array<i32>} : memref<8x32xf32, #tpu.memory_space<vmem>>, vector<8x4xf32>,
      %c0_227 = arith.constant 0 : index
      %c0_228 = arith.constant 0 : index
      %327 = vector.load %arg11[%c0_227, %c0_228] : memref<8x32xf32, #tpu.memory_space<vmem>>, vector<8x32xf32>
      %328 = arith.truncf %327 : vector<8x32xf32> to vector<8x32xbf16>
      %c0_229 = arith.constant 0 : index
      %c0_230 = arith.constant 0 : index
      %329 = vector.load %arg6[%c0_229, %c0_230] : memref<32x32xbf16, #tpu.memory_space<vmem>>, vector<32x32xbf16>
      %cst_231 = arith.constant dense<0.000000e+00> : vector<8x32xf32>
      %330 = tpu.matmul %328, %329, %cst_231 {dimension_numbers = #tpu.dot_dimension_numbers<[1], [0], [0], [1], [0, 0, 1, 1], [], []>} : vector<8x32xbf16>, vector<32x32xbf16>, vector<8x32xf32> -> vector<8x32xf32>
      %c0_232 = arith.constant 0 : index
      %c0_233 = arith.constant 0 : index
      %331 = vector.load %arg7[%c0_232, %c0_233] : memref<1x32xf32, #tpu.memory_space<vmem>>, vector<1x32xf32>
      %332 = vector.broadcast %331 : vector<1x32xf32> to vector<8x32xf32>
      %333 = arith.addf %330, %332 : vector<8x32xf32>
      %c0_234 = arith.constant 0 : index
      %c0_235 = arith.constant 0 : index
      %c0_236 = arith.constant 0 : index
      %334 = vector.load %arg8[%c0_234, %c0_235, %c0_236] : memref<1x8x32xf32, #tpu.memory_space<vmem>>, vector<1x8x32xf32>
      %335 = vector.shape_cast %334 : vector<1x8x32xf32> to vector<8x32xf32>
      %336 = vector.shape_cast %333 : vector<8x32xf32> to vector<1x8x32xf32>
      tpu.vector_store %arg8[%c0_234, %c0_235, %c0_236], %336 {strides = array<i32>} : memref<1x8x32xf32, #tpu.memory_space<vmem>>, vector<1x8x32xf32>,
    } else {
    }
    return
  }
  func.func @transform_0(%arg0: i32, %arg1: i32, %arg2: i32) -> (i32, i32, i32) {
    %c0_i32 = arith.constant 0 : i32
    %c0_i32_0 = arith.constant 0 : i32
    return %arg0, %arg1, %c0_i32 : i32, i32, i32
  }
  func.func @transform_1(%arg0: i32, %arg1: i32, %arg2: i32) -> (i32, i32, i32) {
    %c0_i32 = arith.constant 0 : i32
    %c0_i32_0 = arith.constant 0 : i32
    return %arg0, %arg2, %c0_i32 : i32, i32, i32
  }
  func.func @transform_2(%arg0: i32, %arg1: i32, %arg2: i32) -> (i32, i32) {
    %c0_i32 = arith.constant 0 : i32
    %c0_i32_0 = arith.constant 0 : i32
    %c0_i32_1 = arith.constant 0 : i32
    return %c0_i32, %c0_i32_0 : i32, i32
  }
  func.func @transform_3(%arg0: i32, %arg1: i32, %arg2: i32) -> (i32, i32) {
    %c0_i32 = arith.constant 0 : i32
    %c0_i32_0 = arith.constant 0 : i32
    %c0_i32_1 = arith.constant 0 : i32
    return %c0_i32, %c0_i32_0 : i32, i32
  }
  func.func @transform_4(%arg0: i32, %arg1: i32, %arg2: i32) -> (i32, i32) {
    %c0_i32 = arith.constant 0 : i32
    %c0_i32_0 = arith.constant 0 : i32
    %c0_i32_1 = arith.constant 0 : i32
    return %c0_i32, %c0_i32_0 : i32, i32
  }
  func.func @transform_5(%arg0: i32, %arg1: i32, %arg2: i32) -> (i32, i32, i32) {
    %c0_i32 = arith.constant 0 : i32
    %c0_i32_0 = arith.constant 0 : i32
    return %arg0, %arg1, %c0_i32 : i32, i32, i32
  }
}

module attributes {stable_mosaic.version = 11 : i64} {
  func.func @msa_flash_kernel(%arg0: i32, %arg1: i32, %arg2: i32, %arg3: memref<1x8x32xf32, #tpu.memory_space<vmem>>, %arg4: memref<1x8x32xf32, #tpu.memory_space<vmem>>, %arg5: memref<32x96xbf16, #tpu.memory_space<vmem>>, %arg6: memref<32x32xbf16, #tpu.memory_space<vmem>>, %arg7: memref<1x32xf32, #tpu.memory_space<vmem>>, %arg8: memref<1x8x32xf32, #tpu.memory_space<vmem>>, %arg9: memref<8x32xbf16, #tpu.memory_space<vmem>>, %arg10: memref<8x32xf32, #tpu.memory_space<vmem>>, %arg11: memref<8x32xf32, #tpu.memory_space<vmem>>, %arg12: memref<8x8x1xf32, #tpu.memory_space<vmem>>, %arg13: memref<8x8x1xf32, #tpu.memory_space<vmem>>) attributes {dimension_semantics = [#tpu.dimension_semantics<parallel>, #tpu.dimension_semantics<parallel>, #tpu.dimension_semantics<arbitrary>], iteration_bounds = array<i64: 2, 1, 1>, scalar_prefetch = 0 : i64, scratch_operands = 5 : i64, tpu.core_type = #tpu.core_type<tc>, window_params = [{transform_indices = @transform_0, window_bounds = array<i64: 1, 8, 32>}, {transform_indices = @transform_1, window_bounds = array<i64: 1, 8, 32>}, {pipeline_mode = #tpu.pipeline_mode<synchronous>, transform_indices = @transform_2, window_bounds = array<i64: 32, 96>}, {pipeline_mode = #tpu.pipeline_mode<synchronous>, transform_indices = @transform_3, window_bounds = array<i64: 32, 32>}, {pipeline_mode = #tpu.pipeline_mode<synchronous>, transform_indices = @transform_4, window_bounds = array<i64: 1, 32>}, {transform_indices = @transform_5, window_bounds = array<i64: 1, 8, 32>}]} {
    %c0_i32 = arith.constant 0 : i32
    %0 = arith.cmpi eq, %arg2, %c0_i32 : i32
    %1 = arith.extui %0 : i1 to i32
    %c0_i32_0 = arith.constant 0 : i32
    %2 = arith.cmpi ne, %1, %c0_i32_0 : i32
    scf.if %2 {
      %c0_171 = arith.constant 0 : index
      %c0_172 = arith.constant 0 : index
      %c0_173 = arith.constant 0 : index
      %279 = vector.load %arg3[%c0_171, %c0_172, %c0_173] : memref<1x8x32xf32, #tpu.memory_space<vmem>>, vector<1x8x32xf32>
      %280 = vector.shape_cast %279 : vector<1x8x32xf32> to vector<8x32xf32>
      %281 = arith.truncf %280 : vector<8x32xf32> to vector<8x32xbf16>
      %c0_174 = arith.constant 0 : index
      %c0_175 = arith.constant 0 : index
      %282 = vector.load %arg5[%c0_174, %c0_175] : memref<32x96xbf16, #tpu.memory_space<vmem>>, vector<32x32xbf16>
      %cst_176 = arith.constant dense<0.000000e+00> : vector<8x32xf32>
      %283 = tpu.matmul %281, %282, %cst_176 {dimension_numbers = #tpu.dot_dimension_numbers<[1], [0], [0], [1], [0, 0, 1, 1], [], []>} : vector<8x32xbf16>, vector<32x32xbf16>, vector<8x32xf32> -> vector<8x32xf32>
      %cst_177 = arith.constant 5.000000e-01 : f32
      %284 = vector.broadcast %cst_177 : f32 to vector<8x32xf32>
      %285 = arith.mulf %283, %284 : vector<8x32xf32>
      %286 = arith.truncf %285 : vector<8x32xf32> to vector<8x32xbf16>
      %c0_178 = arith.constant 0 : index
      %c0_179 = arith.constant 0 : index
      %287 = vector.load %arg9[%c0_178, %c0_179] : memref<8x32xbf16, #tpu.memory_space<vmem>>, vector<8x32xbf16>
      tpu.vector_store %arg9[%c0_178, %c0_179], %286 {strides = array<i32>} : memref<8x32xbf16, #tpu.memory_space<vmem>>, vector<8x32xbf16>,
      %cst_180 = arith.constant 0xFF800000 : f32
      %288 = vector.broadcast %cst_180 : f32 to vector<8x8x1xf32>
      %c0_181 = arith.constant 0 : index
      %c0_182 = arith.constant 0 : index
      %c0_183 = arith.constant 0 : index
      %289 = vector.load %arg12[%c0_181, %c0_182, %c0_183] : memref<8x8x1xf32, #tpu.memory_space<vmem>>, vector<8x8x1xf32>
      tpu.vector_store %arg12[%c0_181, %c0_182, %c0_183], %288 {strides = array<i32>} : memref<8x8x1xf32, #tpu.memory_space<vmem>>, vector<8x8x1xf32>,
      %cst_184 = arith.constant 0.000000e+00 : f32
      %290 = vector.broadcast %cst_184 : f32 to vector<8x8x1xf32>
      %c0_185 = arith.constant 0 : index
      %c0_186 = arith.constant 0 : index
      %c0_187 = arith.constant 0 : index
      %291 = vector.load %arg13[%c0_185, %c0_186, %c0_187] : memref<8x8x1xf32, #tpu.memory_space<vmem>>, vector<8x8x1xf32>
      tpu.vector_store %arg13[%c0_185, %c0_186, %c0_187], %290 {strides = array<i32>} : memref<8x8x1xf32, #tpu.memory_space<vmem>>, vector<8x8x1xf32>,
      %cst_188 = arith.constant 0.000000e+00 : f32
      %292 = vector.broadcast %cst_188 : f32 to vector<8x32xf32>
      %c0_189 = arith.constant 0 : index
      %c0_190 = arith.constant 0 : index
      %293 = vector.load %arg10[%c0_189, %c0_190] : memref<8x32xf32, #tpu.memory_space<vmem>>, vector<8x32xf32>
      tpu.vector_store %arg10[%c0_189, %c0_190], %292 {strides = array<i32>} : memref<8x32xf32, #tpu.memory_space<vmem>>, vector<8x32xf32>,
    } else {
    }
    %c0 = arith.constant 0 : index
    %c0_1 = arith.constant 0 : index
    %c0_2 = arith.constant 0 : index
    %3 = vector.load %arg4[%c0, %c0_1, %c0_2] : memref<1x8x32xf32, #tpu.memory_space<vmem>>, vector<1x8x32xf32>
    %4 = vector.shape_cast %3 : vector<1x8x32xf32> to vector<8x32xf32>
    %5 = arith.truncf %4 : vector<8x32xf32> to vector<8x32xbf16>
    %c0_3 = arith.constant 0 : index
    %c32 = arith.constant 32 : index
    %6 = vector.load %arg5[%c0_3, %c32] : memref<32x96xbf16, #tpu.memory_space<vmem>>, vector<32x32xbf16>
    %cst = arith.constant dense<0.000000e+00> : vector<8x32xf32>
    %7 = tpu.matmul %5, %6, %cst {dimension_numbers = #tpu.dot_dimension_numbers<[1], [0], [0], [1], [0, 0, 1, 1], [], []>} : vector<8x32xbf16>, vector<32x32xbf16>, vector<8x32xf32> -> vector<8x32xf32>
    %8 = arith.truncf %7 : vector<8x32xf32> to vector<8x32xbf16>
    %c0_4 = arith.constant 0 : index
    %c64 = arith.constant 64 : index
    %9 = vector.load %arg5[%c0_4, %c64] : memref<32x96xbf16, #tpu.memory_space<vmem>>, vector<32x32xbf16>
    %cst_5 = arith.constant dense<0.000000e+00> : vector<8x32xf32>
    %10 = tpu.matmul %5, %9, %cst_5 {dimension_numbers = #tpu.dot_dimension_numbers<[1], [0], [0], [1], [0, 0, 1, 1], [], []>} : vector<8x32xbf16>, vector<32x32xbf16>, vector<8x32xf32> -> vector<8x32xf32>
    %11 = arith.truncf %10 : vector<8x32xf32> to vector<8x32xbf16>
    %c0_6 = arith.constant 0 : index
    %c0_7 = arith.constant 0 : index
    %12 = vector.load %arg9[%c0_6, %c0_7] : memref<8x32xbf16, #tpu.memory_space<vmem>>, vector<8x4xbf16>
    %13 = vector.extract_strided_slice %8 {offsets = [0, 0], sizes = [8, 4], strides = [1, 1]} : vector<8x32xbf16> to vector<8x4xbf16>
    %cst_8 = arith.constant dense<0.000000e+00> : vector<8x8xf32>
    %14 = tpu.matmul %12, %13, %cst_8 {dimension_numbers = #tpu.dot_dimension_numbers<[1], [1], [0], [0], [0, 0, 1, 0], [], []>} : vector<8x4xbf16>, vector<8x4xbf16>, vector<8x8xf32> -> vector<8x8xf32>
    %c0_9 = arith.constant 0 : index
    %c0_10 = arith.constant 0 : index
    %c0_11 = arith.constant 0 : index
    %15 = vector.load %arg12[%c0_9, %c0_10, %c0_11] : memref<8x8x1xf32, #tpu.memory_space<vmem>>, vector<1x8x1xf32>
    %16 = vector.shape_cast %15 : vector<1x8x1xf32> to vector<8x1xf32>
    %cst_12 = arith.constant dense<0xFF800000> : vector<8xf32>
    %17 = vector.multi_reduction <maximumf>, %14, %cst_12 [1] : vector<8x8xf32> to vector<8xf32>
    %18 = vector.shape_cast %17 : vector<8xf32> to vector<8x1xf32>
    %19 = arith.maximumf %16, %18 : vector<8x1xf32>
    %20 = arith.subf %16, %19 : vector<8x1xf32>
    %21 = math.exp %20 : vector<8x1xf32>
    %22 = vector.broadcast %19 : vector<8x1xf32> to vector<8x8xf32>
    %23 = arith.subf %14, %22 : vector<8x8xf32>
    %24 = math.exp %23 : vector<8x8xf32>
    %c0_13 = arith.constant 0 : index
    %c0_14 = arith.constant 0 : index
    %c0_15 = arith.constant 0 : index
    %25 = vector.load %arg13[%c0_13, %c0_14, %c0_15] : memref<8x8x1xf32, #tpu.memory_space<vmem>>, vector<1x8x1xf32>
    %26 = vector.shape_cast %25 : vector<1x8x1xf32> to vector<8x1xf32>
    %27 = arith.mulf %21, %26 : vector<8x1xf32>
    %cst_16 = arith.constant dense<0.000000e+00> : vector<8xf32>
    %28 = vector.multi_reduction <add>, %24, %cst_16 [1] : vector<8x8xf32> to vector<8xf32>
    %29 = vector.shape_cast %28 : vector<8xf32> to vector<8x1xf32>
    %30 = arith.addf %27, %29 : vector<8x1xf32>
    %c0_17 = arith.constant 0 : index
    %c0_18 = arith.constant 0 : index
    %c0_19 = arith.constant 0 : index
    %31 = vector.load %arg13[%c0_17, %c0_18, %c0_19] : memref<8x8x1xf32, #tpu.memory_space<vmem>>, vector<1x8x1xf32>
    %32 = vector.shape_cast %31 : vector<1x8x1xf32> to vector<8x1xf32>
    %33 = vector.shape_cast %30 : vector<8x1xf32> to vector<1x8x1xf32>
    tpu.vector_store %arg13[%c0_17, %c0_18, %c0_19], %33 {strides = array<i32>} : memref<8x8x1xf32, #tpu.memory_space<vmem>>, vector<1x8x1xf32>,
    %c0_20 = arith.constant 0 : index
    %c0_21 = arith.constant 0 : index
    %34 = vector.load %arg10[%c0_20, %c0_21] : memref<8x32xf32, #tpu.memory_space<vmem>>, vector<8x4xf32>
    %35 = vector.broadcast %21 : vector<8x1xf32> to vector<8x4xf32>
    %36 = arith.mulf %35, %34 : vector<8x4xf32>
    %37 = arith.truncf %24 : vector<8x8xf32> to vector<8x8xbf16>
    %38 = vector.extract_strided_slice %11 {offsets = [0, 0], sizes = [8, 4], strides = [1, 1]} : vector<8x32xbf16> to vector<8x4xbf16>
    %cst_22 = arith.constant dense<0.000000e+00> : vector<8x4xf32>
    %39 = tpu.matmul %37, %38, %cst_22 {dimension_numbers = #tpu.dot_dimension_numbers<[1], [0], [0], [1], [0, 0, 1, 1], [], []>} : vector<8x8xbf16>, vector<8x4xbf16>, vector<8x4xf32> -> vector<8x4xf32>
    %40 = arith.addf %36, %39 : vector<8x4xf32>
    %c0_23 = arith.constant 0 : index
    %c0_24 = arith.constant 0 : index
    %41 = vector.load %arg10[%c0_23, %c0_24] : memref<8x32xf32, #tpu.memory_space<vmem>>, vector<8x4xf32>
    tpu.vector_store %arg10[%c0_23, %c0_24], %40 {strides = array<i32>} : memref<8x32xf32, #tpu.memory_space<vmem>>, vector<8x4xf32>,
    %c0_25 = arith.constant 0 : index
    %c0_26 = arith.constant 0 : index
    %c0_27 = arith.constant 0 : index
    %42 = vector.load %arg12[%c0_25, %c0_26, %c0_27] : memref<8x8x1xf32, #tpu.memory_space<vmem>>, vector<1x8x1xf32>
    %43 = vector.shape_cast %42 : vector<1x8x1xf32> to vector<8x1xf32>
    %44 = vector.shape_cast %19 : vector<8x1xf32> to vector<1x8x1xf32>
    tpu.vector_store %arg12[%c0_25, %c0_26, %c0_27], %44 {strides = array<i32>} : memref<8x8x1xf32, #tpu.memory_space<vmem>>, vector<1x8x1xf32>,
    %c0_28 = arith.constant 0 : index
    %c4 = arith.constant 4 : index
    %45 = vector.load %arg9[%c0_28, %c4] : memref<8x32xbf16, #tpu.memory_space<vmem>>, vector<8x4xbf16>
    %46 = vector.extract_strided_slice %8 {offsets = [0, 4], sizes = [8, 4], strides = [1, 1]} : vector<8x32xbf16> to vector<8x4xbf16>
    %cst_29 = arith.constant dense<0.000000e+00> : vector<8x8xf32>
    %47 = tpu.matmul %45, %46, %cst_29 {dimension_numbers = #tpu.dot_dimension_numbers<[1], [1], [0], [0], [0, 0, 1, 0], [], []>} : vector<8x4xbf16>, vector<8x4xbf16>, vector<8x8xf32> -> vector<8x8xf32>
    %c1 = arith.constant 1 : index
    %c0_30 = arith.constant 0 : index
    %c0_31 = arith.constant 0 : index
    %48 = vector.load %arg12[%c1, %c0_30, %c0_31] : memref<8x8x1xf32, #tpu.memory_space<vmem>>, vector<1x8x1xf32>
    %49 = vector.shape_cast %48 : vector<1x8x1xf32> to vector<8x1xf32>
    %cst_32 = arith.constant dense<0xFF800000> : vector<8xf32>
    %50 = vector.multi_reduction <maximumf>, %47, %cst_32 [1] : vector<8x8xf32> to vector<8xf32>
    %51 = vector.shape_cast %50 : vector<8xf32> to vector<8x1xf32>
    %52 = arith.maximumf %49, %51 : vector<8x1xf32>
    %53 = arith.subf %49, %52 : vector<8x1xf32>
    %54 = math.exp %53 : vector<8x1xf32>
    %55 = vector.broadcast %52 : vector<8x1xf32> to vector<8x8xf32>
    %56 = arith.subf %47, %55 : vector<8x8xf32>
    %57 = math.exp %56 : vector<8x8xf32>
    %c1_33 = arith.constant 1 : index
    %c0_34 = arith.constant 0 : index
    %c0_35 = arith.constant 0 : index
    %58 = vector.load %arg13[%c1_33, %c0_34, %c0_35] : memref<8x8x1xf32, #tpu.memory_space<vmem>>, vector<1x8x1xf32>
    %59 = vector.shape_cast %58 : vector<1x8x1xf32> to vector<8x1xf32>
    %60 = arith.mulf %54, %59 : vector<8x1xf32>
    %cst_36 = arith.constant dense<0.000000e+00> : vector<8xf32>
    %61 = vector.multi_reduction <add>, %57, %cst_36 [1] : vector<8x8xf32> to vector<8xf32>
    %62 = vector.shape_cast %61 : vector<8xf32> to vector<8x1xf32>
    %63 = arith.addf %60, %62 : vector<8x1xf32>
    %c1_37 = arith.constant 1 : index
    %c0_38 = arith.constant 0 : index
    %c0_39 = arith.constant 0 : index
    %64 = vector.load %arg13[%c1_37, %c0_38, %c0_39] : memref<8x8x1xf32, #tpu.memory_space<vmem>>, vector<1x8x1xf32>
    %65 = vector.shape_cast %64 : vector<1x8x1xf32> to vector<8x1xf32>
    %66 = vector.shape_cast %63 : vector<8x1xf32> to vector<1x8x1xf32>
    tpu.vector_store %arg13[%c1_37, %c0_38, %c0_39], %66 {strides = array<i32>} : memref<8x8x1xf32, #tpu.memory_space<vmem>>, vector<1x8x1xf32>,
    %c0_40 = arith.constant 0 : index
    %c4_41 = arith.constant 4 : index
    %67 = vector.load %arg10[%c0_40, %c4_41] : memref<8x32xf32, #tpu.memory_space<vmem>>, vector<8x4xf32>
    %68 = vector.broadcast %54 : vector<8x1xf32> to vector<8x4xf32>
    %69 = arith.mulf %68, %67 : vector<8x4xf32>
    %70 = arith.truncf %57 : vector<8x8xf32> to vector<8x8xbf16>
    %71 = vector.extract_strided_slice %11 {offsets = [0, 4], sizes = [8, 4], strides = [1, 1]} : vector<8x32xbf16> to vector<8x4xbf16>
    %cst_42 = arith.constant dense<0.000000e+00> : vector<8x4xf32>
    %72 = tpu.matmul %70, %71, %cst_42 {dimension_numbers = #tpu.dot_dimension_numbers<[1], [0], [0], [1], [0, 0, 1, 1], [], []>} : vector<8x8xbf16>, vector<8x4xbf16>, vector<8x4xf32> -> vector<8x4xf32>
    %73 = arith.addf %69, %72 : vector<8x4xf32>
    %c0_43 = arith.constant 0 : index
    %c4_44 = arith.constant 4 : index
    %74 = vector.load %arg10[%c0_43, %c4_44] : memref<8x32xf32, #tpu.memory_space<vmem>>, vector<8x4xf32>
    tpu.vector_store %arg10[%c0_43, %c4_44], %73 {strides = array<i32>} : memref<8x32xf32, #tpu.memory_space<vmem>>, vector<8x4xf32>,
    %c1_45 = arith.constant 1 : index
    %c0_46 = arith.constant 0 : index
    %c0_47 = arith.constant 0 : index
    %75 = vector.load %arg12[%c1_45, %c0_46, %c0_47] : memref<8x8x1xf32, #tpu.memory_space<vmem>>, vector<1x8x1xf32>
    %76 = vector.shape_cast %75 : vector<1x8x1xf32> to vector<8x1xf32>
    %77 = vector.shape_cast %52 : vector<8x1xf32> to vector<1x8x1xf32>
    tpu.vector_store %arg12[%c1_45, %c0_46, %c0_47], %77 {strides = array<i32>} : memref<8x8x1xf32, #tpu.memory_space<vmem>>, vector<1x8x1xf32>,
    %c0_48 = arith.constant 0 : index
    %c8 = arith.constant 8 : index
    %78 = vector.load %arg9[%c0_48, %c8] : memref<8x32xbf16, #tpu.memory_space<vmem>>, vector<8x4xbf16>
    %79 = vector.extract_strided_slice %8 {offsets = [0, 8], sizes = [8, 4], strides = [1, 1]} : vector<8x32xbf16> to vector<8x4xbf16>
    %cst_49 = arith.constant dense<0.000000e+00> : vector<8x8xf32>
    %80 = tpu.matmul %78, %79, %cst_49 {dimension_numbers = #tpu.dot_dimension_numbers<[1], [1], [0], [0], [0, 0, 1, 0], [], []>} : vector<8x4xbf16>, vector<8x4xbf16>, vector<8x8xf32> -> vector<8x8xf32>
    %c2 = arith.constant 2 : index
    %c0_50 = arith.constant 0 : index
    %c0_51 = arith.constant 0 : index
    %81 = vector.load %arg12[%c2, %c0_50, %c0_51] : memref<8x8x1xf32, #tpu.memory_space<vmem>>, vector<1x8x1xf32>
    %82 = vector.shape_cast %81 : vector<1x8x1xf32> to vector<8x1xf32>
    %cst_52 = arith.constant dense<0xFF800000> : vector<8xf32>
    %83 = vector.multi_reduction <maximumf>, %80, %cst_52 [1] : vector<8x8xf32> to vector<8xf32>
    %84 = vector.shape_cast %83 : vector<8xf32> to vector<8x1xf32>
    %85 = arith.maximumf %82, %84 : vector<8x1xf32>
    %86 = arith.subf %82, %85 : vector<8x1xf32>
    %87 = math.exp %86 : vector<8x1xf32>
    %88 = vector.broadcast %85 : vector<8x1xf32> to vector<8x8xf32>
    %89 = arith.subf %80, %88 : vector<8x8xf32>
    %90 = math.exp %89 : vector<8x8xf32>
    %c2_53 = arith.constant 2 : index
    %c0_54 = arith.constant 0 : index
    %c0_55 = arith.constant 0 : index
    %91 = vector.load %arg13[%c2_53, %c0_54, %c0_55] : memref<8x8x1xf32, #tpu.memory_space<vmem>>, vector<1x8x1xf32>
    %92 = vector.shape_cast %91 : vector<1x8x1xf32> to vector<8x1xf32>
    %93 = arith.mulf %87, %92 : vector<8x1xf32>
    %cst_56 = arith.constant dense<0.000000e+00> : vector<8xf32>
    %94 = vector.multi_reduction <add>, %90, %cst_56 [1] : vector<8x8xf32> to vector<8xf32>
    %95 = vector.shape_cast %94 : vector<8xf32> to vector<8x1xf32>
    %96 = arith.addf %93, %95 : vector<8x1xf32>
    %c2_57 = arith.constant 2 : index
    %c0_58 = arith.constant 0 : index
    %c0_59 = arith.constant 0 : index
    %97 = vector.load %arg13[%c2_57, %c0_58, %c0_59] : memref<8x8x1xf32, #tpu.memory_space<vmem>>, vector<1x8x1xf32>
    %98 = vector.shape_cast %97 : vector<1x8x1xf32> to vector<8x1xf32>
    %99 = vector.shape_cast %96 : vector<8x1xf32> to vector<1x8x1xf32>
    tpu.vector_store %arg13[%c2_57, %c0_58, %c0_59], %99 {strides = array<i32>} : memref<8x8x1xf32, #tpu.memory_space<vmem>>, vector<1x8x1xf32>,
    %c0_60 = arith.constant 0 : index
    %c8_61 = arith.constant 8 : index
    %100 = vector.load %arg10[%c0_60, %c8_61] : memref<8x32xf32, #tpu.memory_space<vmem>>, vector<8x4xf32>
    %101 = vector.broadcast %87 : vector<8x1xf32> to vector<8x4xf32>
    %102 = arith.mulf %101, %100 : vector<8x4xf32>
    %103 = arith.truncf %90 : vector<8x8xf32> to vector<8x8xbf16>
    %104 = vector.extract_strided_slice %11 {offsets = [0, 8], sizes = [8, 4], strides = [1, 1]} : vector<8x32xbf16> to vector<8x4xbf16>
    %cst_62 = arith.constant dense<0.000000e+00> : vector<8x4xf32>
    %105 = tpu.matmul %103, %104, %cst_62 {dimension_numbers = #tpu.dot_dimension_numbers<[1], [0], [0], [1], [0, 0, 1, 1], [], []>} : vector<8x8xbf16>, vector<8x4xbf16>, vector<8x4xf32> -> vector<8x4xf32>
    %106 = arith.addf %102, %105 : vector<8x4xf32>
    %c0_63 = arith.constant 0 : index
    %c8_64 = arith.constant 8 : index
    %107 = vector.load %arg10[%c0_63, %c8_64] : memref<8x32xf32, #tpu.memory_space<vmem>>, vector<8x4xf32>
    tpu.vector_store %arg10[%c0_63, %c8_64], %106 {strides = array<i32>} : memref<8x32xf32, #tpu.memory_space<vmem>>, vector<8x4xf32>,
    %c2_65 = arith.constant 2 : index
    %c0_66 = arith.constant 0 : index
    %c0_67 = arith.constant 0 : index
    %108 = vector.load %arg12[%c2_65, %c0_66, %c0_67] : memref<8x8x1xf32, #tpu.memory_space<vmem>>, vector<1x8x1xf32>
    %109 = vector.shape_cast %108 : vector<1x8x1xf32> to vector<8x1xf32>
    %110 = vector.shape_cast %85 : vector<8x1xf32> to vector<1x8x1xf32>
    tpu.vector_store %arg12[%c2_65, %c0_66, %c0_67], %110 {strides = array<i32>} : memref<8x8x1xf32, #tpu.memory_space<vmem>>, vector<1x8x1xf32>,
    %c0_68 = arith.constant 0 : index
    %c12 = arith.constant 12 : index
    %111 = vector.load %arg9[%c0_68, %c12] : memref<8x32xbf16, #tpu.memory_space<vmem>>, vector<8x4xbf16>
    %112 = vector.extract_strided_slice %8 {offsets = [0, 12], sizes = [8, 4], strides = [1, 1]} : vector<8x32xbf16> to vector<8x4xbf16>
    %cst_69 = arith.constant dense<0.000000e+00> : vector<8x8xf32>
    %113 = tpu.matmul %111, %112, %cst_69 {dimension_numbers = #tpu.dot_dimension_numbers<[1], [1], [0], [0], [0, 0, 1, 0], [], []>} : vector<8x4xbf16>, vector<8x4xbf16>, vector<8x8xf32> -> vector<8x8xf32>
    %c3 = arith.constant 3 : index
    %c0_70 = arith.constant 0 : index
    %c0_71 = arith.constant 0 : index
    %114 = vector.load %arg12[%c3, %c0_70, %c0_71] : memref<8x8x1xf32, #tpu.memory_space<vmem>>, vector<1x8x1xf32>
    %115 = vector.shape_cast %114 : vector<1x8x1xf32> to vector<8x1xf32>
    %cst_72 = arith.constant dense<0xFF800000> : vector<8xf32>
    %116 = vector.multi_reduction <maximumf>, %113, %cst_72 [1] : vector<8x8xf32> to vector<8xf32>
    %117 = vector.shape_cast %116 : vector<8xf32> to vector<8x1xf32>
    %118 = arith.maximumf %115, %117 : vector<8x1xf32>
    %119 = arith.subf %115, %118 : vector<8x1xf32>
    %120 = math.exp %119 : vector<8x1xf32>
    %121 = vector.broadcast %118 : vector<8x1xf32> to vector<8x8xf32>
    %122 = arith.subf %113, %121 : vector<8x8xf32>
    %123 = math.exp %122 : vector<8x8xf32>
    %c3_73 = arith.constant 3 : index
    %c0_74 = arith.constant 0 : index
    %c0_75 = arith.constant 0 : index
    %124 = vector.load %arg13[%c3_73, %c0_74, %c0_75] : memref<8x8x1xf32, #tpu.memory_space<vmem>>, vector<1x8x1xf32>
    %125 = vector.shape_cast %124 : vector<1x8x1xf32> to vector<8x1xf32>
    %126 = arith.mulf %120, %125 : vector<8x1xf32>
    %cst_76 = arith.constant dense<0.000000e+00> : vector<8xf32>
    %127 = vector.multi_reduction <add>, %123, %cst_76 [1] : vector<8x8xf32> to vector<8xf32>
    %128 = vector.shape_cast %127 : vector<8xf32> to vector<8x1xf32>
    %129 = arith.addf %126, %128 : vector<8x1xf32>
    %c3_77 = arith.constant 3 : index
    %c0_78 = arith.constant 0 : index
    %c0_79 = arith.constant 0 : index
    %130 = vector.load %arg13[%c3_77, %c0_78, %c0_79] : memref<8x8x1xf32, #tpu.memory_space<vmem>>, vector<1x8x1xf32>
    %131 = vector.shape_cast %130 : vector<1x8x1xf32> to vector<8x1xf32>
    %132 = vector.shape_cast %129 : vector<8x1xf32> to vector<1x8x1xf32>
    tpu.vector_store %arg13[%c3_77, %c0_78, %c0_79], %132 {strides = array<i32>} : memref<8x8x1xf32, #tpu.memory_space<vmem>>, vector<1x8x1xf32>,
    %c0_80 = arith.constant 0 : index
    %c12_81 = arith.constant 12 : index
    %133 = vector.load %arg10[%c0_80, %c12_81] : memref<8x32xf32, #tpu.memory_space<vmem>>, vector<8x4xf32>
    %134 = vector.broadcast %120 : vector<8x1xf32> to vector<8x4xf32>
    %135 = arith.mulf %134, %133 : vector<8x4xf32>
    %136 = arith.truncf %123 : vector<8x8xf32> to vector<8x8xbf16>
    %137 = vector.extract_strided_slice %11 {offsets = [0, 12], sizes = [8, 4], strides = [1, 1]} : vector<8x32xbf16> to vector<8x4xbf16>
    %cst_82 = arith.constant dense<0.000000e+00> : vector<8x4xf32>
    %138 = tpu.matmul %136, %137, %cst_82 {dimension_numbers = #tpu.dot_dimension_numbers<[1], [0], [0], [1], [0, 0, 1, 1], [], []>} : vector<8x8xbf16>, vector<8x4xbf16>, vector<8x4xf32> -> vector<8x4xf32>
    %139 = arith.addf %135, %138 : vector<8x4xf32>
    %c0_83 = arith.constant 0 : index
    %c12_84 = arith.constant 12 : index
    %140 = vector.load %arg10[%c0_83, %c12_84] : memref<8x32xf32, #tpu.memory_space<vmem>>, vector<8x4xf32>
    tpu.vector_store %arg10[%c0_83, %c12_84], %139 {strides = array<i32>} : memref<8x32xf32, #tpu.memory_space<vmem>>, vector<8x4xf32>,
    %c3_85 = arith.constant 3 : index
    %c0_86 = arith.constant 0 : index
    %c0_87 = arith.constant 0 : index
    %141 = vector.load %arg12[%c3_85, %c0_86, %c0_87] : memref<8x8x1xf32, #tpu.memory_space<vmem>>, vector<1x8x1xf32>
    %142 = vector.shape_cast %141 : vector<1x8x1xf32> to vector<8x1xf32>
    %143 = vector.shape_cast %118 : vector<8x1xf32> to vector<1x8x1xf32>
    tpu.vector_store %arg12[%c3_85, %c0_86, %c0_87], %143 {strides = array<i32>} : memref<8x8x1xf32, #tpu.memory_space<vmem>>, vector<1x8x1xf32>,
    %c0_88 = arith.constant 0 : index
    %c16 = arith.constant 16 : index
    %144 = vector.load %arg9[%c0_88, %c16] : memref<8x32xbf16, #tpu.memory_space<vmem>>, vector<8x4xbf16>
    %145 = vector.extract_strided_slice %8 {offsets = [0, 16], sizes = [8, 4], strides = [1, 1]} : vector<8x32xbf16> to vector<8x4xbf16>
    %cst_89 = arith.constant dense<0.000000e+00> : vector<8x8xf32>
    %146 = tpu.matmul %144, %145, %cst_89 {dimension_numbers = #tpu.dot_dimension_numbers<[1], [1], [0], [0], [0, 0, 1, 0], [], []>} : vector<8x4xbf16>, vector<8x4xbf16>, vector<8x8xf32> -> vector<8x8xf32>
    %c4_90 = arith.constant 4 : index
    %c0_91 = arith.constant 0 : index
    %c0_92 = arith.constant 0 : index
    %147 = vector.load %arg12[%c4_90, %c0_91, %c0_92] : memref<8x8x1xf32, #tpu.memory_space<vmem>>, vector<1x8x1xf32>
    %148 = vector.shape_cast %147 : vector<1x8x1xf32> to vector<8x1xf32>
    %cst_93 = arith.constant dense<0xFF800000> : vector<8xf32>
    %149 = vector.multi_reduction <maximumf>, %146, %cst_93 [1] : vector<8x8xf32> to vector<8xf32>
    %150 = vector.shape_cast %149 : vector<8xf32> to vector<8x1xf32>
    %151 = arith.maximumf %148, %150 : vector<8x1xf32>
    %152 = arith.subf %148, %151 : vector<8x1xf32>
    %153 = math.exp %152 : vector<8x1xf32>
    %154 = vector.broadcast %151 : vector<8x1xf32> to vector<8x8xf32>
    %155 = arith.subf %146, %154 : vector<8x8xf32>
    %156 = math.exp %155 : vector<8x8xf32>
    %c4_94 = arith.constant 4 : index
    %c0_95 = arith.constant 0 : index
    %c0_96 = arith.constant 0 : index
    %157 = vector.load %arg13[%c4_94, %c0_95, %c0_96] : memref<8x8x1xf32, #tpu.memory_space<vmem>>, vector<1x8x1xf32>
    %158 = vector.shape_cast %157 : vector<1x8x1xf32> to vector<8x1xf32>
    %159 = arith.mulf %153, %158 : vector<8x1xf32>
    %cst_97 = arith.constant dense<0.000000e+00> : vector<8xf32>
    %160 = vector.multi_reduction <add>, %156, %cst_97 [1] : vector<8x8xf32> to vector<8xf32>
    %161 = vector.shape_cast %160 : vector<8xf32> to vector<8x1xf32>
    %162 = arith.addf %159, %161 : vector<8x1xf32>
    %c4_98 = arith.constant 4 : index
    %c0_99 = arith.constant 0 : index
    %c0_100 = arith.constant 0 : index
    %163 = vector.load %arg13[%c4_98, %c0_99, %c0_100] : memref<8x8x1xf32, #tpu.memory_space<vmem>>, vector<1x8x1xf32>
    %164 = vector.shape_cast %163 : vector<1x8x1xf32> to vector<8x1xf32>
    %165 = vector.shape_cast %162 : vector<8x1xf32> to vector<1x8x1xf32>
    tpu.vector_store %arg13[%c4_98, %c0_99, %c0_100], %165 {strides = array<i32>} : memref<8x8x1xf32, #tpu.memory_space<vmem>>, vector<1x8x1xf32>,
    %c0_101 = arith.constant 0 : index
    %c16_102 = arith.constant 16 : index
    %166 = vector.load %arg10[%c0_101, %c16_102] : memref<8x32xf32, #tpu.memory_space<vmem>>, vector<8x4xf32>
    %167 = vector.broadcast %153 : vector<8x1xf32> to vector<8x4xf32>
    %168 = arith.mulf %167, %166 : vector<8x4xf32>
    %169 = arith.truncf %156 : vector<8x8xf32> to vector<8x8xbf16>
    %170 = vector.extract_strided_slice %11 {offsets = [0, 16], sizes = [8, 4], strides = [1, 1]} : vector<8x32xbf16> to vector<8x4xbf16>
    %cst_103 = arith.constant dense<0.000000e+00> : vector<8x4xf32>
    %171 = tpu.matmul %169, %170, %cst_103 {dimension_numbers = #tpu.dot_dimension_numbers<[1], [0], [0], [1], [0, 0, 1, 1], [], []>} : vector<8x8xbf16>, vector<8x4xbf16>, vector<8x4xf32> -> vector<8x4xf32>
    %172 = arith.addf %168, %171 : vector<8x4xf32>
    %c0_104 = arith.constant 0 : index
    %c16_105 = arith.constant 16 : index
    %173 = vector.load %arg10[%c0_104, %c16_105] : memref<8x32xf32, #tpu.memory_space<vmem>>, vector<8x4xf32>
    tpu.vector_store %arg10[%c0_104, %c16_105], %172 {strides = array<i32>} : memref<8x32xf32, #tpu.memory_space<vmem>>, vector<8x4xf32>,
    %c4_106 = arith.constant 4 : index
    %c0_107 = arith.constant 0 : index
    %c0_108 = arith.constant 0 : index
    %174 = vector.load %arg12[%c4_106, %c0_107, %c0_108] : memref<8x8x1xf32, #tpu.memory_space<vmem>>, vector<1x8x1xf32>
    %175 = vector.shape_cast %174 : vector<1x8x1xf32> to vector<8x1xf32>
    %176 = vector.shape_cast %151 : vector<8x1xf32> to vector<1x8x1xf32>
    tpu.vector_store %arg12[%c4_106, %c0_107, %c0_108], %176 {strides = array<i32>} : memref<8x8x1xf32, #tpu.memory_space<vmem>>, vector<1x8x1xf32>,
    %c0_109 = arith.constant 0 : index
    %c20 = arith.constant 20 : index
    %177 = vector.load %arg9[%c0_109, %c20] : memref<8x32xbf16, #tpu.memory_space<vmem>>, vector<8x4xbf16>
    %178 = vector.extract_strided_slice %8 {offsets = [0, 20], sizes = [8, 4], strides = [1, 1]} : vector<8x32xbf16> to vector<8x4xbf16>
    %cst_110 = arith.constant dense<0.000000e+00> : vector<8x8xf32>
    %179 = tpu.matmul %177, %178, %cst_110 {dimension_numbers = #tpu.dot_dimension_numbers<[1], [1], [0], [0], [0, 0, 1, 0], [], []>} : vector<8x4xbf16>, vector<8x4xbf16>, vector<8x8xf32> -> vector<8x8xf32>
    %c5 = arith.constant 5 : index
    %c0_111 = arith.constant 0 : index
    %c0_112 = arith.constant 0 : index
    %180 = vector.load %arg12[%c5, %c0_111, %c0_112] : memref<8x8x1xf32, #tpu.memory_space<vmem>>, vector<1x8x1xf32>
    %181 = vector.shape_cast %180 : vector<1x8x1xf32> to vector<8x1xf32>
    %cst_113 = arith.constant dense<0xFF800000> : vector<8xf32>
    %182 = vector.multi_reduction <maximumf>, %179, %cst_113 [1] : vector<8x8xf32> to vector<8xf32>
    %183 = vector.shape_cast %182 : vector<8xf32> to vector<8x1xf32>
    %184 = arith.maximumf %181, %183 : vector<8x1xf32>
    %185 = arith.subf %181, %184 : vector<8x1xf32>
    %186 = math.exp %185 : vector<8x1xf32>
    %187 = vector.broadcast %184 : vector<8x1xf32> to vector<8x8xf32>
    %188 = arith.subf %179, %187 : vector<8x8xf32>
    %189 = math.exp %188 : vector<8x8xf32>
    %c5_114 = arith.constant 5 : index
    %c0_115 = arith.constant 0 : index
    %c0_116 = arith.constant 0 : index
    %190 = vector.load %arg13[%c5_114, %c0_115, %c0_116] : memref<8x8x1xf32, #tpu.memory_space<vmem>>, vector<1x8x1xf32>
    %191 = vector.shape_cast %190 : vector<1x8x1xf32> to vector<8x1xf32>
    %192 = arith.mulf %186, %191 : vector<8x1xf32>
    %cst_117 = arith.constant dense<0.000000e+00> : vector<8xf32>
    %193 = vector.multi_reduction <add>, %189, %cst_117 [1] : vector<8x8xf32> to vector<8xf32>
    %194 = vector.shape_cast %193 : vector<8xf32> to vector<8x1xf32>
    %195 = arith.addf %192, %194 : vector<8x1xf32>
    %c5_118 = arith.constant 5 : index
    %c0_119 = arith.constant 0 : index
    %c0_120 = arith.constant 0 : index
    %196 = vector.load %arg13[%c5_118, %c0_119, %c0_120] : memref<8x8x1xf32, #tpu.memory_space<vmem>>, vector<1x8x1xf32>
    %197 = vector.shape_cast %196 : vector<1x8x1xf32> to vector<8x1xf32>
    %198 = vector.shape_cast %195 : vector<8x1xf32> to vector<1x8x1xf32>
    tpu.vector_store %arg13[%c5_118, %c0_119, %c0_120], %198 {strides = array<i32>} : memref<8x8x1xf32, #tpu.memory_space<vmem>>, vector<1x8x1xf32>,
    %c0_121 = arith.constant 0 : index
    %c20_122 = arith.constant 20 : index
    %199 = vector.load %arg10[%c0_121, %c20_122] : memref<8x32xf32, #tpu.memory_space<vmem>>, vector<8x4xf32>
    %200 = vector.broadcast %186 : vector<8x1xf32> to vector<8x4xf32>
    %201 = arith.mulf %200, %199 : vector<8x4xf32>
    %202 = arith.truncf %189 : vector<8x8xf32> to vector<8x8xbf16>
    %203 = vector.extract_strided_slice %11 {offsets = [0, 20], sizes = [8, 4], strides = [1, 1]} : vector<8x32xbf16> to vector<8x4xbf16>
    %cst_123 = arith.constant dense<0.000000e+00> : vector<8x4xf32>
    %204 = tpu.matmul %202, %203, %cst_123 {dimension_numbers = #tpu.dot_dimension_numbers<[1], [0], [0], [1], [0, 0, 1, 1], [], []>} : vector<8x8xbf16>, vector<8x4xbf16>, vector<8x4xf32> -> vector<8x4xf32>
    %205 = arith.addf %201, %204 : vector<8x4xf32>
    %c0_124 = arith.constant 0 : index
    %c20_125 = arith.constant 20 : index
    %206 = vector.load %arg10[%c0_124, %c20_125] : memref<8x32xf32, #tpu.memory_space<vmem>>, vector<8x4xf32>
    tpu.vector_store %arg10[%c0_124, %c20_125], %205 {strides = array<i32>} : memref<8x32xf32, #tpu.memory_space<vmem>>, vector<8x4xf32>,
    %c5_126 = arith.constant 5 : index
    %c0_127 = arith.constant 0 : index
    %c0_128 = arith.constant 0 : index
    %207 = vector.load %arg12[%c5_126, %c0_127, %c0_128] : memref<8x8x1xf32, #tpu.memory_space<vmem>>, vector<1x8x1xf32>
    %208 = vector.shape_cast %207 : vector<1x8x1xf32> to vector<8x1xf32>
    %209 = vector.shape_cast %184 : vector<8x1xf32> to vector<1x8x1xf32>
    tpu.vector_store %arg12[%c5_126, %c0_127, %c0_128], %209 {strides = array<i32>} : memref<8x8x1xf32, #tpu.memory_space<vmem>>, vector<1x8x1xf32>,
    %c0_129 = arith.constant 0 : index
    %c24 = arith.constant 24 : index
    %210 = vector.load %arg9[%c0_129, %c24] : memref<8x32xbf16, #tpu.memory_space<vmem>>, vector<8x4xbf16>
    %211 = vector.extract_strided_slice %8 {offsets = [0, 24], sizes = [8, 4], strides = [1, 1]} : vector<8x32xbf16> to vector<8x4xbf16>
    %cst_130 = arith.constant dense<0.000000e+00> : vector<8x8xf32>
    %212 = tpu.matmul %210, %211, %cst_130 {dimension_numbers = #tpu.dot_dimension_numbers<[1], [1], [0], [0], [0, 0, 1, 0], [], []>} : vector<8x4xbf16>, vector<8x4xbf16>, vector<8x8xf32> -> vector<8x8xf32>
    %c6 = arith.constant 6 : index
    %c0_131 = arith.constant 0 : index
    %c0_132 = arith.constant 0 : index
    %213 = vector.load %arg12[%c6, %c0_131, %c0_132] : memref<8x8x1xf32, #tpu.memory_space<vmem>>, vector<1x8x1xf32>
    %214 = vector.shape_cast %213 : vector<1x8x1xf32> to vector<8x1xf32>
    %cst_133 = arith.constant dense<0xFF800000> : vector<8xf32>
    %215 = vector.multi_reduction <maximumf>, %212, %cst_133 [1] : vector<8x8xf32> to vector<8xf32>
    %216 = vector.shape_cast %215 : vector<8xf32> to vector<8x1xf32>
    %217 = arith.maximumf %214, %216 : vector<8x1xf32>
    %218 = arith.subf %214, %217 : vector<8x1xf32>
    %219 = math.exp %218 : vector<8x1xf32>
    %220 = vector.broadcast %217 : vector<8x1xf32> to vector<8x8xf32>
    %221 = arith.subf %212, %220 : vector<8x8xf32>
    %222 = math.exp %221 : vector<8x8xf32>
    %c6_134 = arith.constant 6 : index
    %c0_135 = arith.constant 0 : index
    %c0_136 = arith.constant 0 : index
    %223 = vector.load %arg13[%c6_134, %c0_135, %c0_136] : memref<8x8x1xf32, #tpu.memory_space<vmem>>, vector<1x8x1xf32>
    %224 = vector.shape_cast %223 : vector<1x8x1xf32> to vector<8x1xf32>
    %225 = arith.mulf %219, %224 : vector<8x1xf32>
    %cst_137 = arith.constant dense<0.000000e+00> : vector<8xf32>
    %226 = vector.multi_reduction <add>, %222, %cst_137 [1] : vector<8x8xf32> to vector<8xf32>
    %227 = vector.shape_cast %226 : vector<8xf32> to vector<8x1xf32>
    %228 = arith.addf %225, %227 : vector<8x1xf32>
    %c6_138 = arith.constant 6 : index
    %c0_139 = arith.constant 0 : index
    %c0_140 = arith.constant 0 : index
    %229 = vector.load %arg13[%c6_138, %c0_139, %c0_140] : memref<8x8x1xf32, #tpu.memory_space<vmem>>, vector<1x8x1xf32>
    %230 = vector.shape_cast %229 : vector<1x8x1xf32> to vector<8x1xf32>
    %231 = vector.shape_cast %228 : vector<8x1xf32> to vector<1x8x1xf32>
    tpu.vector_store %arg13[%c6_138, %c0_139, %c0_140], %231 {strides = array<i32>} : memref<8x8x1xf32, #tpu.memory_space<vmem>>, vector<1x8x1xf32>,
    %c0_141 = arith.constant 0 : index
    %c24_142 = arith.constant 24 : index
    %232 = vector.load %arg10[%c0_141, %c24_142] : memref<8x32xf32, #tpu.memory_space<vmem>>, vector<8x4xf32>
    %233 = vector.broadcast %219 : vector<8x1xf32> to vector<8x4xf32>
    %234 = arith.mulf %233, %232 : vector<8x4xf32>
    %235 = arith.truncf %222 : vector<8x8xf32> to vector<8x8xbf16>
    %236 = vector.extract_strided_slice %11 {offsets = [0, 24], sizes = [8, 4], strides = [1, 1]} : vector<8x32xbf16> to vector<8x4xbf16>
    %cst_143 = arith.constant dense<0.000000e+00> : vector<8x4xf32>
    %237 = tpu.matmul %235, %236, %cst_143 {dimension_numbers = #tpu.dot_dimension_numbers<[1], [0], [0], [1], [0, 0, 1, 1], [], []>} : vector<8x8xbf16>, vector<8x4xbf16>, vector<8x4xf32> -> vector<8x4xf32>
    %238 = arith.addf %234, %237 : vector<8x4xf32>
    %c0_144 = arith.constant 0 : index
    %c24_145 = arith.constant 24 : index
    %239 = vector.load %arg10[%c0_144, %c24_145] : memref<8x32xf32, #tpu.memory_space<vmem>>, vector<8x4xf32>
    tpu.vector_store %arg10[%c0_144, %c24_145], %238 {strides = array<i32>} : memref<8x32xf32, #tpu.memory_space<vmem>>, vector<8x4xf32>,
    %c6_146 = arith.constant 6 : index
    %c0_147 = arith.constant 0 : index
    %c0_148 = arith.constant 0 : index
    %240 = vector.load %arg12[%c6_146, %c0_147, %c0_148] : memref<8x8x1xf32, #tpu.memory_space<vmem>>, vector<1x8x1xf32>
    %241 = vector.shape_cast %240 : vector<1x8x1xf32> to vector<8x1xf32>
    %242 = vector.shape_cast %217 : vector<8x1xf32> to vector<1x8x1xf32>
    tpu.vector_store %arg12[%c6_146, %c0_147, %c0_148], %242 {strides = array<i32>} : memref<8x8x1xf32, #tpu.memory_space<vmem>>, vector<1x8x1xf32>,
    %c0_149 = arith.constant 0 : index
    %c28 = arith.constant 28 : index
    %243 = vector.load %arg9[%c0_149, %c28] : memref<8x32xbf16, #tpu.memory_space<vmem>>, vector<8x4xbf16>
    %244 = vector.extract_strided_slice %8 {offsets = [0, 28], sizes = [8, 4], strides = [1, 1]} : vector<8x32xbf16> to vector<8x4xbf16>
    %cst_150 = arith.constant dense<0.000000e+00> : vector<8x8xf32>
    %245 = tpu.matmul %243, %244, %cst_150 {dimension_numbers = #tpu.dot_dimension_numbers<[1], [1], [0], [0], [0, 0, 1, 0], [], []>} : vector<8x4xbf16>, vector<8x4xbf16>, vector<8x8xf32> -> vector<8x8xf32>
    %c7 = arith.constant 7 : index
    %c0_151 = arith.constant 0 : index
    %c0_152 = arith.constant 0 : index
    %246 = vector.load %arg12[%c7, %c0_151, %c0_152] : memref<8x8x1xf32, #tpu.memory_space<vmem>>, vector<1x8x1xf32>
    %247 = vector.shape_cast %246 : vector<1x8x1xf32> to vector<8x1xf32>
    %cst_153 = arith.constant dense<0xFF800000> : vector<8xf32>
    %248 = vector.multi_reduction <maximumf>, %245, %cst_153 [1] : vector<8x8xf32> to vector<8xf32>
    %249 = vector.shape_cast %248 : vector<8xf32> to vector<8x1xf32>
    %250 = arith.maximumf %247, %249 : vector<8x1xf32>
    %251 = arith.subf %247, %250 : vector<8x1xf32>
    %252 = math.exp %251 : vector<8x1xf32>
    %253 = vector.broadcast %250 : vector<8x1xf32> to vector<8x8xf32>
    %254 = arith.subf %245, %253 : vector<8x8xf32>
    %255 = math.exp %254 : vector<8x8xf32>
    %c7_154 = arith.constant 7 : index
    %c0_155 = arith.constant 0 : index
    %c0_156 = arith.constant 0 : index
    %256 = vector.load %arg13[%c7_154, %c0_155, %c0_156] : memref<8x8x1xf32, #tpu.memory_space<vmem>>, vector<1x8x1xf32>
    %257 = vector.shape_cast %256 : vector<1x8x1xf32> to vector<8x1xf32>
    %258 = arith.mulf %252, %257 : vector<8x1xf32>
    %cst_157 = arith.constant dense<0.000000e+00> : vector<8xf32>
    %259 = vector.multi_reduction <add>, %255, %cst_157 [1] : vector<8x8xf32> to vector<8xf32>
    %260 = vector.shape_cast %259 : vector<8xf32> to vector<8x1xf32>
    %261 = arith.addf %258, %260 : vector<8x1xf32>
    %c7_158 = arith.constant 7 : index
    %c0_159 = arith.constant 0 : index
    %c0_160 = arith.constant 0 : index
    %262 = vector.load %arg13[%c7_158, %c0_159, %c0_160] : memref<8x8x1xf32, #tpu.memory_space<vmem>>, vector<1x8x1xf32>
    %263 = vector.shape_cast %262 : vector<1x8x1xf32> to vector<8x1xf32>
    %264 = vector.shape_cast %261 : vector<8x1xf32> to vector<1x8x1xf32>
    tpu.vector_store %arg13[%c7_158, %c0_159, %c0_160], %264 {strides = array<i32>} : memref<8x8x1xf32, #tpu.memory_space<vmem>>, vector<1x8x1xf32>,
    %c0_161 = arith.constant 0 : index
    %c28_162 = arith.constant 28 : index
    %265 = vector.load %arg10[%c0_161, %c28_162] : memref<8x32xf32, #tpu.memory_space<vmem>>, vector<8x4xf32>
    %266 = vector.broadcast %252 : vector<8x1xf32> to vector<8x4xf32>
    %267 = arith.mulf %266, %265 : vector<8x4xf32>
    %268 = arith.truncf %255 : vector<8x8xf32> to vector<8x8xbf16>
    %269 = vector.extract_strided_slice %11 {offsets = [0, 28], sizes = [8, 4], strides = [1, 1]} : vector<8x32xbf16> to vector<8x4xbf16>
    %cst_163 = arith.constant dense<0.000000e+00> : vector<8x4xf32>
    %270 = tpu.matmul %268, %269, %cst_163 {dimension_numbers = #tpu.dot_dimension_numbers<[1], [0], [0], [1], [0, 0, 1, 1], [], []>} : vector<8x8xbf16>, vector<8x4xbf16>, vector<8x4xf32> -> vector<8x4xf32>
    %271 = arith.addf %267, %270 : vector<8x4xf32>
    %c0_164 = arith.constant 0 : index
    %c28_165 = arith.constant 28 : index
    %272 = vector.load %arg10[%c0_164, %c28_165] : memref<8x32xf32, #tpu.memory_space<vmem>>, vector<8x4xf32>
    tpu.vector_store %arg10[%c0_164, %c28_165], %271 {strides = array<i32>} : memref<8x32xf32, #tpu.memory_space<vmem>>, vector<8x4xf32>,
    %c7_166 = arith.constant 7 : index
    %c0_167 = arith.constant 0 : index
    %c0_168 = arith.constant 0 : index
    %273 = vector.load %arg12[%c7_166, %c0_167, %c0_168] : memref<8x8x1xf32, #tpu.memory_space<vmem>>, vector<1x8x1xf32>
    %274 = vector.shape_cast %273 : vector<1x8x1xf32> to vector<8x1xf32>
    %275 = vector.shape_cast %250 : vector<8x1xf32> to vector<1x8x1xf32>
    tpu.vector_store %arg12[%c7_166, %c0_167, %c0_168], %275 {strides = array<i32>} : memref<8x8x1xf32, #tpu.memory_space<vmem>>, vector<1x8x1xf32>,
    %c0_i32_169 = arith.constant 0 : i32
    %276 = arith.cmpi eq, %arg2, %c0_i32_169 : i32
    %277 = arith.extui %276 : i1 to i32
    %c0_i32_170 = arith.constant 0 : i32
    %278 = arith.cmpi ne, %277, %c0_i32_170 : i32
    scf.if %278 {
      %c0_171 = arith.constant 0 : index
      %c0_172 = arith.constant 0 : index
      %279 = vector.load %arg10[%c0_171, %c0_172] : memref<8x32xf32, #tpu.memory_space<vmem>>, vector<8x4xf32>
      %c0_173 = arith.constant 0 : index
      %c0_174 = arith.constant 0 : index
      %c0_175 = arith.constant 0 : index
      %280 = vector.load %arg13[%c0_173, %c0_174, %c0_175] : memref<8x8x1xf32, #tpu.memory_space<vmem>>, vector<1x8x1xf32>
      %281 = vector.shape_cast %280 : vector<1x8x1xf32> to vector<8x1xf32>
      %282 = vector.broadcast %281 : vector<8x1xf32> to vector<8x4xf32>
      %283 = arith.divf %279, %282 : vector<8x4xf32>
      %c0_176 = arith.constant 0 : index
      %c0_177 = arith.constant 0 : index
      %284 = vector.load %arg11[%c0_176, %c0_177] : memref<8x32xf32, #tpu.memory_space<vmem>>, vector<8x4xf32>
      tpu.vector_store %arg11[%c0_176, %c0_177], %283 {strides = array<i32>} : memref<8x32xf32, #tpu.memory_space<vmem>>, vector<8x4xf32>,
      %c0_178 = arith.constant 0 : index
      %c4_179 = arith.constant 4 : index
      %285 = vector.load %arg10[%c0_178, %c4_179] : memref<8x32xf32, #tpu.memory_space<vmem>>, vector<8x4xf32>
      %c1_180 = arith.constant 1 : index
      %c0_181 = arith.constant 0 : index
      %c0_182 = arith.constant 0 : index
      %286 = vector.load %arg13[%c1_180, %c0_181, %c0_182] : memref<8x8x1xf32, #tpu.memory_space<vmem>>, vector<1x8x1xf32>
      %287 = vector.shape_cast %286 : vector<1x8x1xf32> to vector<8x1xf32>
      %288 = vector.broadcast %287 : vector<8x1xf32> to vector<8x4xf32>
      %289 = arith.divf %285, %288 : vector<8x4xf32>
      %c0_183 = arith.constant 0 : index
      %c4_184 = arith.constant 4 : index
      %290 = vector.load %arg11[%c0_183, %c4_184] : memref<8x32xf32, #tpu.memory_space<vmem>>, vector<8x4xf32>
      tpu.vector_store %arg11[%c0_183, %c4_184], %289 {strides = array<i32>} : memref<8x32xf32, #tpu.memory_space<vmem>>, vector<8x4xf32>,
      %c0_185 = arith.constant 0 : index
      %c8_186 = arith.constant 8 : index
      %291 = vector.load %arg10[%c0_185, %c8_186] : memref<8x32xf32, #tpu.memory_space<vmem>>, vector<8x4xf32>
      %c2_187 = arith.constant 2 : index
      %c0_188 = arith.constant 0 : index
      %c0_189 = arith.constant 0 : index
      %292 = vector.load %arg13[%c2_187, %c0_188, %c0_189] : memref<8x8x1xf32, #tpu.memory_space<vmem>>, vector<1x8x1xf32>
      %293 = vector.shape_cast %292 : vector<1x8x1xf32> to vector<8x1xf32>
      %294 = vector.broadcast %293 : vector<8x1xf32> to vector<8x4xf32>
      %295 = arith.divf %291, %294 : vector<8x4xf32>
      %c0_190 = arith.constant 0 : index
      %c8_191 = arith.constant 8 : index
      %296 = vector.load %arg11[%c0_190, %c8_191] : memref<8x32xf32, #tpu.memory_space<vmem>>, vector<8x4xf32>
      tpu.vector_store %arg11[%c0_190, %c8_191], %295 {strides = array<i32>} : memref<8x32xf32, #tpu.memory_space<vmem>>, vector<8x4xf32>,
      %c0_192 = arith.constant 0 : index
      %c12_193 = arith.constant 12 : index
      %297 = vector.load %arg10[%c0_192, %c12_193] : memref<8x32xf32, #tpu.memory_space<vmem>>, vector<8x4xf32>
      %c3_194 = arith.constant 3 : index
      %c0_195 = arith.constant 0 : index
      %c0_196 = arith.constant 0 : index
      %298 = vector.load %arg13[%c3_194, %c0_195, %c0_196] : memref<8x8x1xf32, #tpu.memory_space<vmem>>, vector<1x8x1xf32>
      %299 = vector.shape_cast %298 : vector<1x8x1xf32> to vector<8x1xf32>
      %300 = vector.broadcast %299 : vector<8x1xf32> to vector<8x4xf32>
      %301 = arith.divf %297, %300 : vector<8x4xf32>
      %c0_197 = arith.constant 0 : index
      %c12_198 = arith.constant 12 : index
      %302 = vector.load %arg11[%c0_197, %c12_198] : memref<8x32xf32, #tpu.memory_space<vmem>>, vector<8x4xf32>
      tpu.vector_store %arg11[%c0_197, %c12_198], %301 {strides = array<i32>} : memref<8x32xf32, #tpu.memory_space<vmem>>, vector<8x4xf32>,
      %c0_199 = arith.constant 0 : index
      %c16_200 = arith.constant 16 : index
      %303 = vector.load %arg10[%c0_199, %c16_200] : memref<8x32xf32, #tpu.memory_space<vmem>>, vector<8x4xf32>
      %c4_201 = arith.constant 4 : index
      %c0_202 = arith.constant 0 : index
      %c0_203 = arith.constant 0 : index
      %304 = vector.load %arg13[%c4_201, %c0_202, %c0_203] : memref<8x8x1xf32, #tpu.memory_space<vmem>>, vector<1x8x1xf32>
      %305 = vector.shape_cast %304 : vector<1x8x1xf32> to vector<8x1xf32>
      %306 = vector.broadcast %305 : vector<8x1xf32> to vector<8x4xf32>
      %307 = arith.divf %303, %306 : vector<8x4xf32>
      %c0_204 = arith.constant 0 : index
      %c16_205 = arith.constant 16 : index
      %308 = vector.load %arg11[%c0_204, %c16_205] : memref<8x32xf32, #tpu.memory_space<vmem>>, vector<8x4xf32>
      tpu.vector_store %arg11[%c0_204, %c16_205], %307 {strides = array<i32>} : memref<8x32xf32, #tpu.memory_space<vmem>>, vector<8x4xf32>,
      %c0_206 = arith.constant 0 : index
      %c20_207 = arith.constant 20 : index
      %309 = vector.load %arg10[%c0_206, %c20_207] : memref<8x32xf32, #tpu.memory_space<vmem>>, vector<8x4xf32>
      %c5_208 = arith.constant 5 : index
      %c0_209 = arith.constant 0 : index
      %c0_210 = arith.constant 0 : index
      %310 = vector.load %arg13[%c5_208, %c0_209, %c0_210] : memref<8x8x1xf32, #tpu.memory_space<vmem>>, vector<1x8x1xf32>
      %311 = vector.shape_cast %310 : vector<1x8x1xf32> to vector<8x1xf32>
      %312 = vector.broadcast %311 : vector<8x1xf32> to vector<8x4xf32>
      %313 = arith.divf %309, %312 : vector<8x4xf32>
      %c0_211 = arith.constant 0 : index
      %c20_212 = arith.constant 20 : index
      %314 = vector.load %arg11[%c0_211, %c20_212] : memref<8x32xf32, #tpu.memory_space<vmem>>, vector<8x4xf32>
      tpu.vector_store %arg11[%c0_211, %c20_212], %313 {strides = array<i32>} : memref<8x32xf32, #tpu.memory_space<vmem>>, vector<8x4xf32>,
      %c0_213 = arith.constant 0 : index
      %c24_214 = arith.constant 24 : index
      %315 = vector.load %arg10[%c0_213, %c24_214] : memref<8x32xf32, #tpu.memory_space<vmem>>, vector<8x4xf32>
      %c6_215 = arith.constant 6 : index
      %c0_216 = arith.constant 0 : index
      %c0_217 = arith.constant 0 : index
      %316 = vector.load %arg13[%c6_215, %c0_216, %c0_217] : memref<8x8x1xf32, #tpu.memory_space<vmem>>, vector<1x8x1xf32>
      %317 = vector.shape_cast %316 : vector<1x8x1xf32> to vector<8x1xf32>
      %318 = vector.broadcast %317 : vector<8x1xf32> to vector<8x4xf32>
      %319 = arith.divf %315, %318 : vector<8x4xf32>
      %c0_218 = arith.constant 0 : index
      %c24_219 = arith.constant 24 : index
      %320 = vector.load %arg11[%c0_218, %c24_219] : memref<8x32xf32, #tpu.memory_space<vmem>>, vector<8x4xf32>
      tpu.vector_store %arg11[%c0_218, %c24_219], %319 {strides = array<i32>} : memref<8x32xf32, #tpu.memory_space<vmem>>, vector<8x4xf32>,
      %c0_220 = arith.constant 0 : index
      %c28_221 = arith.constant 28 : index
      %321 = vector.load %arg10[%c0_220, %c28_221] : memref<8x32xf32, #tpu.memory_space<vmem>>, vector<8x4xf32>
      %c7_222 = arith.constant 7 : index
      %c0_223 = arith.constant 0 : index
      %c0_224 = arith.constant 0 : index
      %322 = vector.load %arg13[%c7_222, %c0_223, %c0_224] : memref<8x8x1xf32, #tpu.memory_space<vmem>>, vector<1x8x1xf32>
      %323 = vector.shape_cast %322 : vector<1x8x1xf32> to vector<8x1xf32>
      %324 = vector.broadcast %323 : vector<8x1xf32> to vector<8x4xf32>
      %325 = arith.divf %321, %324 : vector<8x4xf32>
      %c0_225 = arith.constant 0 : index
      %c28_226 = arith.constant 28 : index
      %326 = vector.load %arg11[%c0_225, %c28_226] : memref<8x32xf32, #tpu.memory_space<vmem>>, vector<8x4xf32>
      tpu.vector_store %arg11[%c0_225, %c28_226], %325 {strides = array<i32>} : memref<8x32xf32, #tpu.memory_space<vmem>>, vector<8x4xf32>,
      %c0_227 = arith.constant 0 : index
      %c0_228 = arith.constant 0 : index
      %327 = vector.load %arg11[%c0_227, %c0_228] : memref<8x32xf32, #tpu.memory_space<vmem>>, vector<8x32xf32>
      %328 = arith.truncf %327 : vector<8x32xf32> to vector<8x32xbf16>
      %c0_229 = arith.constant 0 : index
      %c0_230 = arith.constant 0 : index
      %329 = vector.load %arg6[%c0_229, %c0_230] : memref<32x32xbf16, #tpu.memory_space<vmem>>, vector<32x32xbf16>
      %cst_231 = arith.constant dense<0.000000e+00> : vector<8x32xf32>
      %330 = tpu.matmul %328, %329, %cst_231 {dimension_numbers = #tpu.dot_dimension_numbers<[1], [0], [0], [1], [0, 0, 1, 1], [], []>} : vector<8x32xbf16>, vector<32x32xbf16>, vector<8x32xf32> -> vector<8x32xf32>
      %c0_232 = arith.constant 0 : index
      %c0_233 = arith.constant 0 : index
      %331 = vector.load %arg7[%c0_232, %c0_233] : memref<1x32xf32, #tpu.memory_space<vmem>>, vector<1x32xf32>
      %332 = vector.broadcast %331 : vector<1x32xf32> to vector<8x32xf32>
      %333 = arith.addf %330, %332 : vector<8x32xf32>
      %c0_234 = arith.constant 0 : index
      %c0_235 = arith.constant 0 : index
      %c0_236 = arith.constant 0 : index
      %334 = vector.load %arg8[%c0_234, %c0_235, %c0_236] : memref<1x8x32xf32, #tpu.memory_space<vmem>>, vector<1x8x32xf32>
      %335 = vector.shape_cast %334 : vector<1x8x32xf32> to vector<8x32xf32>
      %336 = vector.shape_cast %333 : vector<8x32xf32> to vector<1x8x32xf32>
      tpu.vector_store %arg8[%c0_234, %c0_235, %c0_236], %336 {strides = array<i32>} : memref<1x8x32xf32, #tpu.memory_space<vmem>>, vector<1x8x32xf32>,
    } else {
    }
    return
  }
  func.func @transform_0(%arg0: i32, %arg1: i32, %arg2: i32) -> (i32, i32, i32) {
    %c0_i32 = arith.constant 0 : i32
    %c0_i32_0 = arith.constant 0 : i32
    return %arg0, %arg1, %c0_i32 : i32, i32, i32
  }
  func.func @transform_1(%arg0: i32, %arg1: i32, %arg2: i32) -> (i32, i32, i32) {
    %c0_i32 = arith.constant 0 : i32
    %c0_i32_0 = arith.constant 0 : i32
    return %arg0, %arg2, %c0_i32 : i32, i32, i32
  }
  func.func @transform_2(%arg0: i32, %arg1: i32, %arg2: i32) -> (i32, i32) {
    %c0_i32 = arith.constant 0 : i32
    %c0_i32_0 = arith.constant 0 : i32
    %c0_i32_1 = arith.constant 0 : i32
    return %c0_i32, %c0_i32_0 : i32, i32
  }
  func.func @transform_3(%arg0: i32, %arg1: i32, %arg2: i32) -> (i32, i32) {
    %c0_i32 = arith.constant 0 : i32
    %c0_i32_0 = arith.constant 0 : i32
    %c0_i32_1 = arith.constant 0 : i32
    return %c0_i32, %c0_i32_0 : i32, i32
  }
  func.func @transform_4(%arg0: i32, %arg1: i32, %arg2: i32) -> (i32, i32) {
    %c0_i32 = arith.constant 0 : i32
    %c0_i32_0 = arith.constant 0 : i32
    %c0_i32_1 = arith.constant 0 : i32
    return %c0_i32, %c0_i32_0 : i32, i32
  }
  func.func @transform_5(%arg0: i32, %arg1: i32, %arg2: i32) -> (i32, i32, i32) {
    %c0_i32 = arith.constant 0 : i32
    %c0_i32_0 = arith.constant 0 : i32
    return %arg0, %arg1, %c0_i32 : i32, i32, i32
  }
}

</mosaic_0001>

<bundles_post_ra>
// kernel: tpu_custom_call.1
= control target key start
LH: loop header
LB: loop body
LE: loop exit
PB: predicated region body
PF: predicated region fallthrough
CT: control target
= control target key end

     0   :  { %s3297_s0 = inlined_call_operand.hbm [shape: f32[2,8,32], index: 0, kind: input, shape index: {}]   ;;  %s3298_s1 = inlined_call_operand.hbm [shape: f32[2,8,32], index: 1, kind: input, shape index: {}]   ;;  %s3299_s2 = inlined_call_operand.hbm [shape: bf16[32,96], index: 2, kind: input, shape index: {}]   ;;  %s3300_s3 = inlined_call_operand.hbm [shape: bf16[32,32], index: 3, kind: input, shape index: {}]   ;;  %s3301_s4 = inlined_call_operand.vmem [shape: f32[1,32], index: 4, kind: input, shape index: {}]   ;;  %s3302_s5 = inlined_call_operand.hbm [shape: f32[2,8,32], index: 5, kind: output, shape index: {}]  }
   0x1   :  { %3309 = sst [smem:[#allocation23_spill]] %s3299_s2 }
   0x2   :  { %3310 = sst [smem:[#allocation24_spill]] %s3300_s3 }
   0x3   :  { %10 = vsyncpa [#allocation8], 0 }
   0x4   :  { %12 = vsyncpa [#allocation8 + $0x1], 0 }
   0x5   :  { %13 = vsyncpa [#allocation11], 0 }
   0x6   :  { %15 = vsyncpa [#allocation11 + $0x1], 0 }
   0x7   :  { %16 = vsyncpa [#allocation14], 0 }
   0x8   :  { %17 = vsyncpa [#allocation9], 0 }
   0x9   :  { %19 = vsyncpa [#allocation9 + $0x1], 0  ;;  %s2631_s18 = smov 0   ;;  %s2633_s19 = smov 0  }
   0xa   :  { %s2635_s20 = smov 0   ;;  %s2637_s21 = smov 0  }
   0xb   :  { %s2639_s22 = smov 0   ;;  %s2641_s23 = smov 0  }
   0xc LB: > { %3311 = sst [smem:[#allocation21_spill]] %s2568_s22  ;;  %s2662_s24 = sadd.s32 4294967295, %s2572_s23   ;;  %s2572_s23 = sphi %s2641_s23, %s25_s23   ;;  %s2568_s22 = sphi %s2639_s22, %s3332_s22   ;;  %s2564_s21 = sphi %s2637_s21, %s3331_s21   ;;  %s2560_s20 = sphi %s2635_s20, %s3335_s20   ;;  %s2556_s19 = sphi %s2633_s19, %s3334_s19   ;;  %s2552_s18 = sphi %s2631_s18, %s3333_s18  }
   0xd   : > { %s1964_s25 = sadd.s32 4294967294, %s2572_s23   ;;  %p66_p0 = scmp.ne.s32.totalorder %s2556_s19, %s2552_s18 }
   0xe   : > { %p3303_p1 = scmp.eq.s32.totalorder %s2662_s24, 0  ;;  %p189_p3 = scmp.eq.s32.totalorder %s1964_s25, 1 }
   0xf   : > { %p1965_p5 = scmp.ge.s32.totalorder %s2572_s23, 1  ;;  %p196_p7 = scmp.lt.s32.totalorder %s2572_s23, 3 }
  0x10   : > { %p2671_p4 = por %p3303_p1, %p66_p0  ;;  %p2676_p6 = por %p189_p3, %p66_p0 }
  0x11   : > { %p2681_p8 = pnand %p1965_p5, %p196_p7  ;;  %s2574_s29 = smov [#allocation12]  }
  0x12   : > { %s3312_s26 = scalar_select %p2671_p4, 1, 0 }
  0x13   : > { %s3313_s27 = scalar_select %p2676_p6, 1, 0 }
  0x14   : > { %s3314_s28 = scalar_select %p2681_p8, 1, 0 }
  0x15   : > { %s208_s30 = sshll.u32 %s2574_s29, 4  ;;  %p2203_p9 = pneg %p2681_p8  ;;  %s2685_s30 = int_to_ptr.vmem [resolvable:$true] %s208_s30 }
  0x16   : > { %s2575_s7 = smov [#allocation13]   ;;  %s3316_s2 = sld [smem:[#allocation23_spill]] }
  0x17   : > { %p2692_p11 = pnand %p2203_p9, %p3303_p1  ;;  %s221_s8 = sshll.u32 %s2575_s7, 4  ;;  %s2696_s8 = int_to_ptr.vmem [resolvable:$true] %s221_s8 }
  0x19   : > { %p2364_p13 = pneg %p2692_p11 }
  0x1c   : > { %s2362_s11 = scalar_lea.hbm %s3316_s2, 256 }
  0x1d   : > { %p2363_p12 = scmp.ne.s32.totalorder %s3316_s2, %s2362_s11  ;;  %p2369_p5 = scmp.lt.u32.totalorder %s2362_s11, %s3316_s2 }
  0x1f   : > { %p2365_p0 = pnand %p2364_p13, %p2363_p12 }
  0x21   : > { %p2366_p3 = pneg %p2365_p0 }
  0x23   : > { %p2371_p7 = pnand %p2369_p5, %p2366_p3 }
  0x25   : > { %2374 = shalt.err (!%p2371_p7)
}
  0x26   : > { %s2375_s16 = scalar_lea.vmem %s2685_s30, 256  ;;  %p2383_p2 = scmp.lt.s32.totalorder %s2685_s30, %s2685_s30 }
  0x27   : > { %p2376_p9 = scmp.ne.s32.totalorder %s2685_s30, %s2375_s16  ;;  %p2384_p12 = scmp.lt.s32.totalorder %s2375_s16, %s2375_s16 }
  0x29   : > { %p2378_p10 = pnand %p2376_p9, %p2364_p13  ;;  %p2385_p0 = por %p2384_p12, %p2383_p2 }
  0x2b   : > { %p2379_p1 = pneg %p2378_p10 }
  0x2d   : > { %p2386_p6 = pnand %p2385_p0, %p2379_p1 }
  0x2f   : > { %2389 = shalt.err (!%p2386_p6)
}
  0x30   : > { %s2576_s17 = smov 64   ;;  %s2577_s25 = smov 4  }
  0x31   : > { %2206 = dma.hbm_to_vmem [thread:$0]  (!%p2692_p11), %s3316_s2, 256, %s2685_s30, [#allocation11], %s2576_s17, %s2576_s17, %s2577_s25  }
  0x32   : > { %s3317_s3 = sld [smem:[#allocation24_spill]] }
  0x38   : > { %s2390_s11 = scalar_lea.hbm %s3317_s3, 256 }
  0x39   : > { %p2391_p2 = scmp.ne.s32.totalorder %s3317_s3, %s2390_s11  ;;  %p2397_p10 = scmp.lt.u32.totalorder %s2390_s11, %s3317_s3 }
  0x3b   : > { %p2393_p1 = pnand %p2391_p2, %p2364_p13 }
  0x3d   : > { %p2394_p6 = pneg %p2393_p1 }
  0x3f   : > { %p2399_p3 = pnand %p2397_p10, %p2394_p6 }
  0x41   : > { %2402 = shalt.err (!%p2399_p3)
}
  0x42   : > { %s2403_s30 = scalar_lea.vmem %s2696_s8, 256  ;;  %p2411_p12 = scmp.lt.s32.totalorder %s2696_s8, %s2696_s8 }
  0x43   : > { %p2404_p5 = scmp.ne.s32.totalorder %s2696_s8, %s2403_s30  ;;  %p2412_p0 = scmp.lt.s32.totalorder %s2403_s30, %s2403_s30 }
  0x45   : > { %p2406_p7 = pnand %p2404_p5, %p2364_p13  ;;  %p2413_p2 = por %p2412_p0, %p2411_p12 }
  0x47   : > { %p2407_p9 = pneg %p2406_p7 }
  0x49   : > { %p2414_p1 = pnand %p2413_p2, %p2407_p9 }
  0x4b   : > { %2417 = shalt.err (!%p2414_p1)
}
  0x4c   : > { %2209 = dma.hbm_to_vmem [thread:$0]  (!%p2692_p11), %s3317_s3, 256, %s2696_s8, [#allocation14], %s2576_s17, %s2576_s17, %s2577_s25  }
  0x4d   : > { %s44_s7 = sadd.s32 1, %s2568_s22  ;;  %s53_s9 = sadd.s32 1, %s2560_s20 }
  0x4e   : > { %p46_p13 = scmp.ge.s32.totalorder %s44_s7, 2  ;;  %p60_p6 = scmp.ne.s32.totalorder %s2560_s20, %s2556_s19 }
  0x4f   : > { %p61_p10 = scmp.eq.s32.totalorder %s2572_s23, 0  ;;  %p2223_p3 = scmp.lt.s32.totalorder %s2572_s23, 2 }
  0x50   : > { %s3337_s7 = smov (%p46_p13, %s44_s7), 0  ;;  %p3319_p7 = scmp.eq.s32.totalorder %s2662_s24, 1 }
  0x51   : > { %3318 = sst [smem:[#allocation22_spill]] %s3337_s7  ;;  %p62_p5 = por %p61_p10, %p60_p6 }
  0x52   : > { %p2760_p9 = por %p3319_p7, %p60_p6  ;;  %s48_s10 = ssub.s32 %s2568_s22, %s3337_s7 }
  0x53   : > { %s238_s11 = sand.u32 1, %s2560_s20   ;;  %p51_p12 = scmp.eq.s32.totalorder %s48_s10, 0 }
  0x54   : > { %s3320_s6 = scalar_select %p2760_p9, 1, 0 }
  0x55   : > { %s2767_s8 = sshll.u32 %s238_s11, 3  ;;  %s1970_s17 = sshll.u32 %s2568_s22, 7 }
  0x56   : > { %s2771_s25 = scalar_select %p51_p12, %s2560_s20, %s53_s9  }
  0x57   : > { %s2776_s14 = scalar_lea.hbm %s3297_s0, %s1970_s17  ;;  %s242_s15 = scalar_lea.vmem [#allocation7], %s2767_s8 }
  0x58   : > { %s250_s30 = sshll.u32 %s242_s15, 4  ;;  %p2781_p11 = pnand %p2223_p3, %p62_p5  ;;  %s2785_s30 = int_to_ptr.vmem [resolvable:$true] %s250_s30 }
  0x59   : > { %s2790_s10 = scalar_lea.hbm %s3298_s1, %s1970_s17  ;;  %s239_s12 = scalar_lea.sflag [#allocation8], %s238_s11 }
  0x5a   : > { %s2418_s13 = scalar_lea.hbm %s2776_s14, 128  ;;  %p2420_p2 = pneg %p2781_p11 }
  0x5b   : > { %p2419_p0 = scmp.ne.s32.totalorder %s2776_s14, %s2418_s13  ;;  %s2423_s3 = scalar_lea.hbm %s3297_s0, 256 }
  0x5c   : > { %p2424_p6 = scmp.lt.u32.totalorder %s2776_s14, %s3297_s0  ;;  %p2425_p10 = scmp.lt.u32.totalorder %s2423_s3, %s2418_s13 }
  0x5d   : > { %p2421_p1 = pnand %p2420_p2, %p2419_p0  ;;  %p2427_p5 = scmp.lt.u32.totalorder %s2418_s13, %s2776_s14 }
  0x5e   : > { %p2426_p3 = por %p2425_p10, %p2424_p6 }
  0x5f   : > { %p2422_p13 = pneg %p2421_p1 }
  0x60   : > { %p2428_p7 = por %p2427_p5, %p2426_p3 }
  0x62   : > { %p2429_p12 = pnand %p2428_p7, %p2422_p13 }
  0x64   : > { %2432 = shalt.err (!%p2429_p12)
}
  0x65   : > { %s2433_s11 = scalar_lea.vmem %s2785_s30, 128  ;;  %s2578_s2 = smov [#allocation7]  }
  0x66   : > { %p2434_p0 = scmp.ne.s32.totalorder %s2785_s30, %s2433_s11  ;;  %s2438_s17 = sshll.u32 %s2578_s2, 4  ;;  %s2439_s17 = int_to_ptr.vmem [resolvable:$false] %s2438_s17 }
  0x67   : > { %s2440_s22 = scalar_lea.vmem %s2439_s17, 256  ;;  %p2441_p4 = scmp.lt.s32.totalorder %s2785_s30, %s2439_s17 }
  0x68   : > { %p2436_p1 = pnand %p2434_p0, %p2420_p2  ;;  %p2442_p6 = scmp.lt.s32.totalorder %s2440_s22, %s2433_s11 }
  0x6a   : > { %p2437_p9 = pneg %p2436_p1  ;;  %p2443_p10 = por %p2442_p6, %p2441_p4 }
  0x6c   : > { %p2444_p3 = pnand %p2443_p10, %p2437_p9 }
  0x6e   : > { %2447 = shalt.err (!%p2444_p3)
}
  0x6f   : > { %2213 = dma.hbm_to_vmem [thread:$0]  (!%p2781_p11), %s2776_s14, 128, %s2785_s30, %s239_s12  }
  0x70   : > { %s257_s3 = sand.u32 1, %s2572_s23   ;;  %s261_s7 = scalar_lea.vmem [#allocation10], %s2767_s8 }
  0x71   : > { %s269_s29 = sshll.u32 %s261_s7, 4  ;;  %s258_s9 = scalar_lea.sflag [#allocation11], %s257_s3  ;;  %s270_s29 = int_to_ptr.vmem [resolvable:$true] %s269_s29 }
  0x72   : > { %s2448_s13 = scalar_lea.hbm %s2790_s10, 128  ;;  %s2453_s2 = scalar_lea.hbm %s3298_s1, 256 }
  0x73   : > { %p2449_p4 = scmp.ne.s32.totalorder %s2790_s10, %s2448_s13  ;;  %p2454_p5 = scmp.lt.u32.totalorder %s2790_s10, %s3298_s1 }
  0x74   : > { %p2455_p7 = scmp.lt.u32.totalorder %s2453_s2, %s2448_s13  ;;  %p2457_p0 = scmp.lt.u32.totalorder %s2448_s13, %s2790_s10 }
  0x75   : > { %p2451_p9 = pnand %p2449_p4, %p2420_p2 }
  0x76   : > { %p2456_p12 = por %p2455_p7, %p2454_p5 }
  0x77   : > { %p2452_p13 = pneg %p2451_p9 }
  0x78   : > { %p2458_p1 = por %p2457_p0, %p2456_p12 }
  0x7a   : > { %p2459_p6 = pnand %p2458_p1, %p2452_p13 }
  0x7c   : > { %2462 = shalt.err (!%p2459_p6)
}
  0x7d   : > { %s2463_s8 = scalar_lea.vmem %s270_s29, 128  ;;  %s2579_s14 = smov [#allocation10]  }
  0x7e   : > { %p2464_p10 = scmp.ne.s32.totalorder %s270_s29, %s2463_s8  ;;  %s2468_s30 = sshll.u32 %s2579_s14, 4  ;;  %s2469_s30 = int_to_ptr.vmem [resolvable:$false] %s2468_s30 }
  0x7f   : > { %s2470_s12 = scalar_lea.vmem %s2469_s30, 256  ;;  %p2471_p9 = scmp.lt.s32.totalorder %s270_s29, %s2469_s30 }
  0x80   : > { %p2466_p3 = pnand %p2464_p10, %p2420_p2  ;;  %p2472_p8 = scmp.lt.s32.totalorder %s2470_s12, %s2463_s8 }
  0x82   : > { %p2467_p4 = pneg %p2466_p3  ;;  %p2473_p5 = por %p2472_p8, %p2471_p9 }
  0x84   : > { %p2474_p7 = pnand %p2473_p5, %p2467_p4 }
  0x86   : > { %2477 = shalt.err (!%p2474_p7)
}
  0x87   : > { %2216 = dma.hbm_to_vmem [thread:$0]  (!%p2781_p11), %s2790_s10, 128, %s270_s29, %s258_s9  }
  0x88   : > { %p3322_p13 = scmp.ne.s32.totalorder %s3314_s28, 0 }
  0x89   : > { %s2841_s3 = sand.u32 (!%p3322_p13), 1, %s2556_s19   ;;  %p3323_p8 = scmp.ne.s32.totalorder (!%p3322_p13), %s3312_s26, 0 }
  0x8a   : > { %278 = sbr.rel (%p3322_p13) target bundleno = 1903 (0x76f), region = 40  ;;  %s2844_s7 = sshll.u32 (!%p3322_p13), %s2841_s3, 3 }
  0x8b   : > { %s281_s13 = scalar_lea.sflag (!%p3322_p13), [#allocation8], %s2841_s3  ;;  %s284_s15 = scalar_lea.vmem (!%p3322_p13), [#allocation7], %s2844_s7 }
  0x91   : > { %2531 = dma.done.wait (%p3323_p8), %s281_s13, 128  }
  0x92   : > { %2533 = vsyncadd (%p3323_p8), %s281_s13, 4294967168  ;;  %s289_s28 = sand.u32 1, %s2662_s24   ;;  %s293_s10 = scalar_lea.vmem [#allocation10], %s2844_s7 }
  0x93   : > { %s290_s16 = scalar_lea.sflag [#allocation11], %s289_s28 }
  0x94   : > { %2535 = dma.done.wait (%p3323_p8), %s290_s16, 128  }
  0x95   : > { %2537 = vsyncadd (%p3323_p8), %s290_s16, 4294967168  ;;  %p3324_p11 = scmp.eq.s32.totalorder %s2662_s24, 0 }
  0x97   : > { %2539 = dma.done.wait (%p3324_p11), [#allocation11], 256   ;;  %p3325_p2 = pmov %p3324_p11 }
  0x99   : > { %2541 = vsyncadd (%p3325_p2), [#allocation11], 4294967040  ;;  %p3326_p12 = pmov %p3325_p2 }
  0x9a   : > { %p3327_p0 = pmov %p3325_p2 }
  0x9b   : > { %2543 = dma.done.wait (%p3326_p12), [#allocation14], 256  }
  0x9c   : > { %2545 = vsyncadd (%p3327_p0), [#allocation14], 4294967040  ;;  %vm356_vm0 = vcmask 261120   ;;  %v2580_v0 = vmov 0.0   ;;  %vm2581_vm1 = vmmov 0   ;;  %v2874_v1 = vld [vmem:[#allocation12] sm:$0xff]  }
  0x9d   : > { %2061 = vmatprep.subr.bf16.mxu0 %v2580_v0  ;;  %2065 = vmatprep.mubr.msk.bf16.mxu0 %vm2581_vm1, %v2580_v0  ;;  %421 = vst.msk [vmem:[#allocation3] sm:$0xff] %vm356_vm0, %v2580_v0  ;;  %v2876_v2 = vld [vmem:[#allocation12 + $0x8] sm:$0xff]   ;;  %s2582_s24 = smov 96   ;;  %v2303_v3 = vld [vmem:[#allocation12] sm:$0xff]   ;;  %v422_v8 = vld [vmem:[%s293_s10] sm:$0xff]  ;;  %vm402_vm2 = vcmask 257024  }
  0x9e   : > { %2069 = vmatprep.subr.bf16.mxu1 %v2580_v0  ;;  %2073 = vmatprep.mubr.msk.bf16.mxu1 %vm2581_vm1, %v2580_v0  ;;  %v2304_v4 = vld [vmem:[#allocation12 + $0x8] sm:$0xff]   ;;  %v2888_v10 = vpack.c.bf16 %v422_v8, %v422_v8  ;;  %vm537_vm3 = vcmask 31744   ;;  %s2583_s26 = smov 120   ;;  %s2584_s29 = smov 124   ;;  %vm585_vm4 = vcmask 64512   ;;  %vm404_vm5 = vcmask 7168  }
  0x9f   : > { %438 = vrot.lane.b32.xlu0 %v2874_v1, %s2582_s24  ;;  %2062 = vmatpush3.bf16.msra.mxu0 %v2303_v3  ;;  %v338_v5 = vld [vmem:[%s284_s15] sm:$0xff]  ;;  %s2585_s9 = smov 116   ;;  %s2586_s11 = smov 112   ;;  %v2591_v59 = vmov -inf   ;;  %413 = vst.msk [vmem:[#allocation6] sm:$0xff] %vm404_vm5, %v2580_v0  ;;  %414 = vst.msk [vmem:[#allocation6 + $0x8] sm:$0xff] %vm404_vm5, %v2580_v0 }
  0xa0   : > { %2063 = vmatprep.subr.bf16.mxu0 %v2580_v0  ;;  %v339_v6 = vpack.c.bf16 %v338_v5, %v338_v5  ;;  %s2587_s2 = smov 108   ;;  %s2588_s17 = smov 104   ;;  %405 = vst.msk [vmem:[#allocation5] sm:$0xff] %vm404_vm5, %v2591_v59  ;;  %406 = vst.msk [vmem:[#allocation5 + $0x8] sm:$0xff] %vm404_vm5, %v2591_v59  ;;  %v2592_v60 = vmov 0   ;;  %vm620_vm6 = vcmask 1043456  }
  0xa1   : > { %s2589_s22 = smov 100   ;;  %s2590_s8 = smov 64   ;;  %407 = vst.msk [vmem:[#allocation5 + $0x10] sm:$0xff] %vm404_vm5, %v2591_v59  ;;  %408 = vst.msk [vmem:[#allocation5 + $0x18] sm:$0xff] %vm404_vm5, %v2591_v59  ;;  %2299 = vset.pattern.permute.xlu0 %v2592_v60  ;;  %2300 = vset.pattern.permute.xlu1 %v2592_v60  ;;  %vm809_vm7 = vcmask 64544   ;;  %vm952_vm8 = vcmask 97344  }
  0xa2   : > { %409 = vst.msk [vmem:[#allocation5 + $0x20] sm:$0xff] %vm404_vm5, %v2591_v59  ;;  %410 = vst.msk [vmem:[#allocation5 + $0x28] sm:$0xff] %vm404_vm5, %v2591_v59  ;;  %s2593_s14 = smov 4   ;;  %s2594_s30 = smov 8   ;;  %vm1095_vm9 = vcmask 130144   ;;  %vm1238_vm10 = vcmask 162944  }
  0xa3   : > { %440 = vrot.lane.b32.xlu0 %v2876_v2, %s2582_s24  ;;  %2064 = vmatpush3.bf16.msra.mxu0 %v2304_v4  ;;  %411 = vst.msk [vmem:[#allocation5 + $0x30] sm:$0xff] %vm404_vm5, %v2591_v59  ;;  %412 = vst.msk [vmem:[#allocation5 + $0x38] sm:$0xff] %vm404_vm5, %v2591_v59  ;;  %s2595_s12 = smov 20   ;;  %s2596_s13 = smov 12   ;;  %vm1381_vm11 = vcmask 195744   ;;  %vm1524_vm12 = vcmask 228544  }
  0xa4   : > { %2077 = vmatprep.subr.bf16.mxu0 %v2580_v0  ;;  %415 = vst.msk [vmem:[#allocation6 + $0x10] sm:$0xff] %vm404_vm5, %v2580_v0  ;;  %416 = vst.msk [vmem:[#allocation6 + $0x18] sm:$0xff] %vm404_vm5, %v2580_v0  ;;  %s2597_s15 = smov 16   ;;  %s2598_s28 = smov 24   ;;  %vm1667_vm13 = vcmask 261344  }
  0xa5   : > { %417 = vst.msk [vmem:[#allocation6 + $0x20] sm:$0xff] %vm404_vm5, %v2580_v0  ;;  %418 = vst.msk [vmem:[#allocation6 + $0x28] sm:$0xff] %vm404_vm5, %v2580_v0  ;;  %s2599_s16 = smov 28   ;;  %p3328_p6 = scmp.ne.s32.totalorder %s3320_s6, 0 }
  0xa6   : > { %2066 = vmatmul.mubr.msk.bf16.vlgmr.msra.gmra.mrb[0].mxu0 %vm356_vm0, %v339_v6  ;;  %419 = vst.msk [vmem:[#allocation6 + $0x30] sm:$0xff] %vm404_vm5, %v2580_v0  ;;  %420 = vst.msk [vmem:[#allocation6 + $0x38] sm:$0xff] %vm404_vm5, %v2580_v0 }
  0xa7   : > { %2081 = vmatprep.mubr.msk.bf16.mxu0 %vm2581_vm1, %v2580_v0 }
  0xa9   : > { %v3063_v59 = vld [vmem:[#allocation5 + $0x28] sm:$0xff] }
 0x111   : > { %v439_v7 = vpop.permute.xlu0 %438 }
 0x112   : > { %2070 = vmatpush3.bf16.msra.mxu1 %v439_v7 }
 0x113   : > { %2071 = vmatprep.subr.bf16.mxu1 %v2580_v0 }
 0x115   : > { %v441_v9 = vpop.permute.xlu0 %440 }
 0x116   : > { %2072 = vmatpush3.bf16.msra.mxu1 %v441_v9 }
 0x117   : > { %2085 = vmatprep.subr.bf16.mxu1 %v2580_v0 }
 0x119   : > { %2074 = vmatmul.mubr.msk.bf16.vlgmr.msra.gmra.mrb[0].mxu1 %vm356_vm0, %v2888_v10 }
 0x11a   : > { %2087 = vmatprep.mubr.msk.bf16.mxu1 %vm2581_vm1, %v2580_v0 }
 0x179   : > { %v394_v11 = vpop.f32.mrb[0].mxu0 }
 0x17a   : > { %v400_v12 = vmul.f32 0.5, %v394_v11  ;;  %v2067_v13 = vpop.f32.mrb[1].mxu0 }
 0x17b   : > { %v397_v14 = vpop.f32.mrb[2].mxu0 }
 0x17c   : > { %v401_v15 = vpack.c.bf16 %v400_v12, %v400_v12  ;;  %v2068_v16 = vpop.f32.mrb[3].mxu0 }
 0x17e   : > { %403 = vst.msk [vmem:[#allocation2] sm:$0xf] %vm402_vm2, %v401_v15 }
 0x185   : > { %v2305_v23 = vld [vmem:[#allocation2] ss:$0 sps:$4 sm:$0xff]  }
 0x186   : > { %v2306_v24 = vld [vmem:[#allocation2] ss:$0 sps:$4 sm:$0xff]  }
 0x187   : > { %v536_v25 = vld [vmem:[#allocation2] sm:$0xf] }
 0x188   : > { %v2307_v26 = vld [vmem:[#allocation2] ss:$0 sps:$4 sm:$0xff]  }
 0x189   : > { %v2308_v27 = vld [vmem:[#allocation2] ss:$0 sps:$4 sm:$0xff]  }
 0x18a   : > { %v2309_v28 = vld [vmem:[#allocation2] ss:$0 sps:$4 sm:$0xff]  }
 0x18b   : > { %v2310_v29 = vld [vmem:[#allocation2] ss:$0 sps:$4 sm:$0xff]  }
 0x18c   : > { %v2311_v30 = vld [vmem:[#allocation2] ss:$0 sps:$4 sm:$0xff]  }
 0x1ec   : > { %v482_v17 = vpop.f32.mrb[0].mxu1 }
 0x1ed   : > { %v488_v18 = vpack.c.bf16 %v482_v17, %v482_v17  ;;  %v2075_v19 = vpop.f32.mrb[1].mxu1 }
 0x1ee   : > { %v485_v20 = vpop.f32.mrb[2].mxu1 }
 0x1ef   : > { %818 = vrot.lane.b32.xlu0 %v488_v18, %s2583_s26  ;;  %674 = vrot.lane.b32.xlu1 %v488_v18, %s2584_s29  ;;  %v2076_v21 = vpop.f32.mrb[3].mxu1  ;;  %v542_v22 = vsel %vm537_vm3, %v488_v18, 0 }
 0x1f0   : > { %2086 = vmatpush3.bf16.xpose.msra.mxu1 %v542_v22 }
 0x1f1   : > { %2097 = vmatprep.subr.bf16.mxu1 %v2580_v0 }
 0x1f3   : > { %961 = vrot.lane.b32.xlu0 %v488_v18, %s2585_s9  ;;  %671 = vrot.lane.b32.xlu1 %v2305_v23, %s2584_s29 }
 0x1f7   : > { %1104 = vrot.lane.b32.xlu0 %v488_v18, %s2586_s11  ;;  %816 = vrot.lane.b32.xlu1 %v2306_v24, %s2583_s26 }
 0x1f8   : > { %2088 = vmatmul.mubr.msk.bf16.vlgmr.msra.gmra.mrb[4].mxu1 %vm537_vm3, %v536_v25 }
 0x1f9   : > { %2099 = vmatprep.mubr.msk.bf16.mxu1 %vm2581_vm1, %v2580_v0 }
 0x1fb   : > { %1247 = vrot.lane.b32.xlu0 %v488_v18, %s2587_s2  ;;  %959 = vrot.lane.b32.xlu1 %v2307_v26, %s2585_s9 }
 0x1ff   : > { %1390 = vrot.lane.b32.xlu0 %v488_v18, %s2588_s17  ;;  %1102 = vrot.lane.b32.xlu1 %v2308_v27, %s2586_s11 }
 0x203   : > { %1533 = vrot.lane.b32.xlu0 %v488_v18, %s2589_s22  ;;  %1245 = vrot.lane.b32.xlu1 %v2309_v28, %s2587_s2  ;;  %v3001_v18 = vld [vmem:[#allocation5] sm:$0xff] }
 0x207   : > { %1388 = vrot.lane.b32.xlu1 %v2310_v29, %s2588_s17  ;;  %489 = vrot.lane.b32.xlu0 %v2874_v1, %s2590_s8 }
 0x20b   : > { %1531 = vrot.lane.b32.xlu1 %v2311_v30, %s2589_s22 }
 0x20f   : > { %491 = vrot.lane.b32.xlu1 %v2876_v2, %s2590_s8 }
 0x261   : > { %v819_v31 = vpop.permute.xlu0 %818  ;;  %v675_v32 = vpop.permute.xlu1 %674 }
 0x262   : > { %v680_v33 = vsel %vm537_vm3, %v675_v32, 0  ;;  %v824_v38 = vsel %vm537_vm3, %v819_v31, 0 }
 0x263   : > { %2098 = vmatpush3.bf16.xpose.msra.mxu1 %v680_v33 }
 0x264   : > { %2109 = vmatprep.subr.bf16.mxu1 %v2580_v0 }
 0x265   : > { %v962_v34 = vpop.permute.xlu0 %961  ;;  %v672_v35 = vpop.permute.xlu1 %671 }
 0x266   : > { %v967_v43 = vsel %vm537_vm3, %v962_v34, 0 }
 0x269   : > { %v1105_v36 = vpop.permute.xlu0 %1104  ;;  %v817_v37 = vpop.permute.xlu1 %816 }
 0x26a   : > { %2100 = vmatmul.mubr.msk.bf16.vlgmr.msra.gmra.mrb[8].mxu1 %vm537_vm3, %v672_v35  ;;  %v1110_v48 = vsel %vm537_vm3, %v1105_v36, 0 }
 0x26b   : > { %2110 = vmatpush3.bf16.xpose.msra.mxu1 %v824_v38  ;;  %2111 = vmatprep.mubr.msk.bf16.mxu1 %vm2581_vm1, %v2580_v0 }
 0x26c   : > { %2121 = vmatprep.subr.bf16.mxu1 %v2580_v0 }
 0x26d   : > { %v1248_v39 = vpop.permute.xlu0 %1247  ;;  %v960_v40 = vpop.permute.xlu1 %959 }
 0x26e   : > { %v1253_v51 = vsel %vm537_vm3, %v1248_v39, 0 }
 0x271   : > { %v1391_v41 = vpop.permute.xlu0 %1390  ;;  %v1103_v42 = vpop.permute.xlu1 %1102 }
 0x272   : > { %2112 = vmatmul.mubr.msk.bf16.vlgmr.msra.gmra.mrb[12].mxu1 %vm537_vm3, %v817_v37  ;;  %v1396_v52 = vsel %vm537_vm3, %v1391_v41, 0 }
 0x273   : > { %2122 = vmatpush3.bf16.xpose.msra.mxu1 %v967_v43  ;;  %2123 = vmatprep.mubr.msk.bf16.mxu1 %vm2581_vm1, %v2580_v0  ;;  %v3028_v43 = vld [vmem:[#allocation5 + $0x8] sm:$0xff] }
 0x274   : > { %2133 = vmatprep.subr.bf16.mxu1 %v2580_v0 }
 0x275   : > { %v1534_v44 = vpop.permute.xlu0 %1533  ;;  %v1246_v45 = vpop.permute.xlu1 %1245 }
 0x276   : > { %v1539_v53 = vsel %vm537_vm3, %v1534_v44, 0 }
 0x279   : > { %v1389_v46 = vpop.permute.xlu1 %1388  ;;  %v490_v47 = vpop.permute.xlu0 %489 }
 0x27a   : > { %2124 = vmatmul.mubr.msk.bf16.vlgmr.msra.gmra.mrb[16].mxu1 %vm537_vm3, %v960_v40  ;;  %2078 = vmatpush3.bf16.msra.mxu0 %v490_v47  ;;  %v867_v47 = vld [vmem:[#allocation5 + $0x10] sm:$0xff] }
 0x27b   : > { %2134 = vmatpush3.bf16.xpose.msra.mxu1 %v1110_v48  ;;  %2135 = vmatprep.mubr.msk.bf16.mxu1 %vm2581_vm1, %v2580_v0 }
 0x27c   : > { %2145 = vmatprep.subr.bf16.mxu1 %v2580_v0  ;;  %2079 = vmatprep.subr.bf16.mxu0 %v2580_v0 }
 0x27d   : > { %v1532_v49 = vpop.permute.xlu1 %1531 }
 0x281   : > { %v492_v50 = vpop.permute.xlu1 %491 }
 0x282   : > { %2136 = vmatmul.mubr.msk.bf16.vlgmr.msra.gmra.mrb[20].mxu1 %vm537_vm3, %v1103_v42  ;;  %2080 = vmatpush3.bf16.msra.mxu0 %v492_v50  ;;  %v3039_v50 = vld [vmem:[#allocation5 + $0x18] sm:$0xff] }
 0x283   : > { %2146 = vmatpush3.bf16.xpose.msra.mxu1 %v1253_v51  ;;  %2147 = vmatprep.mubr.msk.bf16.mxu1 %vm2581_vm1, %v2580_v0 }
 0x284   : > { %2157 = vmatprep.subr.bf16.mxu1 %v2580_v0  ;;  %2091 = vmatprep.subr.bf16.mxu0 %v2580_v0 }
 0x285   : > { %2082 = vmatmul.mubr.msk.bf16.vlgmr.msra.gmra.mrb[4].mxu0 %vm356_vm0, %v2888_v10 }
 0x286   : > { %2093 = vmatprep.mubr.msk.bf16.mxu0 %vm2581_vm1, %v2580_v0 }
 0x28a   : > { %2148 = vmatmul.mubr.msk.bf16.vlgmr.msra.gmra.mrb[24].mxu1 %vm537_vm3, %v1246_v45 }
 0x28b   : > { %2158 = vmatpush3.bf16.xpose.msra.mxu1 %v1396_v52  ;;  %2159 = vmatprep.mubr.msk.bf16.mxu1 %vm2581_vm1, %v2580_v0 }
 0x28c   : > { %2169 = vmatprep.subr.bf16.mxu1 %v2580_v0 }
 0x292   : > { %2160 = vmatmul.mubr.msk.bf16.vlgmr.msra.gmra.mrb[28].mxu1 %vm537_vm3, %v1389_v46 }
 0x293   : > { %2170 = vmatpush3.bf16.xpose.msra.mxu1 %v1539_v53  ;;  %2171 = vmatprep.mubr.msk.bf16.mxu1 %vm2581_vm1, %v2580_v0 }
 0x294   : > { %2181 = vmatprep.subr.bf16.mxu1 %v2580_v0 }
 0x29a   : > { %2172 = vmatmul.mubr.msk.bf16.vlgmr.msra.gmra.mrb[32].mxu1 %vm537_vm3, %v1532_v49 }
 0x29b   : > { %2185 = vmatprep.mubr.msk.bf16.mxu1 %vm2581_vm1, %v2580_v0 }
 0x2cb   : > { %v2957_v54 = vpop.f32.mrb[4].mxu1 }
 0x2cc   : > { %v2089_v55 = vpop.f32.mrb[5].mxu1  ;;  %v586_v56 = vsel %vm585_vm4, %v2957_v54, -inf }
 0x2cd   : > { %587 = vmax.xlane.f32.xlu0 %v586_v56  ;;  %v581_v57 = vpop.f32.mrb[6].mxu1  ;;  %v3051_v55 = vld [vmem:[#allocation5 + $0x20] sm:$0xff] }
 0x2ce   : > { %v2090_v58 = vpop.f32.mrb[7].mxu1 }
 0x33d   : > { %v2985_v61 = vpop.f32.mrb[8].mxu1 }
 0x33e   : > { %v2101_v62 = vpop.f32.mrb[9].mxu1  ;;  %v724_v63 = vsel %vm585_vm4, %v2985_v61, -inf }
 0x33f   : > { %725 = vmax.xlane.f32.xlu1 %v724_v63  ;;  %v719_v1 = vpop.f32.mrb[10].mxu1 }
 0x340   : > { %v2102_v2 = vpop.f32.mrb[11].mxu1  ;;  %v3077_v1 = vld [vmem:[#allocation5 + $0x30] sm:$0xff] }
 0x345   : > { %v2989_v3 = vpop.f32.mrb[12].mxu1 }
 0x346   : > { %v2113_v4 = vpop.f32.mrb[13].mxu1  ;;  %v868_v5 = vsel %vm585_vm4, %v2989_v3, -inf }
 0x347   : > { %869 = vmax.xlane.f32.xlu0 %v868_v5  ;;  %v863_v6 = vpop.f32.mrb[14].mxu1 }
 0x348   : > { %v2114_v7 = vpop.f32.mrb[15].mxu1 }
 0x34d   : > { %v2993_v8 = vpop.f32.mrb[16].mxu1 }
 0x34e   : > { %v2125_v9 = vpop.f32.mrb[17].mxu1  ;;  %v1011_v10 = vsel %vm585_vm4, %v2993_v8, -inf }
 0x34f   : > { %1012 = vmax.xlane.f32.xlu0 %v1011_v10  ;;  %v1006_v11 = vpop.f32.mrb[18].mxu1 }
 0x350   : > { %v2126_v12 = vpop.f32.mrb[19].mxu1  ;;  %v3095_v11 = vld [vmem:[#allocation5 + $0x38] sm:$0xff] }
 0x355   : > { %v2997_v13 = vpop.f32.mrb[20].mxu1 }
 0x356   : > { %v2137_v14 = vpop.f32.mrb[21].mxu1  ;;  %v1154_v15 = vsel %vm585_vm4, %v2997_v13, -inf }
 0x357   : > { %1155 = vmax.xlane.f32.xlu1 %v1154_v15  ;;  %v1149_v16 = vpop.f32.mrb[22].mxu1 }
 0x358   : > { %v2138_v17 = vpop.f32.mrb[23].mxu1  ;;  %v529_v19 = vpop.f32.mrb[4].mxu0 }
 0x359   : > { %v2083_v20 = vpop.f32.mrb[5].mxu0  ;;  %v3003_v22 = vpack.c.bf16 %v529_v19, %v529_v19 }
 0x35a   : > { %v588_v21 = vpop.xlane.xlu0 %587  ;;  %v532_v23 = vpop.f32.mrb[6].mxu0 }
 0x35b   : > { %v3006_v24 = vmax.f32 %v3001_v18, %v588_v21  ;;  %v2084_v25 = vpop.f32.mrb[7].mxu0  ;;  %v622_v28 = vsel %vm620_vm6, %v3003_v22, 0 }
 0x35c   : > { %2092 = vmatpush3.bf16.msra.mxu0 %v622_v28 }
 0x35d   : > { %v590_v26 = vsub.f32 %v3001_v18, %v3006_v24  ;;  %666 = vst.msk [vmem:[#allocation5] sm:$0xff] %vm404_vm5, %v3006_v24  ;;  %v3012_v27 = vpop.f32.mrb[24].mxu1  ;;  %2103 = vmatprep.subr.bf16.mxu0 %v2580_v0 }
 0x35e   : > { %v2149_v29 = vpop.f32.mrb[25].mxu1  ;;  %v1297_v30 = vsel %vm585_vm4, %v3012_v27, -inf }
 0x35f   : > { %1298 = vmax.xlane.f32.xlu0 %v1297_v30  ;;  %v1292_v31 = vpop.f32.mrb[26].mxu1  ;;  %v591_v10 = vmul.f32 1.442695, %v590_v26 }
 0x360   : > { %v2150_v32 = vpop.f32.mrb[27].mxu1 }
 0x365   : > { %v3019_v33 = vpop.f32.mrb[28].mxu1 }
 0x366   : > { %v2161_v34 = vpop.f32.mrb[29].mxu1  ;;  %v1440_v35 = vsel %vm585_vm4, %v3019_v33, -inf }
 0x367   : > { %1441 = vmax.xlane.f32.xlu1 %v1440_v35  ;;  %v1435_v36 = vpop.f32.mrb[30].mxu1 }
 0x368   : > { %v2162_v37 = vpop.f32.mrb[31].mxu1 }
 0x36d   : > { %v3023_v38 = vpop.f32.mrb[32].mxu1 }
 0x36e   : > { %v2173_v39 = vpop.f32.mrb[33].mxu1  ;;  %v1583_v40 = vsel %vm585_vm4, %v3023_v38, -inf }
 0x36f   : > { %1584 = vmax.xlane.f32.xlu1 %v1583_v40  ;;  %v1578_v41 = vpop.f32.mrb[34].mxu1 }
 0x370   : > { %v2174_v42 = vpop.f32.mrb[35].mxu1 }
 0x375   : > { %595 = vperm.xlu0 %2299, %v3006_v24  }
 0x3cc   : > { %v726_v44 = vpop.xlane.xlu1 %725 }
 0x3cd   : > { %v3031_v45 = vmax.f32 %v3028_v43, %v726_v44 }
 0x3cf   : > { %v728_v46 = vsub.f32 %v3028_v43, %v3031_v45  ;;  %811 = vst.msk [vmem:[#allocation5 + $0x8] sm:$0xff] %vm404_vm5, %v3031_v45  ;;  %733 = vperm.xlu1 %2300, %v3031_v45  }
 0x3d4   : > { %v870_v48 = vpop.xlane.xlu0 %869 }
 0x3d5   : > { %v871_v49 = vmax.f32 %v867_v47, %v870_v48 }
 0x3d7   : > { %954 = vst.msk [vmem:[#allocation5 + $0x10] sm:$0xff] %vm404_vm5, %v871_v49  ;;  %877 = vperm.xlu1 %2300, %v871_v49  }
 0x3db   : > { %756 = vrot.lane.b32.xlu1 %v3003_v22, %s2584_s29  ;;  %s332_s29 = scalar_lea.vmem [#allocation15], %s2844_s7 }
 0x3dc   : > { %v1013_v51 = vpop.xlane.xlu0 %1012 }
 0x3dd   : > { %v3044_v52 = vmax.f32 %v3039_v50, %v1013_v51 }
 0x3df   : > { %v1015_v53 = vsub.f32 %v3039_v50, %v3044_v52  ;;  %1097 = vst.msk [vmem:[#allocation5 + $0x18] sm:$0xff] %vm404_vm5, %v3044_v52  ;;  %1020 = vperm.xlu1 %2300, %v3044_v52  }
 0x3e1   : > { %v1016_v45 = vmul.f32 1.442695, %v1015_v53 }
 0x3e3   : > { %899 = vrot.lane.b32.xlu1 %v3003_v22, %s2583_s26  ;;  %s2014_s26 = sshll.u32 %s2564_s21, 7  ;;  %s1823_s21 = scalar_lea.sflag [#allocation9], %s2841_s3 }
 0x3e4   : > { %v1156_v56 = vpop.xlane.xlu1 %1155 }
 0x3e5   : > { %v3056_v57 = vmax.f32 %v3051_v55, %v1156_v56 }
 0x3e7   : > { %v1158_v58 = vsub.f32 %v3051_v55, %v3056_v57  ;;  %1240 = vst.msk [vmem:[#allocation5 + $0x20] sm:$0xff] %vm404_vm5, %v3056_v57  ;;  %1163 = vperm.xlu1 %2300, %v3056_v57   ;;  %v1170_v57 = vld [vmem:[#allocation6 + $0x20] sm:$0xff] }
 0x3eb   : > { %1042 = vrot.lane.b32.xlu1 %v3003_v22, %s2585_s9  ;;  %s1837_s9 = sshll.u32 %s332_s29, 4  ;;  %s3249_s9 = int_to_ptr.vmem [resolvable:$true] %s1837_s9 }
 0x3ec   : > { %v1299_v60 = vpop.xlane.xlu0 %1298  ;;  %s2478_s7 = scalar_lea.vmem %s3249_s9, 128 }
 0x3ed   : > { %v3068_v62 = vmax.f32 %v3063_v59, %v1299_v60  ;;  %p2479_p1 = scmp.ne.s32.totalorder %s3249_s9, %s2478_s7 }
 0x3ef   : > { %v1301_v63 = vsub.f32 %v3063_v59, %v3068_v62  ;;  %1383 = vst.msk [vmem:[#allocation5 + $0x28] sm:$0xff] %vm404_vm5, %v3068_v62  ;;  %1306 = vperm.xlu0 %2299, %v3068_v62   ;;  %1185 = vrot.lane.b32.xlu1 %v3003_v22, %s2586_s11  ;;  %v1313_v59 = vld [vmem:[#allocation6 + $0x28] sm:$0xff]  ;;  %p2480_p10 = pnand %p2479_p1, %p3328_p6 }
 0x3f1   : > { %p2481_p3 = pneg %p2480_p10 }
 0x3f3   : > { %1328 = vrot.lane.b32.xlu1 %v3003_v22, %s2587_s2 }
 0x3f4   : > { %v596_v2 = vpop.permute.xlu0 %595  ;;  %v1442_v4 = vpop.xlane.xlu1 %1441 }
 0x3f5   : > { %v598_v5 = vsub.f32 %v2957_v54, %v596_v2  ;;  %v3083_v6 = vmax.f32 %v3077_v1, %v1442_v4  ;;  %v872_v54 = vsub.f32 %v867_v47, %v871_v49 }
 0x3f7   : > { %v599_v7 = vmul.f32 1.442695, %v598_v5  ;;  %v1444_v9 = vsub.f32 %v3077_v1, %v3083_v6  ;;  %1526 = vst.msk [vmem:[#allocation5 + $0x30] sm:$0xff] %vm404_vm5, %v3083_v6  ;;  %1449 = vperm.xlu0 %2299, %v3083_v6   ;;  %1471 = vrot.lane.b32.xlu1 %v3003_v22, %s2588_s17  ;;  %v873_v12 = vmul.f32 1.442695, %v872_v54  ;;  %s3247_s17 = scalar_lea.hbm %s3302_s5, %s2014_s26 }
 0x3f9   : > { %2314 = vpow2.f32 %v599_v7 }
 0x3fa   : > { %2316 = vpow2.f32 %v591_v10 }
 0x3fb   : > { %2318 = vpow2.f32 %v873_v12 }
 0x3fc   : > { %v1585_v14 = vpop.xlane.xlu1 %1584 }
 0x3fd   : > { %v3098_v15 = vmax.f32 %v3095_v11, %v1585_v14 }
 0x3ff   : > { %v1587_v16 = vsub.f32 %v3095_v11, %v3098_v15  ;;  %1669 = vst.msk [vmem:[#allocation5 + $0x38] sm:$0xff] %vm404_vm5, %v3098_v15  ;;  %1592 = vperm.xlu0 %2299, %v3098_v15  }
 0x403   : > { %v2315_v17 = vpop.eup %2314  ;;  %1614 = vrot.lane.b32.xlu0 %v3003_v22, %s2589_s22  ;;  %v729_v22 = vmul.f32 1.442695, %v728_v46  ;;  %s2600_s22 = smov [#allocation15]  }
 0x404   : > { %v616_v18 = vpack.c.bf16 %v2315_v17, %v2315_v17  ;;  %v3107_v19 = vpop.eup %2316  ;;  %v603_v21 = vsel %vm585_vm4, %v2315_v17, 0.0  ;;  %s2482_s8 = sshll.u32 %s2600_s22, 4  ;;  %s2483_s8 = int_to_ptr.vmem [resolvable:$false] %s2482_s8 }
 0x405   : > { %v3113_v20 = vpop.eup %2318  ;;  %2320 = vpow2.f32 %v729_v22  ;;  %p2485_p4 = scmp.lt.s32.totalorder %s3249_s9, %s2483_s8 }
 0x406   : > { %2094 = vmatmul.mubr.msk.bf16.vlgmr.msra.gmra.mrb[8].mxu0 %vm585_vm4, %v616_v18 }
 0x407   : > { %612 = vperm.xlu0 %2299, %v3107_v19   ;;  %2105 = vmatprep.mubr.msk.bf16.mxu0 %vm2581_vm1, %v2580_v0 }
 0x40b   : > { %894 = vperm.xlu0 %2299, %v3113_v20  }
 0x40f   : > { %v3120_v23 = vpop.eup %2320 }
 0x41b   : > { %604 = vadd.xlane.f32.xlu1 %v603_v21 }
 0x42c   : > { %750 = vperm.xlu1 %2300, %v3120_v23  }
 0x44e   : > { %v734_v24 = vpop.permute.xlu1 %733 }
 0x44f   : > { %v736_v25 = vsub.f32 %v2985_v61, %v734_v24 }
 0x451   : > { %v737_v26 = vmul.f32 1.442695, %v736_v25 }
 0x453   : > { %2322 = vpow2.f32 %v737_v26 }
 0x456   : > { %v878_v28 = vpop.permute.xlu1 %877 }
 0x457   : > { %v880_v29 = vsub.f32 %v2989_v3, %v878_v28 }
 0x459   : > { %v881_v30 = vmul.f32 1.442695, %v880_v29 }
 0x45a   : > { %v757_v31 = vpop.permute.xlu1 %756 }
 0x45b   : > { %2324 = vpow2.f32 %v881_v30  ;;  %v762_v32 = vsel %vm620_vm6, %v757_v31, 0 }
 0x45c   : > { %2104 = vmatpush3.bf16.msra.mxu0 %v762_v32 }
 0x45d   : > { %v2323_v34 = vpop.eup %2322  ;;  %2115 = vmatprep.subr.bf16.mxu0 %v2580_v0 }
 0x45e   : > { %v1021_v35 = vpop.permute.xlu1 %1020  ;;  %v742_v36 = vsel %vm585_vm4, %v2323_v34, 0.0  ;;  %v754_v37 = vpack.c.bf16 %v2323_v34, %v2323_v34 }
 0x45f   : > { %v1023_v61 = vsub.f32 %v2993_v8, %v1021_v35  ;;  %743 = vadd.xlane.f32.xlu0 %v742_v36  ;;  %v601_v35 = vld [vmem:[#allocation6] sm:$0xff] }
 0x460   : > { %2106 = vmatmul.mubr.msk.bf16.vlgmr.msra.gmra.mrb[12].mxu0 %vm585_vm4, %v754_v37  ;;  %v602_v36 = vmul.f32 %v3107_v19, %v601_v35 }
 0x461   : > { %v1024_v39 = vmul.f32 1.442695, %v1023_v61  ;;  %2117 = vmatprep.mubr.msk.bf16.mxu0 %vm2581_vm1, %v2580_v0 }
 0x462   : > { %v900_v3 = vpop.permute.xlu1 %899 }
 0x463   : > { %2326 = vpow2.f32 %v1024_v39  ;;  %v905_v40 = vsel %vm620_vm6, %v900_v3, 0  ;;  %v609_v39 = vld [vmem:[#allocation3] sm:$0xff] }
 0x464   : > { %2116 = vmatpush3.bf16.msra.mxu0 %v905_v40 }
 0x465   : > { %v2325_v41 = vpop.eup %2324  ;;  %2127 = vmatprep.subr.bf16.mxu0 %v2580_v0 }
 0x466   : > { %v1164_v42 = vpop.permute.xlu1 %1163  ;;  %v886_v43 = vsel %vm585_vm4, %v2325_v41, 0.0  ;;  %v898_v44 = vpack.c.bf16 %v2325_v41, %v2325_v41 }
 0x467   : > { %v1166_v8 = vsub.f32 %v2997_v13, %v1164_v42  ;;  %887 = vadd.xlane.f32.xlu1 %v886_v43 }
 0x468   : > { %2118 = vmatmul.mubr.msk.bf16.vlgmr.msra.gmra.mrb[16].mxu0 %vm585_vm4, %v898_v44 }
 0x469   : > { %v1167_v46 = vmul.f32 1.442695, %v1166_v8  ;;  %2129 = vmatprep.mubr.msk.bf16.mxu0 %vm2581_vm1, %v2580_v0 }
 0x46a   : > { %v1043_v47 = vpop.permute.xlu1 %1042 }
 0x46b   : > { %2328 = vpow2.f32 %v1167_v46  ;;  %v1048_v48 = vsel %vm620_vm6, %v1043_v47, 0  ;;  %v740_v46 = vld [vmem:[#allocation6 + $0x8] sm:$0xff] }
 0x46c   : > { %2128 = vmatpush3.bf16.msra.mxu0 %v1048_v48  ;;  %2330 = vpow2.f32 %v1016_v45  ;;  %v741_v47 = vmul.f32 %v3120_v23, %v740_v46  ;;  %v1302_v23 = vmul.f32 1.442695, %v1301_v63 }
 0x46d   : > { %v2327_v49 = vpop.eup %2326  ;;  %2139 = vmatprep.subr.bf16.mxu0 %v2580_v0 }
 0x46e   : > { %v1307_v13 = vpop.permute.xlu0 %1306  ;;  %v1186_v51 = vpop.permute.xlu1 %1185  ;;  %v1029_v56 = vsel %vm585_vm4, %v2327_v49, 0.0  ;;  %v1041_v60 = vpack.c.bf16 %v2327_v49, %v2327_v49 }
 0x46f   : > { %v1309_v50 = vsub.f32 %v3012_v27, %v1307_v13  ;;  %v1191_v52 = vsel %vm620_vm6, %v1186_v51, 0  ;;  %1030 = vadd.xlane.f32.xlu0 %v1029_v56  ;;  %v884_v13 = vld [vmem:[#allocation6 + $0x10] sm:$0xff]  ;;  %v1159_v51 = vmul.f32 1.442695, %v1158_v58 }
 0x470   : > { %2130 = vmatmul.mubr.msk.bf16.vlgmr.msra.gmra.mrb[20].mxu0 %vm585_vm4, %v1041_v60  ;;  %v885_v56 = vmul.f32 %v3113_v20, %v884_v13 }
 0x471   : > { %v1310_v53 = vmul.f32 1.442695, %v1309_v50  ;;  %2140 = vmatpush3.bf16.msra.mxu0 %v1191_v52  ;;  %2141 = vmatprep.mubr.msk.bf16.mxu0 %vm2581_vm1, %v2580_v0  ;;  %v1027_v52 = vld [vmem:[#allocation6 + $0x18] sm:$0xff] }
 0x472   : > { %2151 = vmatprep.subr.bf16.mxu0 %v2580_v0  ;;  %v1329_v4 = vpop.permute.xlu1 %1328 }
 0x473   : > { %2332 = vpow2.f32 %v1310_v53  ;;  %v1334_v12 = vsel %vm620_vm6, %v1329_v4, 0 }
 0x475   : > { %v2329_v2 = vpop.eup %2328 }
 0x476   : > { %v1450_v5 = vpop.permute.xlu0 %1449  ;;  %v1172_v7 = vsel %vm585_vm4, %v2329_v2, 0.0  ;;  %v1184_v10 = vpack.c.bf16 %v2329_v2, %v2329_v2  ;;  %v3152_v27 = vpop.eup %2330 }
 0x477   : > { %v1452_v54 = vsub.f32 %v3019_v33, %v1450_v5  ;;  %1173 = vadd.xlane.f32.xlu0 %v1172_v7  ;;  %v1472_v18 = vpop.permute.xlu1 %1471  ;;  %v1028_v53 = vmul.f32 %v3152_v27, %v1027_v52 }
 0x478   : > { %1037 = vperm.xlu1 %2300, %v3152_v27   ;;  %2142 = vmatmul.mubr.msk.bf16.vlgmr.msra.gmra.mrb[24].mxu0 %vm585_vm4, %v1184_v10  ;;  %v1477_v25 = vsel %vm620_vm6, %v1472_v18, 0  ;;  %v1588_v27 = vmul.f32 1.442695, %v1587_v16 }
 0x479   : > { %v1453_v14 = vmul.f32 1.442695, %v1452_v54  ;;  %2152 = vmatpush3.bf16.msra.mxu0 %v1334_v12  ;;  %2153 = vmatprep.mubr.msk.bf16.mxu0 %vm2581_vm1, %v2580_v0 }
 0x47a   : > { %2163 = vmatprep.subr.bf16.mxu0 %v2580_v0 }
 0x47b   : > { %2334 = vpow2.f32 %v1453_v14  ;;  %v1599_v14 = vld [vmem:[#allocation6 + $0x38] sm:$0xff] }
 0x47d   : > { %v2333_v17 = vpop.eup %2332 }
 0x47e   : > { %v1593_v21 = vpop.permute.xlu0 %1592  ;;  %v1315_v33 = vsel %vm585_vm4, %v2333_v17, 0.0  ;;  %v1327_v22 = vpack.c.bf16 %v2333_v17, %v2333_v17 }
 0x47f   : > { %v1595_v24 = vsub.f32 %v3023_v38, %v1593_v21  ;;  %1316 = vadd.xlane.f32.xlu0 %v1315_v33 }
 0x480   : > { %2154 = vmatmul.mubr.msk.bf16.vlgmr.msra.gmra.mrb[28].mxu0 %vm585_vm4, %v1327_v22 }
 0x481   : > { %v1596_v26 = vmul.f32 1.442695, %v1595_v24  ;;  %2164 = vmatpush3.bf16.msra.mxu0 %v1477_v25  ;;  %2165 = vmatprep.mubr.msk.bf16.mxu0 %vm2581_vm1, %v2580_v0 }
 0x482   : > { %2175 = vmatprep.subr.bf16.mxu0 %v2580_v0  ;;  %v1615_v29 = vpop.permute.xlu0 %1614 }
 0x483   : > { %2336 = vpow2.f32 %v1596_v26  ;;  %v1620_v38 = vsel %vm620_vm6, %v1615_v29, 0 }
 0x484   : > { %2338 = vpow2.f32 %v1159_v51 }
 0x485   : > { %v3168_v28 = vpop.eup %2334  ;;  %2340 = vpow2.f32 %v1302_v23 }
 0x486   : > { %v1470_v30 = vpack.c.bf16 %v3168_v28, %v3168_v28  ;;  %v613_v3 = vpop.permute.xlu0 %612  ;;  %2342 = vpow2.f32 %v1588_v27 }
 0x487   : > { %v615_v40 = vmul.f32 %v613_v3, %v609_v39 }
 0x488   : > { %2166 = vmatmul.mubr.msk.bf16.vlgmr.msra.gmra.mrb[32].mxu0 %vm585_vm4, %v1470_v30 }
 0x489   : > { %2176 = vmatpush3.bf16.msra.mxu0 %v1620_v38  ;;  %2177 = vmatprep.mubr.msk.bf16.mxu0 %vm2581_vm1, %v2580_v0 }
 0x48a   : > { %v3181_v45 = vpop.permute.xlu0 %894 }
 0x48d   : > { %v2337_v31 = vpop.eup %2336 }
 0x48e   : > { %v1613_v32 = vpack.c.bf16 %v2337_v31, %v2337_v31  ;;  %v1601_v34 = vsel %vm585_vm4, %v2337_v31, 0.0  ;;  %v3197_v55 = vpop.eup %2338 }
 0x48f   : > { %v1171_v58 = vmul.f32 %v3197_v55, %v1170_v57  ;;  %v3201_v7 = vpop.eup %2340 }
 0x490   : > { %2178 = vmatmul.mubr.msk.bf16.vlgmr.msra.gmra.mrb[36].mxu0 %vm585_vm4, %v1613_v32  ;;  %v1314_v62 = vmul.f32 %v3201_v7, %v1313_v59  ;;  %v2343_v54 = vpop.eup %2342 }
 0x491   : > { %v1600_v17 = vmul.f32 %v2343_v54, %v1599_v14 }
 0x49c   : > { %1602 = vadd.xlane.f32.xlu1 %v1601_v34 }
 0x4a8   : > { %v605_v37 = vpop.xlane.xlu1 %604 }
 0x4a9   : > { %v606_v61 = vadd.f32 %v605_v37, %v602_v36 }
 0x4ab   : > { %608 = vst.msk [vmem:[#allocation6] sm:$0xff] %vm404_vm5, %v606_v61 }
 0x4ac   : > { %v3185_v49 = vpop.permute.xlu1 %750 }
 0x4d9   : > { %v658_v41 = vpop.f32.mrb[8].mxu0 }
 0x4da   : > { %v664_v42 = vadd.f32 %v658_v41, %v615_v40  ;;  %v2095_v43 = vpop.f32.mrb[9].mxu0  ;;  %v1674_v40 = vld [vmem:[#allocation6] sm:$0xff]  ;;  %v1458_v41 = vsel %vm585_vm4, %v3168_v28, 0.0 }
 0x4db   : > { %v661_v44 = vpop.f32.mrb[10].mxu0 }
 0x4dc   : > { %665 = vst.msk [vmem:[#allocation3] sm:$0xff] %vm537_vm3, %v664_v42  ;;  %v2096_v8 = vpop.f32.mrb[11].mxu0 }
 0x4e3   : > { %v747_v6 = vld [vmem:[#allocation3] sm:$0xff] }
 0x4ec   : > { %v744_v19 = vpop.xlane.xlu0 %743 }
 0x4ed   : > { %v745_v48 = vadd.f32 %v744_v19, %v741_v47 }
 0x4ef   : > { %746 = vst.msk [vmem:[#allocation6 + $0x8] sm:$0xff] %vm404_vm5, %v745_v48 }
 0x4f4   : > { %v888_v60 = vpop.xlane.xlu1 %887 }
 0x4f5   : > { %v889_v50 = vadd.f32 %v888_v60, %v885_v56  ;;  %v1445_v56 = vmul.f32 1.442695, %v1444_v9  ;;  %v753_v9 = vmul.f32 %v3185_v49, %v747_v6 }
 0x4f6   : > { %v1684_v60 = vld [vmem:[#allocation6 + $0x8] sm:$0xff] }
 0x4f7   : > { %890 = vst.msk [vmem:[#allocation6 + $0x10] sm:$0xff] %vm404_vm5, %v889_v50  ;;  %2344 = vpow2.f32 %v1445_v56 }
 0x4f8   : > { %v3208_v12 = vpop.permute.xlu1 %1037 }
 0x4fc   : > { %v1031_v2 = vpop.xlane.xlu0 %1030 }
 0x4fd   : > { %v1032_v4 = vadd.f32 %v1031_v2, %v1028_v53 }
 0x4fe   : > { %v1694_v43 = vld [vmem:[#allocation6 + $0x10] sm:$0xff] }
 0x4ff   : > { %1033 = vst.msk [vmem:[#allocation6 + $0x18] sm:$0xff] %vm404_vm5, %v1032_v4 }
 0x501   : > { %v2345_v28 = vpop.eup %2344 }
 0x504   : > { %v1174_v20 = vpop.xlane.xlu0 %1173 }
 0x505   : > { %v1175_v5 = vadd.f32 %v1174_v20, %v1171_v58  ;;  %v1456_v58 = vld [vmem:[#allocation6 + $0x30] sm:$0xff] }
 0x506   : > { %v1704_v50 = vld [vmem:[#allocation6 + $0x18] sm:$0xff]  ;;  %v1457_v20 = vmul.f32 %v2345_v28, %v1456_v58 }
 0x507   : > { %1176 = vst.msk [vmem:[#allocation6 + $0x20] sm:$0xff] %vm404_vm5, %v1175_v5 }
 0x50c   : > { %v1317_v63 = vpop.xlane.xlu0 %1316 }
 0x50d   : > { %v1318_v10 = vadd.f32 %v1317_v63, %v1314_v62 }
 0x50e   : > { %v1714_v47 = vld [vmem:[#allocation6 + $0x20] sm:$0xff] }
 0x50f   : > { %1319 = vst.msk [vmem:[#allocation6 + $0x28] sm:$0xff] %vm404_vm5, %v1318_v10 }
 0x516   : > { %v1724_v52 = vld [vmem:[#allocation6 + $0x28] sm:$0xff] }
 0x529   : > { %v1603_v18 = vpop.xlane.xlu1 %1602 }
 0x52a   : > { %v1604_v21 = vadd.f32 %v1603_v18, %v1600_v17 }
 0x52c   : > { %1605 = vst.msk [vmem:[#allocation6 + $0x38] sm:$0xff] %vm404_vm5, %v1604_v21 }
 0x533   : > { %v798_v33 = vpop.f32.mrb[12].mxu0  ;;  %v1744_v1 = vld [vmem:[#allocation6 + $0x38] sm:$0xff] }
 0x534   : > { %805 = vrot.lane.b32.xlu0 %v798_v33, %s2593_s14  ;;  %v2107_v22 = vpop.f32.mrb[13].mxu0  ;;  %v2312_v33 = vld [vmem:[#allocation13] sm:$0xff]   ;;  %s2484_s14 = scalar_lea.vmem %s2483_s8, 256 }
 0x535   : > { %v801_v24 = vpop.f32.mrb[14].mxu0  ;;  %2182 = vmatpush3.bf16.msra.mxu1 %v2312_v33  ;;  %p2486_p9 = scmp.lt.s32.totalorder %s2484_s14, %s2478_s7 }
 0x536   : > { %v2108_v25 = vpop.f32.mrb[15].mxu0  ;;  %v2313_v24 = vld [vmem:[#allocation13 + $0x8] sm:$0xff]   ;;  %2183 = vmatprep.subr.bf16.mxu1 %v2580_v0 }
 0x537   : > { %p2487_p5 = por %p2486_p9, %p2485_p4 }
 0x539   : > { %2184 = vmatpush3.bf16.msra.mxu1 %v2313_v24  ;;  %p2488_p7 = pnand %p2487_p5, %p2481_p3 }
 0x53b   : > { %v941_v26 = vpop.f32.mrb[16].mxu0 }
 0x53c   : > { %948 = vrot.lane.b32.xlu0 %v941_v26, %s2594_s30  ;;  %v2119_v11 = vpop.f32.mrb[17].mxu0 }
 0x53d   : > { %v944_v15 = vpop.f32.mrb[18].mxu0 }
 0x53e   : > { %v2120_v16 = vpop.f32.mrb[19].mxu0 }
 0x543   : > { %v1084_v29 = vpop.f32.mrb[20].mxu0 }
 0x544   : > { %v2131_v30 = vpop.f32.mrb[21].mxu0 }
 0x545   : > { %v1087_v38 = vpop.f32.mrb[22].mxu0 }
 0x546   : > { %v2132_v31 = vpop.f32.mrb[23].mxu0 }
 0x54b   : > { %v1227_v32 = vpop.f32.mrb[24].mxu0 }
 0x54c   : > { %v2143_v34 = vpop.f32.mrb[25].mxu0 }
 0x54d   : > { %v1230_v35 = vpop.f32.mrb[26].mxu0 }
 0x54e   : > { %v2144_v36 = vpop.f32.mrb[27].mxu0 }
 0x553   : > { %v1370_v37 = vpop.f32.mrb[28].mxu0 }
 0x554   : > { %1377 = vrot.lane.b32.xlu1 %v1370_v37, %s2595_s12  ;;  %v2155_v61 = vpop.f32.mrb[29].mxu0 }
 0x555   : > { %v1373_v39 = vpop.f32.mrb[30].mxu0 }
 0x556   : > { %v2156_v3 = vpop.f32.mrb[31].mxu0 }
 0x558   : > { %1677 = vperm.xlu1 %2300, %v1674_v40  }
 0x55b   : > { %1459 = vadd.xlane.f32.xlu0 %v1458_v41  ;;  %v1513_v42 = vpop.f32.mrb[32].mxu0 }
 0x55c   : > { %1697 = vperm.xlu1 %2300, %v1694_v43   ;;  %v2167_v44 = vpop.f32.mrb[33].mxu0 }
 0x55d   : > { %v1516_v8 = vpop.f32.mrb[34].mxu0 }
 0x55e   : > { %v2168_v46 = vpop.f32.mrb[35].mxu0 }
 0x560   : > { %1717 = vperm.xlu1 %2300, %v1714_v47  }
 0x563   : > { %v1656_v19 = vpop.f32.mrb[36].mxu0 }
 0x564   : > { %v2179_v48 = vpop.f32.mrb[37].mxu0 }
 0x565   : > { %v1659_v13 = vpop.f32.mrb[38].mxu0 }
 0x566   : > { %v2180_v51 = vpop.f32.mrb[39].mxu0 }
 0x571   : > { %1091 = vrot.lane.b32.xlu0 %v1084_v29, %s2596_s13 }
 0x575   : > { %1180 = vperm.xlu0 %2299, %v3197_v55  }
 0x579   : > { %1234 = vrot.lane.b32.xlu0 %v1227_v32, %s2597_s15 }
 0x57d   : > { %1323 = vperm.xlu0 %2299, %v3201_v7  }
 0x581   : > { %1466 = vperm.xlu0 %2299, %v2345_v28  }
 0x585   : > { %1609 = vperm.xlu0 %2299, %v2343_v54  }
 0x589   : > { %1687 = vperm.xlu0 %2299, %v1684_v60  }
 0x58d   : > { %1707 = vperm.xlu0 %2299, %v1704_v50  }
 0x591   : > { %1520 = vrot.lane.b32.xlu0 %v1513_v42, %s2598_s28 }
 0x595   : > { %1727 = vperm.xlu0 %2299, %v1724_v52  }
 0x599   : > { %1663 = vrot.lane.b32.xlu0 %v1656_v19, %s2599_s16 }
 0x59d   : > { %1747 = vperm.xlu0 %2299, %v1744_v1  }
 0x5a6   : > { %v806_v23 = vpop.permute.xlu0 %805 }
 0x5a7   : > { %v808_v53 = vadd.f32 %v806_v23, %v753_v9  ;;  %v2009_v23 = vld [vmem:[%s3301_s4] ss:$0 sm:$0xff] }
 0x5a9   : > { %810 = vst.msk [vmem:[#allocation3] sm:$0xff] %vm809_vm7, %v808_v53 }
 0x5ae   : > { %v949_v55 = vpop.permute.xlu0 %948 }
 0x5b0   : > { %v891_v2 = vld [vmem:[#allocation3] sm:$0xff] }
 0x5b1   : > { %v897_v4 = vmul.f32 %v3181_v45, %v891_v2 }
 0x5b3   : > { %v951_v57 = vadd.f32 %v949_v55, %v897_v4 }
 0x5b5   : > { %953 = vst.msk [vmem:[#allocation3] sm:$0xff] %vm952_vm8, %v951_v57 }
 0x5bc   : > { %v1034_v7 = vld [vmem:[#allocation3] sm:$0xff] }
 0x5bd   : > { %v1040_v49 = vmul.f32 %v3208_v12, %v1034_v7 }
 0x5c6   : > { %v1378_v25 = vpop.permute.xlu1 %1377 }
 0x5d7   : > { %v1678_v31 = vpop.permute.xlu1 %1677 }
 0x5d8   : > { %2346 = vrcp.f32 %v1678_v31 }
 0x5db   : > { %v1698_v35 = vpop.permute.xlu1 %1697 }
 0x5df   : > { %v1718_v61 = vpop.permute.xlu1 %1717 }
 0x5e2   : > { %v2347_v3 = vpop.eup %2346 }
 0x5e8   : > { %v1460_v5 = vpop.xlane.xlu0 %1459 }
 0x5e9   : > { %v1461_v59 = vadd.f32 %v1460_v5, %v1457_v20 }
 0x5eb   : > { %1462 = vst.msk [vmem:[#allocation6 + $0x30] sm:$0xff] %vm404_vm5, %v1461_v59 }
 0x5ec   : > { %v1092_v62 = vpop.permute.xlu0 %1091 }
 0x5ed   : > { %v1094_v63 = vadd.f32 %v1092_v62, %v1040_v49 }
 0x5ef   : > { %1096 = vst.msk [vmem:[#allocation3] sm:$0xff] %vm1095_vm9, %v1094_v63 }
 0x5f2   : > { %v1734_v45 = vld [vmem:[#allocation6 + $0x30] sm:$0xff] }
 0x5f3   : > { %1737 = vperm.xlu1 %2300, %v1734_v45  }
 0x5f4   : > { %v1181_v10 = vpop.permute.xlu0 %1180 }
 0x5f6   : > { %v1177_v27 = vld [vmem:[#allocation3] sm:$0xff] }
 0x5f7   : > { %v1183_v54 = vmul.f32 %v1181_v10, %v1177_v27 }
 0x5f8   : > { %v1235_v14 = vpop.permute.xlu0 %1234 }
 0x5f9   : > { %v1237_v17 = vadd.f32 %v1235_v14, %v1183_v54 }
 0x5fb   : > { %1239 = vst.msk [vmem:[#allocation3] sm:$0xff] %vm1238_vm10, %v1237_v17 }
 0x5fc   : > { %v1324_v18 = vpop.permute.xlu0 %1323 }
 0x600   : > { %v1467_v21 = vpop.permute.xlu0 %1466 }
 0x602   : > { %v1320_v22 = vld [vmem:[#allocation3] sm:$0xff] }
 0x603   : > { %v1326_v12 = vmul.f32 %v1324_v18, %v1320_v22 }
 0x604   : > { %v1610_v26 = vpop.permute.xlu0 %1609 }
 0x605   : > { %v1380_v11 = vadd.f32 %v1378_v25, %v1326_v12 }
 0x607   : > { %1382 = vst.msk [vmem:[#allocation3] sm:$0xff] %vm1381_vm11, %v1380_v11 }
 0x608   : > { %v1688_v15 = vpop.permute.xlu0 %1687 }
 0x609   : > { %2348 = vrcp.f32 %v1688_v15 }
 0x60a   : > { %2350 = vrcp.f32 %v1698_v35 }
 0x60c   : > { %v1708_v16 = vpop.permute.xlu0 %1707 }
 0x60d   : > { %2352 = vrcp.f32 %v1708_v16 }
 0x60e   : > { %v1463_v29 = vld [vmem:[#allocation3] sm:$0xff]  ;;  %2354 = vrcp.f32 %v1718_v61 }
 0x60f   : > { %v1469_v30 = vmul.f32 %v1467_v21, %v1463_v29 }
 0x610   : > { %v1521_v38 = vpop.permute.xlu0 %1520 }
 0x611   : > { %v1523_v32 = vadd.f32 %v1521_v38, %v1469_v30 }
 0x613   : > { %1525 = vst.msk [vmem:[#allocation3] sm:$0xff] %vm1524_vm12, %v1523_v32  ;;  %v2349_v40 = vpop.eup %2348 }
 0x614   : > { %v1728_v34 = vpop.permute.xlu0 %1727  ;;  %v2351_v44 = vpop.eup %2350 }
 0x615   : > { %2356 = vrcp.f32 %v1728_v34 }
 0x617   : > { %v2353_v8 = vpop.eup %2352 }
 0x618   : > { %v1664_v0 = vpop.permute.xlu0 %1663  ;;  %v2355_v47 = vpop.eup %2354 }
 0x61a   : > { %v1606_v36 = vld [vmem:[#allocation3] sm:$0xff] }
 0x61b   : > { %v1612_v37 = vmul.f32 %v1610_v26, %v1606_v36 }
 0x61c   : > { %v1748_v56 = vpop.permute.xlu0 %1747 }
 0x61d   : > { %v1666_v39 = vadd.f32 %v1664_v0, %v1612_v37  ;;  %2358 = vrcp.f32 %v1748_v56 }
 0x61f   : > { %1668 = vst.msk [vmem:[#allocation3] sm:$0xff] %vm1667_vm13, %v1666_v39  ;;  %v2357_v48 = vpop.eup %2356 }
 0x626   : > { %v1673_v41 = vld [vmem:[#allocation3] sm:$0xff] }
 0x627   : > { %v1681_v42 = vmul.f32 %v2347_v3, %v1673_v41  ;;  %v1691_v43 = vmul.f32 %v2349_v40, %v1673_v41  ;;  %v1701_v46 = vmul.f32 %v2351_v44, %v1673_v41  ;;  %v1711_v19 = vmul.f32 %v2353_v8, %v1673_v41  ;;  %v2359_v60 = vpop.eup %2358 }
 0x628   : > { %v1721_v13 = vmul.f32 %v2355_v47, %v1673_v41  ;;  %v1731_v51 = vmul.f32 %v2357_v48, %v1673_v41  ;;  %v1751_v1 = vmul.f32 %v2359_v60, %v1673_v41 }
 0x629   : > { %1682 = vst.msk [vmem:[#allocation4] sm:$0xff] %vm537_vm3, %v1681_v42 }
 0x62a   : > { %1692 = vst.msk [vmem:[#allocation4] sm:$0xff] %vm809_vm7, %v1691_v43 }
 0x62b   : > { %1702 = vst.msk [vmem:[#allocation4] sm:$0xff] %vm952_vm8, %v1701_v46 }
 0x62c   : > { %1712 = vst.msk [vmem:[#allocation4] sm:$0xff] %vm1095_vm9, %v1711_v19 }
 0x62d   : > { %1722 = vst.msk [vmem:[#allocation4] sm:$0xff] %vm1238_vm10, %v1721_v13 }
 0x62e   : > { %1732 = vst.msk [vmem:[#allocation4] sm:$0xff] %vm1381_vm11, %v1731_v51 }
 0x672   : > { %v1738_v28 = vpop.permute.xlu1 %1737 }
 0x673   : > { %2360 = vrcp.f32 %v1738_v28 }
 0x67d   : > { %v2361_v50 = vpop.eup %2360 }
 0x67e   : > { %v1741_v52 = vmul.f32 %v2361_v50, %v1673_v41 }
 0x680   : > { %1742 = vst.msk [vmem:[#allocation4] sm:$0xff] %vm1524_vm12, %v1741_v52 }
 0x681   : > { %1752 = vst.msk [vmem:[#allocation4] sm:$0xff] %vm1667_vm13, %v1751_v1 }
 0x688   : > { %v1753_v6 = vld [vmem:[#allocation4] sm:$0xff] }
 0x689   : > { %v1754_v9 = vpack.c.bf16 %v1753_v6, %v1753_v6 }
 0x68b   : > { %2186 = vmatmul.mubr.msk.bf16.vlgmr.msra.gmra.mrb[36].mxu1 %vm356_vm0, %v1754_v9 }
 0x75e   : > { %v1815_v53 = vpop.f32.mrb[36].mxu1 }
 0x75f   : > { %v1816_v2 = vadd.f32 %v2009_v23, %v1815_v53  ;;  %v2187_v4 = vpop.f32.mrb[37].mxu1 }
 0x760   : > { %v1818_v55 = vpop.f32.mrb[38].mxu1 }
 0x761   : > { %v2188_v57 = vpop.f32.mrb[39].mxu1  ;;  %1821 = vst.msk [vmem:[%s332_s29] sm:$0xff] %vm356_vm0, %v1816_v2 }
 0x762   : > { %2491 = shalt.err (!%p2488_p7)
}
 0x763   : > { %s2492_s3 = scalar_lea.hbm %s3247_s17, 128  ;;  %s2496_s13 = scalar_lea.hbm %s3302_s5, 256 }
 0x764   : > { %p2493_p13 = scmp.ne.s32.totalorder %s3247_s17, %s2492_s3  ;;  %p2497_p2 = scmp.lt.u32.totalorder %s3247_s17, %s3302_s5 }
 0x765   : > { %p2498_p12 = scmp.lt.u32.totalorder %s2496_s13, %s2492_s3  ;;  %p2500_p1 = scmp.lt.u32.totalorder %s2492_s3, %s3247_s17 }
 0x766   : > { %p2494_p8 = pnand %p2493_p13, %p3328_p6 }
 0x767   : > { %p2499_p0 = por %p2498_p12, %p2497_p2 }
 0x768   : > { %p2495_p11 = pneg %p2494_p8 }
 0x769   : > { %p2501_p10 = por %p2500_p1, %p2499_p0 }
 0x76b   : > { %p2502_p3 = pnand %p2501_p10, %p2495_p11 }
 0x76d   : > { %2505 = shalt.err (!%p2502_p3)
}
 0x76e   : > { %2201 = dma.vmem_to_hbm [thread:$0]  (%p3328_p6), %s3249_s9, 128, %s3247_s17, %s1823_s21  }
 0x76f PF: > { %s1849_s16 = sand.u32 1, %s2552_s18   ;;  %p3329_p4 = scmp.ne.s32.totalorder %s3313_s27, 0 }
 0x770   : > { %p3330_p9 = scmp.ge.s32.totalorder %s2572_s23, 2  ;;  %s1850_s10 = scalar_lea.sflag [#allocation9], %s1849_s16 }
 0x772   : > { %p2218_p5 = pnand %p3330_p9, %p3329_p4 }
 0x774   : > { %2547 = dma.done.wait (!%p2218_p5), %s1850_s10, 128  }
 0x775   : > { %2549 = vsyncadd (!%p2218_p5), %s1850_s10, 4294967168  ;;  %s25_s23 = sadd.s32 1, %s2572_s23   ;;  %s3331_s21 = sld [smem:[#allocation21_spill]] }
 0x776   : > { %p22_p7 = scmp.ge.s32.totalorder %s25_s23, 4   ;;  %s3332_s22 = sld [smem:[#allocation22_spill]] }
 0x777   : > { %s3333_s18 = smov %s2556_s19  ;;  %s3334_s19 = smov %s2560_s20 }
 0x778   : > { %s3335_s20 = smov %s2771_s25  ;;  %24 = sbr.rel (!%p22_p7) target bundleno = 12 (0xc), region = 128 }
 0x77f   :  { %1855 = vsyncpa [#allocation8], 1 }
 0x780   :  { %1857 = vsyncpa [#allocation8 + $0x1], 1 }
 0x781   :  { %1858 = vsyncpa [#allocation11], 1 }
 0x782   :  { %1860 = vsyncpa [#allocation11 + $0x1], 1 }
 0x783   :  { %1861 = vsyncpa [#allocation14], 1 }
 0x784   :  { %1862 = vsyncpa [#allocation9], 1 }
 0x785   :  { %1864 = vsyncpa [#allocation9 + $0x1], 1 }

// kernel: tpu_custom_call.1
= control target key start
LH: loop header
LB: loop body
LE: loop exit
PB: predicated region body
PF: predicated region fallthrough
CT: control target
= control target key end

     0   :  { %s3297_s0 = inlined_call_operand.hbm [shape: f32[2,8,32], index: 0, kind: input, shape index: {}]   ;;  %s3298_s1 = inlined_call_operand.hbm [shape: f32[2,8,32], index: 1, kind: input, shape index: {}]   ;;  %s3299_s2 = inlined_call_operand.hbm [shape: bf16[32,96], index: 2, kind: input, shape index: {}]   ;;  %s3300_s3 = inlined_call_operand.hbm [shape: bf16[32,32], index: 3, kind: input, shape index: {}]   ;;  %s3301_s4 = inlined_call_operand.vmem [shape: f32[1,32], index: 4, kind: input, shape index: {}]   ;;  %s3302_s5 = inlined_call_operand.hbm [shape: f32[2,8,32], index: 5, kind: output, shape index: {}]  }
   0x1   :  { %3309 = sst [smem:[#allocation23_spill]] %s3299_s2 }
   0x2   :  { %3310 = sst [smem:[#allocation24_spill]] %s3300_s3 }
   0x3   :  { %10 = vsyncpa [#allocation8], 0 }
   0x4   :  { %12 = vsyncpa [#allocation8 + $0x1], 0 }
   0x5   :  { %13 = vsyncpa [#allocation11], 0 }
   0x6   :  { %15 = vsyncpa [#allocation11 + $0x1], 0 }
   0x7   :  { %16 = vsyncpa [#allocation14], 0 }
   0x8   :  { %17 = vsyncpa [#allocation9], 0 }
   0x9   :  { %19 = vsyncpa [#allocation9 + $0x1], 0  ;;  %s2631_s18 = smov 0   ;;  %s2633_s19 = smov 0  }
   0xa   :  { %s2635_s20 = smov 0   ;;  %s2637_s21 = smov 0  }
   0xb   :  { %s2639_s22 = smov 0   ;;  %s2641_s23 = smov 0  }
   0xc LB: > { %3311 = sst [smem:[#allocation21_spill]] %s2568_s22  ;;  %s2662_s24 = sadd.s32 4294967295, %s2572_s23   ;;  %s2572_s23 = sphi %s2641_s23, %s25_s23   ;;  %s2568_s22 = sphi %s2639_s22, %s3332_s22   ;;  %s2564_s21 = sphi %s2637_s21, %s3331_s21   ;;  %s2560_s20 = sphi %s2635_s20, %s3335_s20   ;;  %s2556_s19 = sphi %s2633_s19, %s3334_s19   ;;  %s2552_s18 = sphi %s2631_s18, %s3333_s18  }
   0xd   : > { %s1964_s25 = sadd.s32 4294967294, %s2572_s23   ;;  %p66_p0 = scmp.ne.s32.totalorder %s2556_s19, %s2552_s18 }
   0xe   : > { %p3303_p1 = scmp.eq.s32.totalorder %s2662_s24, 0  ;;  %p189_p3 = scmp.eq.s32.totalorder %s1964_s25, 1 }
   0xf   : > { %p1965_p5 = scmp.ge.s32.totalorder %s2572_s23, 1  ;;  %p196_p7 = scmp.lt.s32.totalorder %s2572_s23, 3 }
  0x10   : > { %p2671_p4 = por %p3303_p1, %p66_p0  ;;  %p2676_p6 = por %p189_p3, %p66_p0 }
  0x11   : > { %p2681_p8 = pnand %p1965_p5, %p196_p7  ;;  %s2574_s29 = smov [#allocation12]  }
  0x12   : > { %s3312_s26 = scalar_select %p2671_p4, 1, 0 }
  0x13   : > { %s3313_s27 = scalar_select %p2676_p6, 1, 0 }
  0x14   : > { %s3314_s28 = scalar_select %p2681_p8, 1, 0 }
  0x15   : > { %s208_s30 = sshll.u32 %s2574_s29, 4  ;;  %p2203_p9 = pneg %p2681_p8  ;;  %s2685_s30 = int_to_ptr.vmem [resolvable:$true] %s208_s30 }
  0x16   : > { %s2575_s7 = smov [#allocation13]   ;;  %s3316_s2 = sld [smem:[#allocation23_spill]] }
  0x17   : > { %p2692_p11 = pnand %p2203_p9, %p3303_p1  ;;  %s221_s8 = sshll.u32 %s2575_s7, 4  ;;  %s2696_s8 = int_to_ptr.vmem [resolvable:$true] %s221_s8 }
  0x19   : > { %p2364_p13 = pneg %p2692_p11 }
  0x1c   : > { %s2362_s11 = scalar_lea.hbm %s3316_s2, 256 }
  0x1d   : > { %p2363_p12 = scmp.ne.s32.totalorder %s3316_s2, %s2362_s11  ;;  %p2369_p5 = scmp.lt.u32.totalorder %s2362_s11, %s3316_s2 }
  0x1f   : > { %p2365_p0 = pnand %p2364_p13, %p2363_p12 }
  0x21   : > { %p2366_p3 = pneg %p2365_p0 }
  0x23   : > { %p2371_p7 = pnand %p2369_p5, %p2366_p3 }
  0x25   : > { %2374 = shalt.err (!%p2371_p7)
}
  0x26   : > { %s2375_s16 = scalar_lea.vmem %s2685_s30, 256  ;;  %p2383_p2 = scmp.lt.s32.totalorder %s2685_s30, %s2685_s30 }
  0x27   : > { %p2376_p9 = scmp.ne.s32.totalorder %s2685_s30, %s2375_s16  ;;  %p2384_p12 = scmp.lt.s32.totalorder %s2375_s16, %s2375_s16 }
  0x29   : > { %p2378_p10 = pnand %p2376_p9, %p2364_p13  ;;  %p2385_p0 = por %p2384_p12, %p2383_p2 }
  0x2b   : > { %p2379_p1 = pneg %p2378_p10 }
  0x2d   : > { %p2386_p6 = pnand %p2385_p0, %p2379_p1 }
  0x2f   : > { %2389 = shalt.err (!%p2386_p6)
}
  0x30   : > { %s2576_s17 = smov 64   ;;  %s2577_s25 = smov 4  }
  0x31   : > { %2206 = dma.hbm_to_vmem [thread:$0]  (!%p2692_p11), %s3316_s2, 256, %s2685_s30, [#allocation11], %s2576_s17, %s2576_s17, %s2577_s25  }
  0x32   : > { %s3317_s3 = sld [smem:[#allocation24_spill]] }
  0x38   : > { %s2390_s11 = scalar_lea.hbm %s3317_s3, 256 }
  0x39   : > { %p2391_p2 = scmp.ne.s32.totalorder %s3317_s3, %s2390_s11  ;;  %p2397_p10 = scmp.lt.u32.totalorder %s2390_s11, %s3317_s3 }
  0x3b   : > { %p2393_p1 = pnand %p2391_p2, %p2364_p13 }
  0x3d   : > { %p2394_p6 = pneg %p2393_p1 }
  0x3f   : > { %p2399_p3 = pnand %p2397_p10, %p2394_p6 }
  0x41   : > { %2402 = shalt.err (!%p2399_p3)
}
  0x42   : > { %s2403_s30 = scalar_lea.vmem %s2696_s8, 256  ;;  %p2411_p12 = scmp.lt.s32.totalorder %s2696_s8, %s2696_s8 }
  0x43   : > { %p2404_p5 = scmp.ne.s32.totalorder %s2696_s8, %s2403_s30  ;;  %p2412_p0 = scmp.lt.s32.totalorder %s2403_s30, %s2403_s30 }
  0x45   : > { %p2406_p7 = pnand %p2404_p5, %p2364_p13  ;;  %p2413_p2 = por %p2412_p0, %p2411_p12 }
  0x47   : > { %p2407_p9 = pneg %p2406_p7 }
  0x49   : > { %p2414_p1 = pnand %p2413_p2, %p2407_p9 }
  0x4b   : > { %2417 = shalt.err (!%p2414_p1)
}
  0x4c   : > { %2209 = dma.hbm_to_vmem [thread:$0]  (!%p2692_p11), %s3317_s3, 256, %s2696_s8, [#allocation14], %s2576_s17, %s2576_s17, %s2577_s25  }
  0x4d   : > { %s44_s7 = sadd.s32 1, %s2568_s22  ;;  %s53_s9 = sadd.s32 1, %s2560_s20 }
  0x4e   : > { %p46_p13 = scmp.ge.s32.totalorder %s44_s7, 2  ;;  %p60_p6 = scmp.ne.s32.totalorder %s2560_s20, %s2556_s19 }
  0x4f   : > { %p61_p10 = scmp.eq.s32.totalorder %s2572_s23, 0  ;;  %p2223_p3 = scmp.lt.s32.totalorder %s2572_s23, 2 }
  0x50   : > { %s3337_s7 = smov (%p46_p13, %s44_s7), 0  ;;  %p3319_p7 = scmp.eq.s32.totalorder %s2662_s24, 1 }
  0x51   : > { %3318 = sst [smem:[#allocation22_spill]] %s3337_s7  ;;  %p62_p5 = por %p61_p10, %p60_p6 }
  0x52   : > { %p2760_p9 = por %p3319_p7, %p60_p6  ;;  %s48_s10 = ssub.s32 %s2568_s22, %s3337_s7 }
  0x53   : > { %s238_s11 = sand.u32 1, %s2560_s20   ;;  %p51_p12 = scmp.eq.s32.totalorder %s48_s10, 0 }
  0x54   : > { %s3320_s6 = scalar_select %p2760_p9, 1, 0 }
  0x55   : > { %s2767_s8 = sshll.u32 %s238_s11, 3  ;;  %s1970_s17 = sshll.u32 %s2568_s22, 7 }
  0x56   : > { %s2771_s25 = scalar_select %p51_p12, %s2560_s20, %s53_s9  }
  0x57   : > { %s2776_s14 = scalar_lea.hbm %s3297_s0, %s1970_s17  ;;  %s242_s15 = scalar_lea.vmem [#allocation7], %s2767_s8 }
  0x58   : > { %s250_s30 = sshll.u32 %s242_s15, 4  ;;  %p2781_p11 = pnand %p2223_p3, %p62_p5  ;;  %s2785_s30 = int_to_ptr.vmem [resolvable:$true] %s250_s30 }
  0x59   : > { %s2790_s10 = scalar_lea.hbm %s3298_s1, %s1970_s17  ;;  %s239_s12 = scalar_lea.sflag [#allocation8], %s238_s11 }
  0x5a   : > { %s2418_s13 = scalar_lea.hbm %s2776_s14, 128  ;;  %p2420_p2 = pneg %p2781_p11 }
  0x5b   : > { %p2419_p0 = scmp.ne.s32.totalorder %s2776_s14, %s2418_s13  ;;  %s2423_s3 = scalar_lea.hbm %s3297_s0, 256 }
  0x5c   : > { %p2424_p6 = scmp.lt.u32.totalorder %s2776_s14, %s3297_s0  ;;  %p2425_p10 = scmp.lt.u32.totalorder %s2423_s3, %s2418_s13 }
  0x5d   : > { %p2421_p1 = pnand %p2420_p2, %p2419_p0  ;;  %p2427_p5 = scmp.lt.u32.totalorder %s2418_s13, %s2776_s14 }
  0x5e   : > { %p2426_p3 = por %p2425_p10, %p2424_p6 }
  0x5f   : > { %p2422_p13 = pneg %p2421_p1 }
  0x60   : > { %p2428_p7 = por %p2427_p5, %p2426_p3 }
  0x62   : > { %p2429_p12 = pnand %p2428_p7, %p2422_p13 }
  0x64   : > { %2432 = shalt.err (!%p2429_p12)
}
  0x65   : > { %s2433_s11 = scalar_lea.vmem %s2785_s30, 128  ;;  %s2578_s2 = smov [#allocation7]  }
  0x66   : > { %p2434_p0 = scmp.ne.s32.totalorder %s2785_s30, %s2433_s11  ;;  %s2438_s17 = sshll.u32 %s2578_s2, 4  ;;  %s2439_s17 = int_to_ptr.vmem [resolvable:$false] %s2438_s17 }
  0x67   : > { %s2440_s22 = scalar_lea.vmem %s2439_s17, 256  ;;  %p2441_p4 = scmp.lt.s32.totalorder %s2785_s30, %s2439_s17 }
  0x68   : > { %p2436_p1 = pnand %p2434_p0, %p2420_p2  ;;  %p2442_p6 = scmp.lt.s32.totalorder %s2440_s22, %s2433_s11 }
  0x6a   : > { %p2437_p9 = pneg %p2436_p1  ;;  %p2443_p10 = por %p2442_p6, %p2441_p4 }
  0x6c   : > { %p2444_p3 = pnand %p2443_p10, %p2437_p9 }
  0x6e   : > { %2447 = shalt.err (!%p2444_p3)
}
  0x6f   : > { %2213 = dma.hbm_to_vmem [thread:$0]  (!%p2781_p11), %s2776_s14, 128, %s2785_s30, %s239_s12  }
  0x70   : > { %s257_s3 = sand.u32 1, %s2572_s23   ;;  %s261_s7 = scalar_lea.vmem [#allocation10], %s2767_s8 }
  0x71   : > { %s269_s29 = sshll.u32 %s261_s7, 4  ;;  %s258_s9 = scalar_lea.sflag [#allocation11], %s257_s3  ;;  %s270_s29 = int_to_ptr.vmem [resolvable:$true] %s269_s29 }
  0x72   : > { %s2448_s13 = scalar_lea.hbm %s2790_s10, 128  ;;  %s2453_s2 = scalar_lea.hbm %s3298_s1, 256 }
  0x73   : > { %p2449_p4 = scmp.ne.s32.totalorder %s2790_s10, %s2448_s13  ;;  %p2454_p5 = scmp.lt.u32.totalorder %s2790_s10, %s3298_s1 }
  0x74   : > { %p2455_p7 = scmp.lt.u32.totalorder %s2453_s2, %s2448_s13  ;;  %p2457_p0 = scmp.lt.u32.totalorder %s2448_s13, %s2790_s10 }
  0x75   : > { %p2451_p9 = pnand %p2449_p4, %p2420_p2 }
  0x76   : > { %p2456_p12 = por %p2455_p7, %p2454_p5 }
  0x77   : > { %p2452_p13 = pneg %p2451_p9 }
  0x78   : > { %p2458_p1 = por %p2457_p0, %p2456_p12 }
  0x7a   : > { %p2459_p6 = pnand %p2458_p1, %p2452_p13 }
  0x7c   : > { %2462 = shalt.err (!%p2459_p6)
}
  0x7d   : > { %s2463_s8 = scalar_lea.vmem %s270_s29, 128  ;;  %s2579_s14 = smov [#allocation10]  }
  0x7e   : > { %p2464_p10 = scmp.ne.s32.totalorder %s270_s29, %s2463_s8  ;;  %s2468_s30 = sshll.u32 %s2579_s14, 4  ;;  %s2469_s30 = int_to_ptr.vmem [resolvable:$false] %s2468_s30 }
  0x7f   : > { %s2470_s12 = scalar_lea.vmem %s2469_s30, 256  ;;  %p2471_p9 = scmp.lt.s32.totalorder %s270_s29, %s2469_s30 }
  0x80   : > { %p2466_p3 = pnand %p2464_p10, %p2420_p2  ;;  %p2472_p8 = scmp.lt.s32.totalorder %s2470_s12, %s2463_s8 }
  0x82   : > { %p2467_p4 = pneg %p2466_p3  ;;  %p2473_p5 = por %p2472_p8, %p2471_p9 }
  0x84   : > { %p2474_p7 = pnand %p2473_p5, %p2467_p4 }
  0x86   : > { %2477 = shalt.err (!%p2474_p7)
}
  0x87   : > { %2216 = dma.hbm_to_vmem [thread:$0]  (!%p2781_p11), %s2790_s10, 128, %s270_s29, %s258_s9  }
  0x88   : > { %p3322_p13 = scmp.ne.s32.totalorder %s3314_s28, 0 }
  0x89   : > { %s2841_s3 = sand.u32 (!%p3322_p13), 1, %s2556_s19   ;;  %p3323_p8 = scmp.ne.s32.totalorder (!%p3322_p13), %s3312_s26, 0 }
  0x8a   : > { %278 = sbr.rel (%p3322_p13) target bundleno = 1903 (0x76f), region = 40  ;;  %s2844_s7 = sshll.u32 (!%p3322_p13), %s2841_s3, 3 }
  0x8b   : > { %s281_s13 = scalar_lea.sflag (!%p3322_p13), [#allocation8], %s2841_s3  ;;  %s284_s15 = scalar_lea.vmem (!%p3322_p13), [#allocation7], %s2844_s7 }
  0x91   : > { %2531 = dma.done.wait (%p3323_p8), %s281_s13, 128  }
  0x92   : > { %2533 = vsyncadd (%p3323_p8), %s281_s13, 4294967168  ;;  %s289_s28 = sand.u32 1, %s2662_s24   ;;  %s293_s10 = scalar_lea.vmem [#allocation10], %s2844_s7 }
  0x93   : > { %s290_s16 = scalar_lea.sflag [#allocation11], %s289_s28 }
  0x94   : > { %2535 = dma.done.wait (%p3323_p8), %s290_s16, 128  }
  0x95   : > { %2537 = vsyncadd (%p3323_p8), %s290_s16, 4294967168  ;;  %p3324_p11 = scmp.eq.s32.totalorder %s2662_s24, 0 }
  0x97   : > { %2539 = dma.done.wait (%p3324_p11), [#allocation11], 256   ;;  %p3325_p2 = pmov %p3324_p11 }
  0x99   : > { %2541 = vsyncadd (%p3325_p2), [#allocation11], 4294967040  ;;  %p3326_p12 = pmov %p3325_p2 }
  0x9a   : > { %p3327_p0 = pmov %p3325_p2 }
  0x9b   : > { %2543 = dma.done.wait (%p3326_p12), [#allocation14], 256  }
  0x9c   : > { %2545 = vsyncadd (%p3327_p0), [#allocation14], 4294967040  ;;  %vm356_vm0 = vcmask 261120   ;;  %v2580_v0 = vmov 0.0   ;;  %vm2581_vm1 = vmmov 0   ;;  %v2874_v1 = vld [vmem:[#allocation12] sm:$0xff]  }
  0x9d   : > { %2061 = vmatprep.subr.bf16.mxu0 %v2580_v0  ;;  %2065 = vmatprep.mubr.msk.bf16.mxu0 %vm2581_vm1, %v2580_v0  ;;  %421 = vst.msk [vmem:[#allocation3] sm:$0xff] %vm356_vm0, %v2580_v0  ;;  %v2876_v2 = vld [vmem:[#allocation12 + $0x8] sm:$0xff]   ;;  %s2582_s24 = smov 96   ;;  %v2303_v3 = vld [vmem:[#allocation12] sm:$0xff]   ;;  %v422_v8 = vld [vmem:[%s293_s10] sm:$0xff]  ;;  %vm402_vm2 = vcmask 257024  }
  0x9e   : > { %2069 = vmatprep.subr.bf16.mxu1 %v2580_v0  ;;  %2073 = vmatprep.mubr.msk.bf16.mxu1 %vm2581_vm1, %v2580_v0  ;;  %v2304_v4 = vld [vmem:[#allocation12 + $0x8] sm:$0xff]   ;;  %v2888_v10 = vpack.c.bf16 %v422_v8, %v422_v8  ;;  %vm537_vm3 = vcmask 31744   ;;  %s2583_s26 = smov 120   ;;  %s2584_s29 = smov 124   ;;  %vm585_vm4 = vcmask 64512   ;;  %vm404_vm5 = vcmask 7168  }
  0x9f   : > { %438 = vrot.lane.b32.xlu0 %v2874_v1, %s2582_s24  ;;  %2062 = vmatpush3.bf16.msra.mxu0 %v2303_v3  ;;  %v338_v5 = vld [vmem:[%s284_s15] sm:$0xff]  ;;  %s2585_s9 = smov 116   ;;  %s2586_s11 = smov 112   ;;  %v2591_v59 = vmov -inf   ;;  %413 = vst.msk [vmem:[#allocation6] sm:$0xff] %vm404_vm5, %v2580_v0  ;;  %414 = vst.msk [vmem:[#allocation6 + $0x8] sm:$0xff] %vm404_vm5, %v2580_v0 }
  0xa0   : > { %2063 = vmatprep.subr.bf16.mxu0 %v2580_v0  ;;  %v339_v6 = vpack.c.bf16 %v338_v5, %v338_v5  ;;  %s2587_s2 = smov 108   ;;  %s2588_s17 = smov 104   ;;  %405 = vst.msk [vmem:[#allocation5] sm:$0xff] %vm404_vm5, %v2591_v59  ;;  %406 = vst.msk [vmem:[#allocation5 + $0x8] sm:$0xff] %vm404_vm5, %v2591_v59  ;;  %v2592_v60 = vmov 0   ;;  %vm620_vm6 = vcmask 1043456  }
  0xa1   : > { %s2589_s22 = smov 100   ;;  %s2590_s8 = smov 64   ;;  %407 = vst.msk [vmem:[#allocation5 + $0x10] sm:$0xff] %vm404_vm5, %v2591_v59  ;;  %408 = vst.msk [vmem:[#allocation5 + $0x18] sm:$0xff] %vm404_vm5, %v2591_v59  ;;  %2299 = vset.pattern.permute.xlu0 %v2592_v60  ;;  %2300 = vset.pattern.permute.xlu1 %v2592_v60  ;;  %vm809_vm7 = vcmask 64544   ;;  %vm952_vm8 = vcmask 97344  }
  0xa2   : > { %409 = vst.msk [vmem:[#allocation5 + $0x20] sm:$0xff] %vm404_vm5, %v2591_v59  ;;  %410 = vst.msk [vmem:[#allocation5 + $0x28] sm:$0xff] %vm404_vm5, %v2591_v59  ;;  %s2593_s14 = smov 4   ;;  %s2594_s30 = smov 8   ;;  %vm1095_vm9 = vcmask 130144   ;;  %vm1238_vm10 = vcmask 162944  }
  0xa3   : > { %440 = vrot.lane.b32.xlu0 %v2876_v2, %s2582_s24  ;;  %2064 = vmatpush3.bf16.msra.mxu0 %v2304_v4  ;;  %411 = vst.msk [vmem:[#allocation5 + $0x30] sm:$0xff] %vm404_vm5, %v2591_v59  ;;  %412 = vst.msk [vmem:[#allocation5 + $0x38] sm:$0xff] %vm404_vm5, %v2591_v59  ;;  %s2595_s12 = smov 20   ;;  %s2596_s13 = smov 12   ;;  %vm1381_vm11 = vcmask 195744   ;;  %vm1524_vm12 = vcmask 228544  }
  0xa4   : > { %2077 = vmatprep.subr.bf16.mxu0 %v2580_v0  ;;  %415 = vst.msk [vmem:[#allocation6 + $0x10] sm:$0xff] %vm404_vm5, %v2580_v0  ;;  %416 = vst.msk [vmem:[#allocation6 + $0x18] sm:$0xff] %vm404_vm5, %v2580_v0  ;;  %s2597_s15 = smov 16   ;;  %s2598_s28 = smov 24   ;;  %vm1667_vm13 = vcmask 261344  }
  0xa5   : > { %417 = vst.msk [vmem:[#allocation6 + $0x20] sm:$0xff] %vm404_vm5, %v2580_v0  ;;  %418 = vst.msk [vmem:[#allocation6 + $0x28] sm:$0xff] %vm404_vm5, %v2580_v0  ;;  %s2599_s16 = smov 28   ;;  %p3328_p6 = scmp.ne.s32.totalorder %s3320_s6, 0 }
  0xa6   : > { %2066 = vmatmul.mubr.msk.bf16.vlgmr.msra.gmra.mrb[0].mxu0 %vm356_vm0, %v339_v6  ;;  %419 = vst.msk [vmem:[#allocation6 + $0x30] sm:$0xff] %vm404_vm5, %v2580_v0  ;;  %420 = vst.msk [vmem:[#allocation6 + $0x38] sm:$0xff] %vm404_vm5, %v2580_v0 }
  0xa7   : > { %2081 = vmatprep.mubr.msk.bf16.mxu0 %vm2581_vm1, %v2580_v0 }
  0xa9   : > { %v3063_v59 = vld [vmem:[#allocation5 + $0x28] sm:$0xff] }
 0x111   : > { %v439_v7 = vpop.permute.xlu0 %438 }
 0x112   : > { %2070 = vmatpush3.bf16.msra.mxu1 %v439_v7 }
 0x113   : > { %2071 = vmatprep.subr.bf16.mxu1 %v2580_v0 }
 0x115   : > { %v441_v9 = vpop.permute.xlu0 %440 }
 0x116   : > { %2072 = vmatpush3.bf16.msra.mxu1 %v441_v9 }
 0x117   : > { %2085 = vmatprep.subr.bf16.mxu1 %v2580_v0 }
 0x119   : > { %2074 = vmatmul.mubr.msk.bf16.vlgmr.msra.gmra.mrb[0].mxu1 %vm356_vm0, %v2888_v10 }
 0x11a   : > { %2087 = vmatprep.mubr.msk.bf16.mxu1 %vm2581_vm1, %v2580_v0 }
 0x179   : > { %v394_v11 = vpop.f32.mrb[0].mxu0 }
 0x17a   : > { %v400_v12 = vmul.f32 0.5, %v394_v11  ;;  %v2067_v13 = vpop.f32.mrb[1].mxu0 }
 0x17b   : > { %v397_v14 = vpop.f32.mrb[2].mxu0 }
 0x17c   : > { %v401_v15 = vpack.c.bf16 %v400_v12, %v400_v12  ;;  %v2068_v16 = vpop.f32.mrb[3].mxu0 }
 0x17e   : > { %403 = vst.msk [vmem:[#allocation2] sm:$0xf] %vm402_vm2, %v401_v15 }
 0x185   : > { %v2305_v23 = vld [vmem:[#allocation2] ss:$0 sps:$4 sm:$0xff]  }
 0x186   : > { %v2306_v24 = vld [vmem:[#allocation2] ss:$0 sps:$4 sm:$0xff]  }
 0x187   : > { %v536_v25 = vld [vmem:[#allocation2] sm:$0xf] }
 0x188   : > { %v2307_v26 = vld [vmem:[#allocation2] ss:$0 sps:$4 sm:$0xff]  }
 0x189   : > { %v2308_v27 = vld [vmem:[#allocation2] ss:$0 sps:$4 sm:$0xff]  }
 0x18a   : > { %v2309_v28 = vld [vmem:[#allocation2] ss:$0 sps:$4 sm:$0xff]  }
 0x18b   : > { %v2310_v29 = vld [vmem:[#allocation2] ss:$0 sps:$4 sm:$0xff]  }
 0x18c   : > { %v2311_v30 = vld [vmem:[#allocation2] ss:$0 sps:$4 sm:$0xff]  }
 0x1ec   : > { %v482_v17 = vpop.f32.mrb[0].mxu1 }
 0x1ed   : > { %v488_v18 = vpack.c.bf16 %v482_v17, %v482_v17  ;;  %v2075_v19 = vpop.f32.mrb[1].mxu1 }
 0x1ee   : > { %v485_v20 = vpop.f32.mrb[2].mxu1 }
 0x1ef   : > { %818 = vrot.lane.b32.xlu0 %v488_v18, %s2583_s26  ;;  %674 = vrot.lane.b32.xlu1 %v488_v18, %s2584_s29  ;;  %v2076_v21 = vpop.f32.mrb[3].mxu1  ;;  %v542_v22 = vsel %vm537_vm3, %v488_v18, 0 }
 0x1f0   : > { %2086 = vmatpush3.bf16.xpose.msra.mxu1 %v542_v22 }
 0x1f1   : > { %2097 = vmatprep.subr.bf16.mxu1 %v2580_v0 }
 0x1f3   : > { %961 = vrot.lane.b32.xlu0 %v488_v18, %s2585_s9  ;;  %671 = vrot.lane.b32.xlu1 %v2305_v23, %s2584_s29 }
 0x1f7   : > { %1104 = vrot.lane.b32.xlu0 %v488_v18, %s2586_s11  ;;  %816 = vrot.lane.b32.xlu1 %v2306_v24, %s2583_s26 }
 0x1f8   : > { %2088 = vmatmul.mubr.msk.bf16.vlgmr.msra.gmra.mrb[4].mxu1 %vm537_vm3, %v536_v25 }
 0x1f9   : > { %2099 = vmatprep.mubr.msk.bf16.mxu1 %vm2581_vm1, %v2580_v0 }
 0x1fb   : > { %1247 = vrot.lane.b32.xlu0 %v488_v18, %s2587_s2  ;;  %959 = vrot.lane.b32.xlu1 %v2307_v26, %s2585_s9 }
 0x1ff   : > { %1390 = vrot.lane.b32.xlu0 %v488_v18, %s2588_s17  ;;  %1102 = vrot.lane.b32.xlu1 %v2308_v27, %s2586_s11 }
 0x203   : > { %1533 = vrot.lane.b32.xlu0 %v488_v18, %s2589_s22  ;;  %1245 = vrot.lane.b32.xlu1 %v2309_v28, %s2587_s2  ;;  %v3001_v18 = vld [vmem:[#allocation5] sm:$0xff] }
 0x207   : > { %1388 = vrot.lane.b32.xlu1 %v2310_v29, %s2588_s17  ;;  %489 = vrot.lane.b32.xlu0 %v2874_v1, %s2590_s8 }
 0x20b   : > { %1531 = vrot.lane.b32.xlu1 %v2311_v30, %s2589_s22 }
 0x20f   : > { %491 = vrot.lane.b32.xlu1 %v2876_v2, %s2590_s8 }
 0x261   : > { %v819_v31 = vpop.permute.xlu0 %818  ;;  %v675_v32 = vpop.permute.xlu1 %674 }
 0x262   : > { %v680_v33 = vsel %vm537_vm3, %v675_v32, 0  ;;  %v824_v38 = vsel %vm537_vm3, %v819_v31, 0 }
 0x263   : > { %2098 = vmatpush3.bf16.xpose.msra.mxu1 %v680_v33 }
 0x264   : > { %2109 = vmatprep.subr.bf16.mxu1 %v2580_v0 }
 0x265   : > { %v962_v34 = vpop.permute.xlu0 %961  ;;  %v672_v35 = vpop.permute.xlu1 %671 }
 0x266   : > { %v967_v43 = vsel %vm537_vm3, %v962_v34, 0 }
 0x269   : > { %v1105_v36 = vpop.permute.xlu0 %1104  ;;  %v817_v37 = vpop.permute.xlu1 %816 }
 0x26a   : > { %2100 = vmatmul.mubr.msk.bf16.vlgmr.msra.gmra.mrb[8].mxu1 %vm537_vm3, %v672_v35  ;;  %v1110_v48 = vsel %vm537_vm3, %v1105_v36, 0 }
 0x26b   : > { %2110 = vmatpush3.bf16.xpose.msra.mxu1 %v824_v38  ;;  %2111 = vmatprep.mubr.msk.bf16.mxu1 %vm2581_vm1, %v2580_v0 }
 0x26c   : > { %2121 = vmatprep.subr.bf16.mxu1 %v2580_v0 }
 0x26d   : > { %v1248_v39 = vpop.permute.xlu0 %1247  ;;  %v960_v40 = vpop.permute.xlu1 %959 }
 0x26e   : > { %v1253_v51 = vsel %vm537_vm3, %v1248_v39, 0 }
 0x271   : > { %v1391_v41 = vpop.permute.xlu0 %1390  ;;  %v1103_v42 = vpop.permute.xlu1 %1102 }
 0x272   : > { %2112 = vmatmul.mubr.msk.bf16.vlgmr.msra.gmra.mrb[12].mxu1 %vm537_vm3, %v817_v37  ;;  %v1396_v52 = vsel %vm537_vm3, %v1391_v41, 0 }
 0x273   : > { %2122 = vmatpush3.bf16.xpose.msra.mxu1 %v967_v43  ;;  %2123 = vmatprep.mubr.msk.bf16.mxu1 %vm2581_vm1, %v2580_v0  ;;  %v3028_v43 = vld [vmem:[#allocation5 + $0x8] sm:$0xff] }
 0x274   : > { %2133 = vmatprep.subr.bf16.mxu1 %v2580_v0 }
 0x275   : > { %v1534_v44 = vpop.permute.xlu0 %1533  ;;  %v1246_v45 = vpop.permute.xlu1 %1245 }
 0x276   : > { %v1539_v53 = vsel %vm537_vm3, %v1534_v44, 0 }
 0x279   : > { %v1389_v46 = vpop.permute.xlu1 %1388  ;;  %v490_v47 = vpop.permute.xlu0 %489 }
 0x27a   : > { %2124 = vmatmul.mubr.msk.bf16.vlgmr.msra.gmra.mrb[16].mxu1 %vm537_vm3, %v960_v40  ;;  %2078 = vmatpush3.bf16.msra.mxu0 %v490_v47  ;;  %v867_v47 = vld [vmem:[#allocation5 + $0x10] sm:$0xff] }
 0x27b   : > { %2134 = vmatpush3.bf16.xpose.msra.mxu1 %v1110_v48  ;;  %2135 = vmatprep.mubr.msk.bf16.mxu1 %vm2581_vm1, %v2580_v0 }
 0x27c   : > { %2145 = vmatprep.subr.bf16.mxu1 %v2580_v0  ;;  %2079 = vmatprep.subr.bf16.mxu0 %v2580_v0 }
 0x27d   : > { %v1532_v49 = vpop.permute.xlu1 %1531 }
 0x281   : > { %v492_v50 = vpop.permute.xlu1 %491 }
 0x282   : > { %2136 = vmatmul.mubr.msk.bf16.vlgmr.msra.gmra.mrb[20].mxu1 %vm537_vm3, %v1103_v42  ;;  %2080 = vmatpush3.bf16.msra.mxu0 %v492_v50  ;;  %v3039_v50 = vld [vmem:[#allocation5 + $0x18] sm:$0xff] }
 0x283   : > { %2146 = vmatpush3.bf16.xpose.msra.mxu1 %v1253_v51  ;;  %2147 = vmatprep.mubr.msk.bf16.mxu1 %vm2581_vm1, %v2580_v0 }
 0x284   : > { %2157 = vmatprep.subr.bf16.mxu1 %v2580_v0  ;;  %2091 = vmatprep.subr.bf16.mxu0 %v2580_v0 }
 0x285   : > { %2082 = vmatmul.mubr.msk.bf16.vlgmr.msra.gmra.mrb[4].mxu0 %vm356_vm0, %v2888_v10 }
 0x286   : > { %2093 = vmatprep.mubr.msk.bf16.mxu0 %vm2581_vm1, %v2580_v0 }
 0x28a   : > { %2148 = vmatmul.mubr.msk.bf16.vlgmr.msra.gmra.mrb[24].mxu1 %vm537_vm3, %v1246_v45 }
 0x28b   : > { %2158 = vmatpush3.bf16.xpose.msra.mxu1 %v1396_v52  ;;  %2159 = vmatprep.mubr.msk.bf16.mxu1 %vm2581_vm1, %v2580_v0 }
 0x28c   : > { %2169 = vmatprep.subr.bf16.mxu1 %v2580_v0 }
 0x292   : > { %2160 = vmatmul.mubr.msk.bf16.vlgmr.msra.gmra.mrb[28].mxu1 %vm537_vm3, %v1389_v46 }
 0x293   : > { %2170 = vmatpush3.bf16.xpose.msra.mxu1 %v1539_v53  ;;  %2171 = vmatprep.mubr.msk.bf16.mxu1 %vm2581_vm1, %v2580_v0 }
 0x294   : > { %2181 = vmatprep.subr.bf16.mxu1 %v2580_v0 }
 0x29a   : > { %2172 = vmatmul.mubr.msk.bf16.vlgmr.msra.gmra.mrb[32].mxu1 %vm537_vm3, %v1532_v49 }
 0x29b   : > { %2185 = vmatprep.mubr.msk.bf16.mxu1 %vm2581_vm1, %v2580_v0 }
 0x2cb   : > { %v2957_v54 = vpop.f32.mrb[4].mxu1 }
 0x2cc   : > { %v2089_v55 = vpop.f32.mrb[5].mxu1  ;;  %v586_v56 = vsel %vm585_vm4, %v2957_v54, -inf }
 0x2cd   : > { %587 = vmax.xlane.f32.xlu0 %v586_v56  ;;  %v581_v57 = vpop.f32.mrb[6].mxu1  ;;  %v3051_v55 = vld [vmem:[#allocation5 + $0x20] sm:$0xff] }
 0x2ce   : > { %v2090_v58 = vpop.f32.mrb[7].mxu1 }
 0x33d   : > { %v2985_v61 = vpop.f32.mrb[8].mxu1 }
 0x33e   : > { %v2101_v62 = vpop.f32.mrb[9].mxu1  ;;  %v724_v63 = vsel %vm585_vm4, %v2985_v61, -inf }
 0x33f   : > { %725 = vmax.xlane.f32.xlu1 %v724_v63  ;;  %v719_v1 = vpop.f32.mrb[10].mxu1 }
 0x340   : > { %v2102_v2 = vpop.f32.mrb[11].mxu1  ;;  %v3077_v1 = vld [vmem:[#allocation5 + $0x30] sm:$0xff] }
 0x345   : > { %v2989_v3 = vpop.f32.mrb[12].mxu1 }
 0x346   : > { %v2113_v4 = vpop.f32.mrb[13].mxu1  ;;  %v868_v5 = vsel %vm585_vm4, %v2989_v3, -inf }
 0x347   : > { %869 = vmax.xlane.f32.xlu0 %v868_v5  ;;  %v863_v6 = vpop.f32.mrb[14].mxu1 }
 0x348   : > { %v2114_v7 = vpop.f32.mrb[15].mxu1 }
 0x34d   : > { %v2993_v8 = vpop.f32.mrb[16].mxu1 }
 0x34e   : > { %v2125_v9 = vpop.f32.mrb[17].mxu1  ;;  %v1011_v10 = vsel %vm585_vm4, %v2993_v8, -inf }
 0x34f   : > { %1012 = vmax.xlane.f32.xlu0 %v1011_v10  ;;  %v1006_v11 = vpop.f32.mrb[18].mxu1 }
 0x350   : > { %v2126_v12 = vpop.f32.mrb[19].mxu1  ;;  %v3095_v11 = vld [vmem:[#allocation5 + $0x38] sm:$0xff] }
 0x355   : > { %v2997_v13 = vpop.f32.mrb[20].mxu1 }
 0x356   : > { %v2137_v14 = vpop.f32.mrb[21].mxu1  ;;  %v1154_v15 = vsel %vm585_vm4, %v2997_v13, -inf }
 0x357   : > { %1155 = vmax.xlane.f32.xlu1 %v1154_v15  ;;  %v1149_v16 = vpop.f32.mrb[22].mxu1 }
 0x358   : > { %v2138_v17 = vpop.f32.mrb[23].mxu1  ;;  %v529_v19 = vpop.f32.mrb[4].mxu0 }
 0x359   : > { %v2083_v20 = vpop.f32.mrb[5].mxu0  ;;  %v3003_v22 = vpack.c.bf16 %v529_v19, %v529_v19 }
 0x35a   : > { %v588_v21 = vpop.xlane.xlu0 %587  ;;  %v532_v23 = vpop.f32.mrb[6].mxu0 }
 0x35b   : > { %v3006_v24 = vmax.f32 %v3001_v18, %v588_v21  ;;  %v2084_v25 = vpop.f32.mrb[7].mxu0  ;;  %v622_v28 = vsel %vm620_vm6, %v3003_v22, 0 }
 0x35c   : > { %2092 = vmatpush3.bf16.msra.mxu0 %v622_v28 }
 0x35d   : > { %v590_v26 = vsub.f32 %v3001_v18, %v3006_v24  ;;  %666 = vst.msk [vmem:[#allocation5] sm:$0xff] %vm404_vm5, %v3006_v24  ;;  %v3012_v27 = vpop.f32.mrb[24].mxu1  ;;  %2103 = vmatprep.subr.bf16.mxu0 %v2580_v0 }
 0x35e   : > { %v2149_v29 = vpop.f32.mrb[25].mxu1  ;;  %v1297_v30 = vsel %vm585_vm4, %v3012_v27, -inf }
 0x35f   : > { %1298 = vmax.xlane.f32.xlu0 %v1297_v30  ;;  %v1292_v31 = vpop.f32.mrb[26].mxu1  ;;  %v591_v10 = vmul.f32 1.442695, %v590_v26 }
 0x360   : > { %v2150_v32 = vpop.f32.mrb[27].mxu1 }
 0x365   : > { %v3019_v33 = vpop.f32.mrb[28].mxu1 }
 0x366   : > { %v2161_v34 = vpop.f32.mrb[29].mxu1  ;;  %v1440_v35 = vsel %vm585_vm4, %v3019_v33, -inf }
 0x367   : > { %1441 = vmax.xlane.f32.xlu1 %v1440_v35  ;;  %v1435_v36 = vpop.f32.mrb[30].mxu1 }
 0x368   : > { %v2162_v37 = vpop.f32.mrb[31].mxu1 }
 0x36d   : > { %v3023_v38 = vpop.f32.mrb[32].mxu1 }
 0x36e   : > { %v2173_v39 = vpop.f32.mrb[33].mxu1  ;;  %v1583_v40 = vsel %vm585_vm4, %v3023_v38, -inf }
 0x36f   : > { %1584 = vmax.xlane.f32.xlu1 %v1583_v40  ;;  %v1578_v41 = vpop.f32.mrb[34].mxu1 }
 0x370   : > { %v2174_v42 = vpop.f32.mrb[35].mxu1 }
 0x375   : > { %595 = vperm.xlu0 %2299, %v3006_v24  }
 0x3cc   : > { %v726_v44 = vpop.xlane.xlu1 %725 }
 0x3cd   : > { %v3031_v45 = vmax.f32 %v3028_v43, %v726_v44 }
 0x3cf   : > { %v728_v46 = vsub.f32 %v3028_v43, %v3031_v45  ;;  %811 = vst.msk [vmem:[#allocation5 + $0x8] sm:$0xff] %vm404_vm5, %v3031_v45  ;;  %733 = vperm.xlu1 %2300, %v3031_v45  }
 0x3d4   : > { %v870_v48 = vpop.xlane.xlu0 %869 }
 0x3d5   : > { %v871_v49 = vmax.f32 %v867_v47, %v870_v48 }
 0x3d7   : > { %954 = vst.msk [vmem:[#allocation5 + $0x10] sm:$0xff] %vm404_vm5, %v871_v49  ;;  %877 = vperm.xlu1 %2300, %v871_v49  }
 0x3db   : > { %756 = vrot.lane.b32.xlu1 %v3003_v22, %s2584_s29  ;;  %s332_s29 = scalar_lea.vmem [#allocation15], %s2844_s7 }
 0x3dc   : > { %v1013_v51 = vpop.xlane.xlu0 %1012 }
 0x3dd   : > { %v3044_v52 = vmax.f32 %v3039_v50, %v1013_v51 }
 0x3df   : > { %v1015_v53 = vsub.f32 %v3039_v50, %v3044_v52  ;;  %1097 = vst.msk [vmem:[#allocation5 + $0x18] sm:$0xff] %vm404_vm5, %v3044_v52  ;;  %1020 = vperm.xlu1 %2300, %v3044_v52  }
 0x3e1   : > { %v1016_v45 = vmul.f32 1.442695, %v1015_v53 }
 0x3e3   : > { %899 = vrot.lane.b32.xlu1 %v3003_v22, %s2583_s26  ;;  %s2014_s26 = sshll.u32 %s2564_s21, 7  ;;  %s1823_s21 = scalar_lea.sflag [#allocation9], %s2841_s3 }
 0x3e4   : > { %v1156_v56 = vpop.xlane.xlu1 %1155 }
 0x3e5   : > { %v3056_v57 = vmax.f32 %v3051_v55, %v1156_v56 }
 0x3e7   : > { %v1158_v58 = vsub.f32 %v3051_v55, %v3056_v57  ;;  %1240 = vst.msk [vmem:[#allocation5 + $0x20] sm:$0xff] %vm404_vm5, %v3056_v57  ;;  %1163 = vperm.xlu1 %2300, %v3056_v57   ;;  %v1170_v57 = vld [vmem:[#allocation6 + $0x20] sm:$0xff] }
 0x3eb   : > { %1042 = vrot.lane.b32.xlu1 %v3003_v22, %s2585_s9  ;;  %s1837_s9 = sshll.u32 %s332_s29, 4  ;;  %s3249_s9 = int_to_ptr.vmem [resolvable:$true] %s1837_s9 }
 0x3ec   : > { %v1299_v60 = vpop.xlane.xlu0 %1298  ;;  %s2478_s7 = scalar_lea.vmem %s3249_s9, 128 }
 0x3ed   : > { %v3068_v62 = vmax.f32 %v3063_v59, %v1299_v60  ;;  %p2479_p1 = scmp.ne.s32.totalorder %s3249_s9, %s2478_s7 }
 0x3ef   : > { %v1301_v63 = vsub.f32 %v3063_v59, %v3068_v62  ;;  %1383 = vst.msk [vmem:[#allocation5 + $0x28] sm:$0xff] %vm404_vm5, %v3068_v62  ;;  %1306 = vperm.xlu0 %2299, %v3068_v62   ;;  %1185 = vrot.lane.b32.xlu1 %v3003_v22, %s2586_s11  ;;  %v1313_v59 = vld [vmem:[#allocation6 + $0x28] sm:$0xff]  ;;  %p2480_p10 = pnand %p2479_p1, %p3328_p6 }
 0x3f1   : > { %p2481_p3 = pneg %p2480_p10 }
 0x3f3   : > { %1328 = vrot.lane.b32.xlu1 %v3003_v22, %s2587_s2 }
 0x3f4   : > { %v596_v2 = vpop.permute.xlu0 %595  ;;  %v1442_v4 = vpop.xlane.xlu1 %1441 }
 0x3f5   : > { %v598_v5 = vsub.f32 %v2957_v54, %v596_v2  ;;  %v3083_v6 = vmax.f32 %v3077_v1, %v1442_v4  ;;  %v872_v54 = vsub.f32 %v867_v47, %v871_v49 }
 0x3f7   : > { %v599_v7 = vmul.f32 1.442695, %v598_v5  ;;  %v1444_v9 = vsub.f32 %v3077_v1, %v3083_v6  ;;  %1526 = vst.msk [vmem:[#allocation5 + $0x30] sm:$0xff] %vm404_vm5, %v3083_v6  ;;  %1449 = vperm.xlu0 %2299, %v3083_v6   ;;  %1471 = vrot.lane.b32.xlu1 %v3003_v22, %s2588_s17  ;;  %v873_v12 = vmul.f32 1.442695, %v872_v54  ;;  %s3247_s17 = scalar_lea.hbm %s3302_s5, %s2014_s26 }
 0x3f9   : > { %2314 = vpow2.f32 %v599_v7 }
 0x3fa   : > { %2316 = vpow2.f32 %v591_v10 }
 0x3fb   : > { %2318 = vpow2.f32 %v873_v12 }
 0x3fc   : > { %v1585_v14 = vpop.xlane.xlu1 %1584 }
 0x3fd   : > { %v3098_v15 = vmax.f32 %v3095_v11, %v1585_v14 }
 0x3ff   : > { %v1587_v16 = vsub.f32 %v3095_v11, %v3098_v15  ;;  %1669 = vst.msk [vmem:[#allocation5 + $0x38] sm:$0xff] %vm404_vm5, %v3098_v15  ;;  %1592 = vperm.xlu0 %2299, %v3098_v15  }
 0x403   : > { %v2315_v17 = vpop.eup %2314  ;;  %1614 = vrot.lane.b32.xlu0 %v3003_v22, %s2589_s22  ;;  %v729_v22 = vmul.f32 1.442695, %v728_v46  ;;  %s2600_s22 = smov [#allocation15]  }
 0x404   : > { %v616_v18 = vpack.c.bf16 %v2315_v17, %v2315_v17  ;;  %v3107_v19 = vpop.eup %2316  ;;  %v603_v21 = vsel %vm585_vm4, %v2315_v17, 0.0  ;;  %s2482_s8 = sshll.u32 %s2600_s22, 4  ;;  %s2483_s8 = int_to_ptr.vmem [resolvable:$false] %s2482_s8 }
 0x405   : > { %v3113_v20 = vpop.eup %2318  ;;  %2320 = vpow2.f32 %v729_v22  ;;  %p2485_p4 = scmp.lt.s32.totalorder %s3249_s9, %s2483_s8 }
 0x406   : > { %2094 = vmatmul.mubr.msk.bf16.vlgmr.msra.gmra.mrb[8].mxu0 %vm585_vm4, %v616_v18 }
 0x407   : > { %612 = vperm.xlu0 %2299, %v3107_v19   ;;  %2105 = vmatprep.mubr.msk.bf16.mxu0 %vm2581_vm1, %v2580_v0 }
 0x40b   : > { %894 = vperm.xlu0 %2299, %v3113_v20  }
 0x40f   : > { %v3120_v23 = vpop.eup %2320 }
 0x41b   : > { %604 = vadd.xlane.f32.xlu1 %v603_v21 }
 0x42c   : > { %750 = vperm.xlu1 %2300, %v3120_v23  }
 0x44e   : > { %v734_v24 = vpop.permute.xlu1 %733 }
 0x44f   : > { %v736_v25 = vsub.f32 %v2985_v61, %v734_v24 }
 0x451   : > { %v737_v26 = vmul.f32 1.442695, %v736_v25 }
 0x453   : > { %2322 = vpow2.f32 %v737_v26 }
 0x456   : > { %v878_v28 = vpop.permute.xlu1 %877 }
 0x457   : > { %v880_v29 = vsub.f32 %v2989_v3, %v878_v28 }
 0x459   : > { %v881_v30 = vmul.f32 1.442695, %v880_v29 }
 0x45a   : > { %v757_v31 = vpop.permute.xlu1 %756 }
 0x45b   : > { %2324 = vpow2.f32 %v881_v30  ;;  %v762_v32 = vsel %vm620_vm6, %v757_v31, 0 }
 0x45c   : > { %2104 = vmatpush3.bf16.msra.mxu0 %v762_v32 }
 0x45d   : > { %v2323_v34 = vpop.eup %2322  ;;  %2115 = vmatprep.subr.bf16.mxu0 %v2580_v0 }
 0x45e   : > { %v1021_v35 = vpop.permute.xlu1 %1020  ;;  %v742_v36 = vsel %vm585_vm4, %v2323_v34, 0.0  ;;  %v754_v37 = vpack.c.bf16 %v2323_v34, %v2323_v34 }
 0x45f   : > { %v1023_v61 = vsub.f32 %v2993_v8, %v1021_v35  ;;  %743 = vadd.xlane.f32.xlu0 %v742_v36  ;;  %v601_v35 = vld [vmem:[#allocation6] sm:$0xff] }
 0x460   : > { %2106 = vmatmul.mubr.msk.bf16.vlgmr.msra.gmra.mrb[12].mxu0 %vm585_vm4, %v754_v37  ;;  %v602_v36 = vmul.f32 %v3107_v19, %v601_v35 }
 0x461   : > { %v1024_v39 = vmul.f32 1.442695, %v1023_v61  ;;  %2117 = vmatprep.mubr.msk.bf16.mxu0 %vm2581_vm1, %v2580_v0 }
 0x462   : > { %v900_v3 = vpop.permute.xlu1 %899 }
 0x463   : > { %2326 = vpow2.f32 %v1024_v39  ;;  %v905_v40 = vsel %vm620_vm6, %v900_v3, 0  ;;  %v609_v39 = vld [vmem:[#allocation3] sm:$0xff] }
 0x464   : > { %2116 = vmatpush3.bf16.msra.mxu0 %v905_v40 }
 0x465   : > { %v2325_v41 = vpop.eup %2324  ;;  %2127 = vmatprep.subr.bf16.mxu0 %v2580_v0 }
 0x466   : > { %v1164_v42 = vpop.permute.xlu1 %1163  ;;  %v886_v43 = vsel %vm585_vm4, %v2325_v41, 0.0  ;;  %v898_v44 = vpack.c.bf16 %v2325_v41, %v2325_v41 }
 0x467   : > { %v1166_v8 = vsub.f32 %v2997_v13, %v1164_v42  ;;  %887 = vadd.xlane.f32.xlu1 %v886_v43 }
 0x468   : > { %2118 = vmatmul.mubr.msk.bf16.vlgmr.msra.gmra.mrb[16].mxu0 %vm585_vm4, %v898_v44 }
 0x469   : > { %v1167_v46 = vmul.f32 1.442695, %v1166_v8  ;;  %2129 = vmatprep.mubr.msk.bf16.mxu0 %vm2581_vm1, %v2580_v0 }
 0x46a   : > { %v1043_v47 = vpop.permute.xlu1 %1042 }
 0x46b   : > { %2328 = vpow2.f32 %v1167_v46  ;;  %v1048_v48 = vsel %vm620_vm6, %v1043_v47, 0  ;;  %v740_v46 = vld [vmem:[#allocation6 + $0x8] sm:$0xff] }
 0x46c   : > { %2128 = vmatpush3.bf16.msra.mxu0 %v1048_v48  ;;  %2330 = vpow2.f32 %v1016_v45  ;;  %v741_v47 = vmul.f32 %v3120_v23, %v740_v46  ;;  %v1302_v23 = vmul.f32 1.442695, %v1301_v63 }
 0x46d   : > { %v2327_v49 = vpop.eup %2326  ;;  %2139 = vmatprep.subr.bf16.mxu0 %v2580_v0 }
 0x46e   : > { %v1307_v13 = vpop.permute.xlu0 %1306  ;;  %v1186_v51 = vpop.permute.xlu1 %1185  ;;  %v1029_v56 = vsel %vm585_vm4, %v2327_v49, 0.0  ;;  %v1041_v60 = vpack.c.bf16 %v2327_v49, %v2327_v49 }
 0x46f   : > { %v1309_v50 = vsub.f32 %v3012_v27, %v1307_v13  ;;  %v1191_v52 = vsel %vm620_vm6, %v1186_v51, 0  ;;  %1030 = vadd.xlane.f32.xlu0 %v1029_v56  ;;  %v884_v13 = vld [vmem:[#allocation6 + $0x10] sm:$0xff]  ;;  %v1159_v51 = vmul.f32 1.442695, %v1158_v58 }
 0x470   : > { %2130 = vmatmul.mubr.msk.bf16.vlgmr.msra.gmra.mrb[20].mxu0 %vm585_vm4, %v1041_v60  ;;  %v885_v56 = vmul.f32 %v3113_v20, %v884_v13 }
 0x471   : > { %v1310_v53 = vmul.f32 1.442695, %v1309_v50  ;;  %2140 = vmatpush3.bf16.msra.mxu0 %v1191_v52  ;;  %2141 = vmatprep.mubr.msk.bf16.mxu0 %vm2581_vm1, %v2580_v0  ;;  %v1027_v52 = vld [vmem:[#allocation6 + $0x18] sm:$0xff] }
 0x472   : > { %2151 = vmatprep.subr.bf16.mxu0 %v2580_v0  ;;  %v1329_v4 = vpop.permute.xlu1 %1328 }
 0x473   : > { %2332 = vpow2.f32 %v1310_v53  ;;  %v1334_v12 = vsel %vm620_vm6, %v1329_v4, 0 }
 0x475   : > { %v2329_v2 = vpop.eup %2328 }
 0x476   : > { %v1450_v5 = vpop.permute.xlu0 %1449  ;;  %v1172_v7 = vsel %vm585_vm4, %v2329_v2, 0.0  ;;  %v1184_v10 = vpack.c.bf16 %v2329_v2, %v2329_v2  ;;  %v3152_v27 = vpop.eup %2330 }
 0x477   : > { %v1452_v54 = vsub.f32 %v3019_v33, %v1450_v5  ;;  %1173 = vadd.xlane.f32.xlu0 %v1172_v7  ;;  %v1472_v18 = vpop.permute.xlu1 %1471  ;;  %v1028_v53 = vmul.f32 %v3152_v27, %v1027_v52 }
 0x478   : > { %1037 = vperm.xlu1 %2300, %v3152_v27   ;;  %2142 = vmatmul.mubr.msk.bf16.vlgmr.msra.gmra.mrb[24].mxu0 %vm585_vm4, %v1184_v10  ;;  %v1477_v25 = vsel %vm620_vm6, %v1472_v18, 0  ;;  %v1588_v27 = vmul.f32 1.442695, %v1587_v16 }
 0x479   : > { %v1453_v14 = vmul.f32 1.442695, %v1452_v54  ;;  %2152 = vmatpush3.bf16.msra.mxu0 %v1334_v12  ;;  %2153 = vmatprep.mubr.msk.bf16.mxu0 %vm2581_vm1, %v2580_v0 }
 0x47a   : > { %2163 = vmatprep.subr.bf16.mxu0 %v2580_v0 }
 0x47b   : > { %2334 = vpow2.f32 %v1453_v14  ;;  %v1599_v14 = vld [vmem:[#allocation6 + $0x38] sm:$0xff] }
 0x47d   : > { %v2333_v17 = vpop.eup %2332 }
 0x47e   : > { %v1593_v21 = vpop.permute.xlu0 %1592  ;;  %v1315_v33 = vsel %vm585_vm4, %v2333_v17, 0.0  ;;  %v1327_v22 = vpack.c.bf16 %v2333_v17, %v2333_v17 }
 0x47f   : > { %v1595_v24 = vsub.f32 %v3023_v38, %v1593_v21  ;;  %1316 = vadd.xlane.f32.xlu0 %v1315_v33 }
 0x480   : > { %2154 = vmatmul.mubr.msk.bf16.vlgmr.msra.gmra.mrb[28].mxu0 %vm585_vm4, %v1327_v22 }
 0x481   : > { %v1596_v26 = vmul.f32 1.442695, %v1595_v24  ;;  %2164 = vmatpush3.bf16.msra.mxu0 %v1477_v25  ;;  %2165 = vmatprep.mubr.msk.bf16.mxu0 %vm2581_vm1, %v2580_v0 }
 0x482   : > { %2175 = vmatprep.subr.bf16.mxu0 %v2580_v0  ;;  %v1615_v29 = vpop.permute.xlu0 %1614 }
 0x483   : > { %2336 = vpow2.f32 %v1596_v26  ;;  %v1620_v38 = vsel %vm620_vm6, %v1615_v29, 0 }
 0x484   : > { %2338 = vpow2.f32 %v1159_v51 }
 0x485   : > { %v3168_v28 = vpop.eup %2334  ;;  %2340 = vpow2.f32 %v1302_v23 }
 0x486   : > { %v1470_v30 = vpack.c.bf16 %v3168_v28, %v3168_v28  ;;  %v613_v3 = vpop.permute.xlu0 %612  ;;  %2342 = vpow2.f32 %v1588_v27 }
 0x487   : > { %v615_v40 = vmul.f32 %v613_v3, %v609_v39 }
 0x488   : > { %2166 = vmatmul.mubr.msk.bf16.vlgmr.msra.gmra.mrb[32].mxu0 %vm585_vm4, %v1470_v30 }
 0x489   : > { %2176 = vmatpush3.bf16.msra.mxu0 %v1620_v38  ;;  %2177 = vmatprep.mubr.msk.bf16.mxu0 %vm2581_vm1, %v2580_v0 }
 0x48a   : > { %v3181_v45 = vpop.permute.xlu0 %894 }
 0x48d   : > { %v2337_v31 = vpop.eup %2336 }
 0x48e   : > { %v1613_v32 = vpack.c.bf16 %v2337_v31, %v2337_v31  ;;  %v1601_v34 = vsel %vm585_vm4, %v2337_v31, 0.0  ;;  %v3197_v55 = vpop.eup %2338 }
 0x48f   : > { %v1171_v58 = vmul.f32 %v3197_v55, %v1170_v57  ;;  %v3201_v7 = vpop.eup %2340 }
 0x490   : > { %2178 = vmatmul.mubr.msk.bf16.vlgmr.msra.gmra.mrb[36].mxu0 %vm585_vm4, %v1613_v32  ;;  %v1314_v62 = vmul.f32 %v3201_v7, %v1313_v59  ;;  %v2343_v54 = vpop.eup %2342 }
 0x491   : > { %v1600_v17 = vmul.f32 %v2343_v54, %v1599_v14 }
 0x49c   : > { %1602 = vadd.xlane.f32.xlu1 %v1601_v34 }
 0x4a8   : > { %v605_v37 = vpop.xlane.xlu1 %604 }
 0x4a9   : > { %v606_v61 = vadd.f32 %v605_v37, %v602_v36 }
 0x4ab   : > { %608 = vst.msk [vmem:[#allocation6] sm:$0xff] %vm404_vm5, %v606_v61 }
 0x4ac   : > { %v3185_v49 = vpop.permute.xlu1 %750 }
 0x4d9   : > { %v658_v41 = vpop.f32.mrb[8].mxu0 }
 0x4da   : > { %v664_v42 = vadd.f32 %v658_v41, %v615_v40  ;;  %v2095_v43 = vpop.f32.mrb[9].mxu0  ;;  %v1674_v40 = vld [vmem:[#allocation6] sm:$0xff]  ;;  %v1458_v41 = vsel %vm585_vm4, %v3168_v28, 0.0 }
 0x4db   : > { %v661_v44 = vpop.f32.mrb[10].mxu0 }
 0x4dc   : > { %665 = vst.msk [vmem:[#allocation3] sm:$0xff] %vm537_vm3, %v664_v42  ;;  %v2096_v8 = vpop.f32.mrb[11].mxu0 }
 0x4e3   : > { %v747_v6 = vld [vmem:[#allocation3] sm:$0xff] }
 0x4ec   : > { %v744_v19 = vpop.xlane.xlu0 %743 }
 0x4ed   : > { %v745_v48 = vadd.f32 %v744_v19, %v741_v47 }
 0x4ef   : > { %746 = vst.msk [vmem:[#allocation6 + $0x8] sm:$0xff] %vm404_vm5, %v745_v48 }
 0x4f4   : > { %v888_v60 = vpop.xlane.xlu1 %887 }
 0x4f5   : > { %v889_v50 = vadd.f32 %v888_v60, %v885_v56  ;;  %v1445_v56 = vmul.f32 1.442695, %v1444_v9  ;;  %v753_v9 = vmul.f32 %v3185_v49, %v747_v6 }
 0x4f6   : > { %v1684_v60 = vld [vmem:[#allocation6 + $0x8] sm:$0xff] }
 0x4f7   : > { %890 = vst.msk [vmem:[#allocation6 + $0x10] sm:$0xff] %vm404_vm5, %v889_v50  ;;  %2344 = vpow2.f32 %v1445_v56 }
 0x4f8   : > { %v3208_v12 = vpop.permute.xlu1 %1037 }
 0x4fc   : > { %v1031_v2 = vpop.xlane.xlu0 %1030 }
 0x4fd   : > { %v1032_v4 = vadd.f32 %v1031_v2, %v1028_v53 }
 0x4fe   : > { %v1694_v43 = vld [vmem:[#allocation6 + $0x10] sm:$0xff] }
 0x4ff   : > { %1033 = vst.msk [vmem:[#allocation6 + $0x18] sm:$0xff] %vm404_vm5, %v1032_v4 }
 0x501   : > { %v2345_v28 = vpop.eup %2344 }
 0x504   : > { %v1174_v20 = vpop.xlane.xlu0 %1173 }
 0x505   : > { %v1175_v5 = vadd.f32 %v1174_v20, %v1171_v58  ;;  %v1456_v58 = vld [vmem:[#allocation6 + $0x30] sm:$0xff] }
 0x506   : > { %v1704_v50 = vld [vmem:[#allocation6 + $0x18] sm:$0xff]  ;;  %v1457_v20 = vmul.f32 %v2345_v28, %v1456_v58 }
 0x507   : > { %1176 = vst.msk [vmem:[#allocation6 + $0x20] sm:$0xff] %vm404_vm5, %v1175_v5 }
 0x50c   : > { %v1317_v63 = vpop.xlane.xlu0 %1316 }
 0x50d   : > { %v1318_v10 = vadd.f32 %v1317_v63, %v1314_v62 }
 0x50e   : > { %v1714_v47 = vld [vmem:[#allocation6 + $0x20] sm:$0xff] }
 0x50f   : > { %1319 = vst.msk [vmem:[#allocation6 + $0x28] sm:$0xff] %vm404_vm5, %v1318_v10 }
 0x516   : > { %v1724_v52 = vld [vmem:[#allocation6 + $0x28] sm:$0xff] }
 0x529   : > { %v1603_v18 = vpop.xlane.xlu1 %1602 }
 0x52a   : > { %v1604_v21 = vadd.f32 %v1603_v18, %v1600_v17 }
 0x52c   : > { %1605 = vst.msk [vmem:[#allocation6 + $0x38] sm:$0xff] %vm404_vm5, %v1604_v21 }
 0x533   : > { %v798_v33 = vpop.f32.mrb[12].mxu0  ;;  %v1744_v1 = vld [vmem:[#allocation6 + $0x38] sm:$0xff] }
 0x534   : > { %805 = vrot.lane.b32.xlu0 %v798_v33, %s2593_s14  ;;  %v2107_v22 = vpop.f32.mrb[13].mxu0  ;;  %v2312_v33 = vld [vmem:[#allocation13] sm:$0xff]   ;;  %s2484_s14 = scalar_lea.vmem %s2483_s8, 256 }
 0x535   : > { %v801_v24 = vpop.f32.mrb[14].mxu0  ;;  %2182 = vmatpush3.bf16.msra.mxu1 %v2312_v33  ;;  %p2486_p9 = scmp.lt.s32.totalorder %s2484_s14, %s2478_s7 }
 0x536   : > { %v2108_v25 = vpop.f32.mrb[15].mxu0  ;;  %v2313_v24 = vld [vmem:[#allocation13 + $0x8] sm:$0xff]   ;;  %2183 = vmatprep.subr.bf16.mxu1 %v2580_v0 }
 0x537   : > { %p2487_p5 = por %p2486_p9, %p2485_p4 }
 0x539   : > { %2184 = vmatpush3.bf16.msra.mxu1 %v2313_v24  ;;  %p2488_p7 = pnand %p2487_p5, %p2481_p3 }
 0x53b   : > { %v941_v26 = vpop.f32.mrb[16].mxu0 }
 0x53c   : > { %948 = vrot.lane.b32.xlu0 %v941_v26, %s2594_s30  ;;  %v2119_v11 = vpop.f32.mrb[17].mxu0 }
 0x53d   : > { %v944_v15 = vpop.f32.mrb[18].mxu0 }
 0x53e   : > { %v2120_v16 = vpop.f32.mrb[19].mxu0 }
 0x543   : > { %v1084_v29 = vpop.f32.mrb[20].mxu0 }
 0x544   : > { %v2131_v30 = vpop.f32.mrb[21].mxu0 }
 0x545   : > { %v1087_v38 = vpop.f32.mrb[22].mxu0 }
 0x546   : > { %v2132_v31 = vpop.f32.mrb[23].mxu0 }
 0x54b   : > { %v1227_v32 = vpop.f32.mrb[24].mxu0 }
 0x54c   : > { %v2143_v34 = vpop.f32.mrb[25].mxu0 }
 0x54d   : > { %v1230_v35 = vpop.f32.mrb[26].mxu0 }
 0x54e   : > { %v2144_v36 = vpop.f32.mrb[27].mxu0 }
 0x553   : > { %v1370_v37 = vpop.f32.mrb[28].mxu0 }
 0x554   : > { %1377 = vrot.lane.b32.xlu1 %v1370_v37, %s2595_s12  ;;  %v2155_v61 = vpop.f32.mrb[29].mxu0 }
 0x555   : > { %v1373_v39 = vpop.f32.mrb[30].mxu0 }
 0x556   : > { %v2156_v3 = vpop.f32.mrb[31].mxu0 }
 0x558   : > { %1677 = vperm.xlu1 %2300, %v1674_v40  }
 0x55b   : > { %1459 = vadd.xlane.f32.xlu0 %v1458_v41  ;;  %v1513_v42 = vpop.f32.mrb[32].mxu0 }
 0x55c   : > { %1697 = vperm.xlu1 %2300, %v1694_v43   ;;  %v2167_v44 = vpop.f32.mrb[33].mxu0 }
 0x55d   : > { %v1516_v8 = vpop.f32.mrb[34].mxu0 }
 0x55e   : > { %v2168_v46 = vpop.f32.mrb[35].mxu0 }
 0x560   : > { %1717 = vperm.xlu1 %2300, %v1714_v47  }
 0x563   : > { %v1656_v19 = vpop.f32.mrb[36].mxu0 }
 0x564   : > { %v2179_v48 = vpop.f32.mrb[37].mxu0 }
 0x565   : > { %v1659_v13 = vpop.f32.mrb[38].mxu0 }
 0x566   : > { %v2180_v51 = vpop.f32.mrb[39].mxu0 }
 0x571   : > { %1091 = vrot.lane.b32.xlu0 %v1084_v29, %s2596_s13 }
 0x575   : > { %1180 = vperm.xlu0 %2299, %v3197_v55  }
 0x579   : > { %1234 = vrot.lane.b32.xlu0 %v1227_v32, %s2597_s15 }
 0x57d   : > { %1323 = vperm.xlu0 %2299, %v3201_v7  }
 0x581   : > { %1466 = vperm.xlu0 %2299, %v2345_v28  }
 0x585   : > { %1609 = vperm.xlu0 %2299, %v2343_v54  }
 0x589   : > { %1687 = vperm.xlu0 %2299, %v1684_v60  }
 0x58d   : > { %1707 = vperm.xlu0 %2299, %v1704_v50  }
 0x591   : > { %1520 = vrot.lane.b32.xlu0 %v1513_v42, %s2598_s28 }
 0x595   : > { %1727 = vperm.xlu0 %2299, %v1724_v52  }
 0x599   : > { %1663 = vrot.lane.b32.xlu0 %v1656_v19, %s2599_s16 }
 0x59d   : > { %1747 = vperm.xlu0 %2299, %v1744_v1  }
 0x5a6   : > { %v806_v23 = vpop.permute.xlu0 %805 }
 0x5a7   : > { %v808_v53 = vadd.f32 %v806_v23, %v753_v9  ;;  %v2009_v23 = vld [vmem:[%s3301_s4] ss:$0 sm:$0xff] }
 0x5a9   : > { %810 = vst.msk [vmem:[#allocation3] sm:$0xff] %vm809_vm7, %v808_v53 }
 0x5ae   : > { %v949_v55 = vpop.permute.xlu0 %948 }
 0x5b0   : > { %v891_v2 = vld [vmem:[#allocation3] sm:$0xff] }
 0x5b1   : > { %v897_v4 = vmul.f32 %v3181_v45, %v891_v2 }
 0x5b3   : > { %v951_v57 = vadd.f32 %v949_v55, %v897_v4 }
 0x5b5   : > { %953 = vst.msk [vmem:[#allocation3] sm:$0xff] %vm952_vm8, %v951_v57 }
 0x5bc   : > { %v1034_v7 = vld [vmem:[#allocation3] sm:$0xff] }
 0x5bd   : > { %v1040_v49 = vmul.f32 %v3208_v12, %v1034_v7 }
 0x5c6   : > { %v1378_v25 = vpop.permute.xlu1 %1377 }
 0x5d7   : > { %v1678_v31 = vpop.permute.xlu1 %1677 }
 0x5d8   : > { %2346 = vrcp.f32 %v1678_v31 }
 0x5db   : > { %v1698_v35 = vpop.permute.xlu1 %1697 }
 0x5df   : > { %v1718_v61 = vpop.permute.xlu1 %1717 }
 0x5e2   : > { %v2347_v3 = vpop.eup %2346 }
 0x5e8   : > { %v1460_v5 = vpop.xlane.xlu0 %1459 }
 0x5e9   : > { %v1461_v59 = vadd.f32 %v1460_v5, %v1457_v20 }
 0x5eb   : > { %1462 = vst.msk [vmem:[#allocation6 + $0x30] sm:$0xff] %vm404_vm5, %v1461_v59 }
 0x5ec   : > { %v1092_v62 = vpop.permute.xlu0 %1091 }
 0x5ed   : > { %v1094_v63 = vadd.f32 %v1092_v62, %v1040_v49 }
 0x5ef   : > { %1096 = vst.msk [vmem:[#allocation3] sm:$0xff] %vm1095_vm9, %v1094_v63 }
 0x5f2   : > { %v1734_v45 = vld [vmem:[#allocation6 + $0x30] sm:$0xff] }
 0x5f3   : > { %1737 = vperm.xlu1 %2300, %v1734_v45  }
 0x5f4   : > { %v1181_v10 = vpop.permute.xlu0 %1180 }
 0x5f6   : > { %v1177_v27 = vld [vmem:[#allocation3] sm:$0xff] }
 0x5f7   : > { %v1183_v54 = vmul.f32 %v1181_v10, %v1177_v27 }
 0x5f8   : > { %v1235_v14 = vpop.permute.xlu0 %1234 }
 0x5f9   : > { %v1237_v17 = vadd.f32 %v1235_v14, %v1183_v54 }
 0x5fb   : > { %1239 = vst.msk [vmem:[#allocation3] sm:$0xff] %vm1238_vm10, %v1237_v17 }
 0x5fc   : > { %v1324_v18 = vpop.permute.xlu0 %1323 }
 0x600   : > { %v1467_v21 = vpop.permute.xlu0 %1466 }
 0x602   : > { %v1320_v22 = vld [vmem:[#allocation3] sm:$0xff] }
 0x603   : > { %v1326_v12 = vmul.f32 %v1324_v18, %v1320_v22 }
 0x604   : > { %v1610_v26 = vpop.permute.xlu0 %1609 }
 0x605   : > { %v1380_v11 = vadd.f32 %v1378_v25, %v1326_v12 }
 0x607   : > { %1382 = vst.msk [vmem:[#allocation3] sm:$0xff] %vm1381_vm11, %v1380_v11 }
 0x608   : > { %v1688_v15 = vpop.permute.xlu0 %1687 }
 0x609   : > { %2348 = vrcp.f32 %v1688_v15 }
 0x60a   : > { %2350 = vrcp.f32 %v1698_v35 }
 0x60c   : > { %v1708_v16 = vpop.permute.xlu0 %1707 }
 0x60d   : > { %2352 = vrcp.f32 %v1708_v16 }
 0x60e   : > { %v1463_v29 = vld [vmem:[#allocation3] sm:$0xff]  ;;  %2354 = vrcp.f32 %v1718_v61 }
 0x60f   : > { %v1469_v30 = vmul.f32 %v1467_v21, %v1463_v29 }
 0x610   : > { %v1521_v38 = vpop.permute.xlu0 %1520 }
 0x611   : > { %v1523_v32 = vadd.f32 %v1521_v38, %v1469_v30 }
 0x613   : > { %1525 = vst.msk [vmem:[#allocation3] sm:$0xff] %vm1524_vm12, %v1523_v32  ;;  %v2349_v40 = vpop.eup %2348 }
 0x614   : > { %v1728_v34 = vpop.permute.xlu0 %1727  ;;  %v2351_v44 = vpop.eup %2350 }
 0x615   : > { %2356 = vrcp.f32 %v1728_v34 }
 0x617   : > { %v2353_v8 = vpop.eup %2352 }
 0x618   : > { %v1664_v0 = vpop.permute.xlu0 %1663  ;;  %v2355_v47 = vpop.eup %2354 }
 0x61a   : > { %v1606_v36 = vld [vmem:[#allocation3] sm:$0xff] }
 0x61b   : > { %v1612_v37 = vmul.f32 %v1610_v26, %v1606_v36 }
 0x61c   : > { %v1748_v56 = vpop.permute.xlu0 %1747 }
 0x61d   : > { %v1666_v39 = vadd.f32 %v1664_v0, %v1612_v37  ;;  %2358 = vrcp.f32 %v1748_v56 }
 0x61f   : > { %1668 = vst.msk [vmem:[#allocation3] sm:$0xff] %vm1667_vm13, %v1666_v39  ;;  %v2357_v48 = vpop.eup %2356 }
 0x626   : > { %v1673_v41 = vld [vmem:[#allocation3] sm:$0xff] }
 0x627   : > { %v1681_v42 = vmul.f32 %v2347_v3, %v1673_v41  ;;  %v1691_v43 = vmul.f32 %v2349_v40, %v1673_v41  ;;  %v1701_v46 = vmul.f32 %v2351_v44, %v1673_v41  ;;  %v1711_v19 = vmul.f32 %v2353_v8, %v1673_v41  ;;  %v2359_v60 = vpop.eup %2358 }
 0x628   : > { %v1721_v13 = vmul.f32 %v2355_v47, %v1673_v41  ;;  %v1731_v51 = vmul.f32 %v2357_v48, %v1673_v41  ;;  %v1751_v1 = vmul.f32 %v2359_v60, %v1673_v41 }
 0x629   : > { %1682 = vst.msk [vmem:[#allocation4] sm:$0xff] %vm537_vm3, %v1681_v42 }
 0x62a   : > { %1692 = vst.msk [vmem:[#allocation4] sm:$0xff] %vm809_vm7, %v1691_v43 }
 0x62b   : > { %1702 = vst.msk [vmem:[#allocation4] sm:$0xff] %vm952_vm8, %v1701_v46 }
 0x62c   : > { %1712 = vst.msk [vmem:[#allocation4] sm:$0xff] %vm1095_vm9, %v1711_v19 }
 0x62d   : > { %1722 = vst.msk [vmem:[#allocation4] sm:$0xff] %vm1238_vm10, %v1721_v13 }
 0x62e   : > { %1732 = vst.msk [vmem:[#allocation4] sm:$0xff] %vm1381_vm11, %v1731_v51 }
 0x672   : > { %v1738_v28 = vpop.permute.xlu1 %1737 }
 0x673   : > { %2360 = vrcp.f32 %v1738_v28 }
 0x67d   : > { %v2361_v50 = vpop.eup %2360 }
 0x67e   : > { %v1741_v52 = vmul.f32 %v2361_v50, %v1673_v41 }
 0x680   : > { %1742 = vst.msk [vmem:[#allocation4] sm:$0xff] %vm1524_vm12, %v1741_v52 }
 0x681   : > { %1752 = vst.msk [vmem:[#allocation4] sm:$0xff] %vm1667_vm13, %v1751_v1 }
 0x688   : > { %v1753_v6 = vld [vmem:[#allocation4] sm:$0xff] }
 0x689   : > { %v1754_v9 = vpack.c.bf16 %v1753_v6, %v1753_v6 }
 0x68b   : > { %2186 = vmatmul.mubr.msk.bf16.vlgmr.msra.gmra.mrb[36].mxu1 %vm356_vm0, %v1754_v9 }
 0x75e   : > { %v1815_v53 = vpop.f32.mrb[36].mxu1 }
 0x75f   : > { %v1816_v2 = vadd.f32 %v2009_v23, %v1815_v53  ;;  %v2187_v4 = vpop.f32.mrb[37].mxu1 }
 0x760   : > { %v1818_v55 = vpop.f32.mrb[38].mxu1 }
 0x761   : > { %v2188_v57 = vpop.f32.mrb[39].mxu1  ;;  %1821 = vst.msk [vmem:[%s332_s29] sm:$0xff] %vm356_vm0, %v1816_v2 }
 0x762   : > { %2491 = shalt.err (!%p2488_p7)
}
 0x763   : > { %s2492_s3 = scalar_lea.hbm %s3247_s17, 128  ;;  %s2496_s13 = scalar_lea.hbm %s3302_s5, 256 }
 0x764   : > { %p2493_p13 = scmp.ne.s32.totalorder %s3247_s17, %s2492_s3  ;;  %p2497_p2 = scmp.lt.u32.totalorder %s3247_s17, %s3302_s5 }
 0x765   : > { %p2498_p12 = scmp.lt.u32.totalorder %s2496_s13, %s2492_s3  ;;  %p2500_p1 = scmp.lt.u32.totalorder %s2492_s3, %s3247_s17 }
 0x766   : > { %p2494_p8 = pnand %p2493_p13, %p3328_p6 }
 0x767   : > { %p2499_p0 = por %p2498_p12, %p2497_p2 }
 0x768   : > { %p2495_p11 = pneg %p2494_p8 }
 0x769   : > { %p2501_p10 = por %p2500_p1, %p2499_p0 }
 0x76b   : > { %p2502_p3 = pnand %p2501_p10, %p2495_p11 }
 0x76d   : > { %2505 = shalt.err (!%p2502_p3)
}
 0x76e   : > { %2201 = dma.vmem_to_hbm [thread:$0]  (%p3328_p6), %s3249_s9, 128, %s3247_s17, %s1823_s21  }
 0x76f PF: > { %s1849_s16 = sand.u32 1, %s2552_s18   ;;  %p3329_p4 = scmp.ne.s32.totalorder %s3313_s27, 0 }
 0x770   : > { %p3330_p9 = scmp.ge.s32.totalorder %s2572_s23, 2  ;;  %s1850_s10 = scalar_lea.sflag [#allocation9], %s1849_s16 }
 0x772   : > { %p2218_p5 = pnand %p3330_p9, %p3329_p4 }
 0x774   : > { %2547 = dma.done.wait (!%p2218_p5), %s1850_s10, 128  }
 0x775   : > { %2549 = vsyncadd (!%p2218_p5), %s1850_s10, 4294967168  ;;  %s25_s23 = sadd.s32 1, %s2572_s23   ;;  %s3331_s21 = sld [smem:[#allocation21_spill]] }
 0x776   : > { %p22_p7 = scmp.ge.s32.totalorder %s25_s23, 4   ;;  %s3332_s22 = sld [smem:[#allocation22_spill]] }
 0x777   : > { %s3333_s18 = smov %s2556_s19  ;;  %s3334_s19 = smov %s2560_s20 }
 0x778   : > { %s3335_s20 = smov %s2771_s25  ;;  %24 = sbr.rel (!%p22_p7) target bundleno = 12 (0xc), region = 128 }
 0x77f   :  { %1855 = vsyncpa [#allocation8], 1 }
 0x780   :  { %1857 = vsyncpa [#allocation8 + $0x1], 1 }
 0x781   :  { %1858 = vsyncpa [#allocation11], 1 }
 0x782   :  { %1860 = vsyncpa [#allocation11 + $0x1], 1 }
 0x783   :  { %1861 = vsyncpa [#allocation14], 1 }
 0x784   :  { %1862 = vsyncpa [#allocation9], 1 }
 0x785   :  { %1864 = vsyncpa [#allocation9 + $0x1], 1 }

</bundles_post_ra>
